<compile_context>
chip_gen: v7x
topology: tpu7x:2x2x1
jax: 0.10.0
libtpu: 0.0.40
codegen_flags: <defaults>
</compile_context>

<pallas_src>
import numpy as np
import jax
import jax.numpy as jnp
from jax.experimental import pallas as pl
from jax.experimental.pallas import tpu as pltpu  # noqa: F401  (TPU backend)

# ----------------------------- configuration --------------------------------
B = 2            # batch
NV1 = 64         # input vertex count
NV2 = 64         # output vertex count
BNECK = 8        # bottleneck
VS = [32, 16, 8]     # vertex-dim sequence
FS = [8, 16, 32]     # feature-dim sequence
NEG_SLOPE = 0.01     # nn.LeakyReLU default

# (Cin, Cout, Lin, Lout, batchnorm, activation, skip_split)
BLOCKS_STATIC = [
    (3,        FS[0], NV1,   VS[0], True,  True,  False),   # encoder 0
    (FS[0],    FS[1], VS[0], VS[1], True,  True,  False),   # encoder 1
    (FS[1],    FS[2], VS[1], VS[2], True,  True,  False),   # encoder 2
    (FS[2],    FS[1], VS[2], VS[1], True,  True,  False),   # decoder1 block
    (2 * FS[1], FS[0], VS[1], VS[0], True,  True,  True),    # decoder2 block 1 (skip)
    (2 * FS[0], 3,     VS[0], NV2,   False, False, True),    # decoder2 block 2 (skip)
]


# ------------------------------- fused kernel --------------------------------
def fused_kernel(*refs):
    it = iter(refs)
    x_ref = next(it)       # (B, NV1, 3)   -- (batch, length, channel)
    eps_ref = next(it)     # (B, 1, BNECK)

    blk_refs = []
    for (_cin, _cout, _lin, _lout, bn, _act, split) in BLOCKS_STATIC:
        r = {}
        if split:
            r["wtap_h"] = next(it)     # (3, cin_h, cout)  decoder-path half
            r["wtap_s"] = next(it)     # (3, cin_s, cout)  skip half
        else:
            r["wtap"] = next(it)       # (3, cin, cout)
        r["wdstack"] = next(it)        # (3, lout, lin) = [wd_prev, wd, wd_next]
        r["bfull"] = next(it)          # (lout, cout)  folded conv + linear bias
        if bn:
            r["scale"] = next(it)      # (1, cout)
            r["shift"] = next(it)      # (1, cout)
        blk_refs.append(r)

    wenc3_ref = next(it)   # (VS[-1], FS[-1], BNECK)
    benc_ref = next(it)    # (1, BNECK)
    wmuT_ref = next(it)    # (BNECK, BNECK)
    bmu_ref = next(it)     # (1, BNECK)
    wlvT_ref = next(it)    # (BNECK, BNECK)
    blv_ref = next(it)     # (1, BNECK)
    wdec3_ref = next(it)   # (VS[-1], BNECK, FS[-1])
    bdec_ref = next(it)    # (VS[-1], FS[-1])
    o_ref = next(it)       # (B, NV2, 3)

    def conv_block(idx, a, skip=None):
        """One S/TConvBlock in (length, channel) layout.

        The zero-padded +/-1 length shifts of the 3-tap conv are absorbed into
        pre-shifted copies of the length-Linear weight (wdstack), so
          z = sum_k wdstack[k] @ (a @ wtap[k]) + bfull
        reproduces Linear_len(Conv1d_k3s1p1(a) + conv_bias) + linear_bias exactly.
        """
        _cin, _cout, _lin, _lout, bn, act, split = BLOCKS_STATIC[idx]
        r = blk_refs[idx]
        z = r["bfull"][...]                                    # (lout, cout)
        for k in range(3):
            if split:
                ck = (jnp.dot(a, r["wtap_h"][k], preferred_element_type=jnp.float32)
                      + jnp.dot(skip, r["wtap_s"][k], preferred_element_type=jnp.float32))
            else:
                ck = jnp.dot(a, r["wtap"][k], preferred_element_type=jnp.float32)
            z = z + jnp.dot(r["wdstack"][k], ck, preferred_element_type=jnp.float32)
        if act:                                                # LeakyReLU(0.01)
            z = jnp.where(z >= 0, z, NEG_SLOPE * z)
        if bn:                                                 # eval-mode BatchNorm1d
            z = z * r["scale"][...] + r["shift"][...]
        return z                                               # (lout, cout)

    bsz = x_ref.shape[0]
    # row-index map used to extract / scatter single length rows (no reshapes)
    ridx = jax.lax.broadcasted_iota(jnp.int32, (VS[-1], FS[-1]), 0)

    for b in range(bsz):                                       # B=2, unrolled at trace time
        # Permute(1, 0): free -- (length, channel) is our working layout.
        h = x_ref[b]                                           # (NV1, 3)

        skips = []
        for i in range(3):                                     # encoder
            h = conv_block(i, h)
            skips.append(h)

        # nn.Flatten + Linear(vs*fs -> bneck): contract (l, c) jointly by
        # extracting one length-row at a time with an iota mask (no reshape).
        lat = benc_ref[...]                                    # (1, BNECK)
        for l in range(VS[-1]):
            row = jnp.where(ridx == l, h, 0.0).sum(axis=0, keepdims=True)   # (1, FS[-1])
            lat = lat + jnp.dot(row, wenc3_ref[l], preferred_element_type=jnp.float32)

        # fc_mu / fc_logvar / reparameterize (all fused, EUP exp)
        mu = jnp.dot(lat, wmuT_ref[...], preferred_element_type=jnp.float32) + bmu_ref[...]
        logvar = jnp.dot(lat, wlvT_ref[...], preferred_element_type=jnp.float32) + blv_ref[...]
        zlat = mu + eps_ref[b] * jnp.exp(0.5 * logvar)         # (1, BNECK)

        # Linear(bneck -> fs*vs) + Reshape(fs, vs): scatter rows with an iota mask.
        h = bdec_ref[...]                                      # (VS[-1], FS[-1])
        for l in range(VS[-1]):
            row = jnp.dot(zlat, wdec3_ref[l], preferred_element_type=jnp.float32)  # (1, FS[-1])
            h = h + jnp.where(ridx == l, 1.0, 0.0) * row

        # decoder; U-Net skip channel-concat folded into split conv weights
        h = conv_block(3, h)
        h = conv_block(4, h, skip=skips[1])
        h = conv_block(5, h, skip=skips[0])

        # Permute(1, 0): free -- h is already (NV2, 3).
        o_ref[b] = h


# ------------------------------- wrapper --------------------------------------
def mesh_vunet_forward(params, x, eps):
    """x: (B, NV1, 3) float32; eps: (B, BNECK) float32.  Returns (B, NV2, 3)."""
    b = x.shape[0]
    args = [x.astype(jnp.float32), eps.astype(jnp.float32).reshape(b, 1, BNECK)]
    for blk, (_c, _o, _li, _lo, bn, _a, split) in zip(params["blocks"], BLOCKS_STATIC):
        if split:
            args += [blk["wtap_h"], blk["wtap_s"]]
        else:
            args += [blk["wtap"]]
        args += [blk["wdstack"], blk["bfull"]]
        if bn:
            args += [blk["scale"], blk["shift"]]
    args += [params["wenc3"], params["benc"],
             params["wmuT"], params["bmu"],
             params["wlvT"], params["blv"],
             params["wdec3"], params["bdec"]]
    # Single grid-less pallas_call; every operand is a whole-array VMEM block.
    return pl.pallas_call(
        fused_kernel,
        out_shape=jax.ShapeDtypeStruct((b, NV2, 3), jnp.float32),
    )(*args)


# --------------------------- parameter init ----------------------------------
def init_params(key):
    keys = iter(jax.random.split(key, 256))

    def nk():
        return next(keys)

    def make_block(cfg):
        cin, cout, lin, lout, bn, _act, split = cfg
        # effective conv taps: k=0 multiplies x[l-1], k=1 x[l], k=2 x[l+1]
        w_eff = jax.random.normal(nk(), (3, cout, cin), jnp.float32) / np.sqrt(3 * cin)
        wtapT = jnp.transpose(w_eff, (0, 2, 1))                        # (3, cin, cout)
        bc = 0.01 * jax.random.normal(nk(), (cout,), jnp.float32)
        wd = jax.random.normal(nk(), (lout, lin), jnp.float32) / np.sqrt(lin)
        bd = 0.01 * jax.random.normal(nk(), (lout,), jnp.float32)
        # absorb the +/-1 zero-padded conv shifts into the length-Linear weight
        zero_col = jnp.zeros((lout, 1), jnp.float32)
        wdp = jnp.concatenate([wd[:, 1:], zero_col], axis=1)   # pairs with tap k=0 (x[l-1])
        wdn = jnp.concatenate([zero_col, wd[:, :-1]], axis=1)  # pairs with tap k=2 (x[l+1])
        wdstack = jnp.stack([wdp, wd, wdn], axis=0)            # (3, lout, lin)
        # fold conv bias + linear bias into one (lout, cout) bias
        bfull = bc[None, :] * jnp.sum(wd, axis=1, keepdims=True) + bd[:, None]

        blk = {"wdstack": wdstack, "bfull": bfull}
        raw = {"w_eff": w_eff, "bc": bc, "wd": wd, "bd": bd}
        if split:
            ch = cin // 2
            blk["wtap_h"] = wtapT[:, :ch, :]
            blk["wtap_s"] = wtapT[:, ch:, :]
        else:
            blk["wtap"] = wtapT
        if bn:
            gamma = 1.0 + 0.1 * jax.random.normal(nk(), (cout,), jnp.float32)
            beta = 0.1 * jax.random.normal(nk(), (cout,), jnp.float32)
            rmean = 0.1 * jax.random.normal(nk(), (cout,), jnp.float32)
            rvar = 1.0 + 0.5 * jax.random.uniform(nk(), (cout,), jnp.float32)
            scale = gamma / jnp.sqrt(rvar + 1e-5)
            shift = beta - rmean * scale
            blk["scale"] = scale[None, :]
            blk["shift"] = shift[None, :]
            raw["scale"] = scale
            raw["shift"] = shift
        return blk, raw

    blocks, raws = [], []
    for cfg in BLOCKS_STATIC:
        blk, raw = make_block(cfg)
        blocks.append(blk)
        raws.append(raw)

    din = VS[-1] * FS[-1]
    params = {
        "blocks": blocks,
        "raw": raws,
        # Flatten + Linear(vs*fs -> bneck); weight indexed as [l, c, j]
        "wenc3": jax.random.normal(nk(), (VS[-1], FS[-1], BNECK), jnp.float32) / np.sqrt(din),
        "benc": 0.01 * jax.random.normal(nk(), (1, BNECK), jnp.float32),
        "wmuT": jax.random.normal(nk(), (BNECK, BNECK), jnp.float32) / np.sqrt(BNECK),
        "bmu": 0.01 * jax.random.normal(nk(), (1, BNECK), jnp.float32),
        "wlvT": jax.random.normal(nk(), (BNECK, BNECK), jnp.float32) / np.sqrt(BNECK),
        "blv": 0.01 * jax.random.normal(nk(), (1, BNECK), jnp.float32),
        # Linear(bneck -> fs*vs) + reshape; weight indexed as [l, j, c]
        "wdec3": jax.random.normal(nk(), (VS[-1], BNECK, FS[-1]), jnp.float32) / np.sqrt(BNECK),
        "bdec": 0.01 * jax.random.normal(nk(), (VS[-1], FS[-1]), jnp.float32),
    }
    return params


# --------------------------- pure-JAX reference --------------------------------
def reference_forward(params, x, eps):
    """Original (un-fused) formulation, used only to sanity-check the kernel."""
    HI = jax.lax.Precision.HIGHEST

    def block(h, i):                                   # h: (B, C, L) PyTorch layout
        _cin, _cout, lin, _lout, bn, act, _split = BLOCKS_STATIC[i]
        rb = params["raw"][i]
        xp = jnp.pad(h, ((0, 0), (0, 0), (1, 1)))
        x_r, x_l = xp[:, :, :lin], xp[:, :, 2:]
        y = (jnp.einsum('oc,bcl->bol', rb["w_eff"][0], x_r, precision=HI)
             + jnp.einsum('oc,bcl->bol', rb["w_eff"][1], h, precision=HI)
             + jnp.einsum('oc,bcl->bol', rb["w_eff"][2], x_l, precision=HI))
        y = y + rb["bc"][None, :, None]
        z = jnp.einsum('bcl,Ll->bcL', y, rb["wd"], precision=HI) + rb["bd"][None, None, :]
        if act:
            z = jnp.where(z >= 0, z, NEG_SLOPE * z)
        if bn:
            z = z * rb["scale"][None, :, None] + rb["shift"][None, :, None]
        return z

    h = jnp.transpose(x.astype(jnp.float32), (0, 2, 1))         # Permute(1, 0)
    skips = []
    for i in range(3):
        h = block(h, i)
        skips.append(h)
    lat = jnp.einsum('bcl,lcj->bj', h, params["wenc3"], precision=HI) + params["benc"]
    mu = jnp.dot(lat, params["wmuT"], precision=HI) + params["bmu"]
    logvar = jnp.dot(lat, params["wlvT"], precision=HI) + params["blv"]
    z = mu + eps * jnp.exp(0.5 * logvar)
    d = (jnp.einsum('bj,ljc->bcl', z, params["wdec3"], precision=HI)
         + jnp.transpose(params["bdec"])[None])
    h = block(d, 3)
    h = block(jnp.concatenate([h, skips[1]], axis=1), 4)
    h = block(jnp.concatenate([h, skips[0]], axis=1), 5)
    return jnp.transpose(h, (0, 2, 1))                           # Permute(1, 0)


# --------------------------------- main ---------------------------------------
if __name__ == "__main__":
    key = jax.random.PRNGKey(0)
    pkey, xkey, ekey = jax.random.split(key, 3)

    params = init_params(pkey)
    x = jax.random.normal(xkey, (B, NV1, 3), jnp.float32)
    eps = jax.random.normal(ekey, (B, BNECK), jnp.float32)      # reparameterize noise

    out = mesh_vunet_forward(params, x, eps)
    out = jax.block_until_ready(out)
    assert out.shape == (B, NV2, 3), out.shape
    assert out.dtype == jnp.float32

    ref = jax.block_until_ready(reference_forward(params, x, eps))
    err = float(jnp.max(jnp.abs(out - ref)) / (jnp.max(jnp.abs(ref)) + 1e-6))
    assert err < 0.1, f"numerical mismatch vs pure-JAX reference: rel_err={err}"

    print("KERNEL_OK")
</pallas_src>

<mosaic_0001>
module attributes {stable_mosaic.version = 11 : i64} {
  func.func @fused_kernel(%arg0: memref<2x64x3xf32, #tpu.memory_space<vmem>>, %arg1: memref<2x1x8xf32, #tpu.memory_space<vmem>>, %arg2: memref<3x3x8xf32, #tpu.memory_space<vmem>>, %arg3: memref<3x32x64xf32, #tpu.memory_space<vmem>>, %arg4: memref<32x8xf32, #tpu.memory_space<vmem>>, %arg5: memref<1x8xf32, #tpu.memory_space<vmem>>, %arg6: memref<1x8xf32, #tpu.memory_space<vmem>>, %arg7: memref<3x8x16xf32, #tpu.memory_space<vmem>>, %arg8: memref<3x16x32xf32, #tpu.memory_space<vmem>>, %arg9: memref<16x16xf32, #tpu.memory_space<vmem>>, %arg10: memref<1x16xf32, #tpu.memory_space<vmem>>, %arg11: memref<1x16xf32, #tpu.memory_space<vmem>>, %arg12: memref<3x16x32xf32, #tpu.memory_space<vmem>>, %arg13: memref<3x8x16xf32, #tpu.memory_space<vmem>>, %arg14: memref<8x32xf32, #tpu.memory_space<vmem>>, %arg15: memref<1x32xf32, #tpu.memory_space<vmem>>, %arg16: memref<1x32xf32, #tpu.memory_space<vmem>>, %arg17: memref<3x32x16xf32, #tpu.memory_space<vmem>>, %arg18: memref<3x16x8xf32, #tpu.memory_space<vmem>>, %arg19: memref<16x16xf32, #tpu.memory_space<vmem>>, %arg20: memref<1x16xf32, #tpu.memory_space<vmem>>, %arg21: memref<1x16xf32, #tpu.memory_space<vmem>>, %arg22: memref<3x16x8xf32, #tpu.memory_space<vmem>>, %arg23: memref<3x16x8xf32, #tpu.memory_space<vmem>>, %arg24: memref<3x32x16xf32, #tpu.memory_space<vmem>>, %arg25: memref<32x8xf32, #tpu.memory_space<vmem>>, %arg26: memref<1x8xf32, #tpu.memory_space<vmem>>, %arg27: memref<1x8xf32, #tpu.memory_space<vmem>>, %arg28: memref<3x8x3xf32, #tpu.memory_space<vmem>>, %arg29: memref<3x8x3xf32, #tpu.memory_space<vmem>>, %arg30: memref<3x64x32xf32, #tpu.memory_space<vmem>>, %arg31: memref<64x3xf32, #tpu.memory_space<vmem>>, %arg32: memref<8x32x8xf32, #tpu.memory_space<vmem>>, %arg33: memref<1x8xf32, #tpu.memory_space<vmem>>, %arg34: memref<8x8xf32, #tpu.memory_space<vmem>>, %arg35: memref<1x8xf32, #tpu.memory_space<vmem>>, %arg36: memref<8x8xf32, #tpu.memory_space<vmem>>, %arg37: memref<1x8xf32, #tpu.memory_space<vmem>>, %arg38: memref<8x8x32xf32, #tpu.memory_space<vmem>>, %arg39: memref<8x32xf32, #tpu.memory_space<vmem>>, %arg40: memref<2x64x3xf32, #tpu.memory_space<vmem>>) attributes {dimension_semantics = [], scalar_prefetch = 0 : i64, scratch_operands = 0 : i64, tpu.core_type = #tpu.core_type<tc>} {
    %0 = tpu.iota {dimensions = array<i32: 0>} : vector<8x32xi32>
    %c0 = arith.constant 0 : index
    %c0_0 = arith.constant 0 : index
    %c0_1 = arith.constant 0 : index
    %1 = vector.load %arg0[%c0, %c0_0, %c0_1] : memref<2x64x3xf32, #tpu.memory_space<vmem>>, vector<1x64x3xf32>
    %2 = vector.shape_cast %1 : vector<1x64x3xf32> to vector<64x3xf32>
    %c0_2 = arith.constant 0 : index
    %c0_3 = arith.constant 0 : index
    %3 = vector.load %arg4[%c0_2, %c0_3] : memref<32x8xf32, #tpu.memory_space<vmem>>, vector<32x8xf32>
    %c0_4 = arith.constant 0 : index
    %c0_5 = arith.constant 0 : index
    %c0_6 = arith.constant 0 : index
    %4 = vector.load %arg2[%c0_4, %c0_5, %c0_6] : memref<3x3x8xf32, #tpu.memory_space<vmem>>, vector<1x3x8xf32>
    %5 = vector.shape_cast %4 : vector<1x3x8xf32> to vector<3x8xf32>
    %cst = arith.constant dense<0.000000e+00> : vector<64x8xf32>
    %6 = tpu.matmul %2, %5, %cst {dimension_numbers = #tpu.dot_dimension_numbers<[1], [0], [0], [1], [0, 0, 1, 1], [], []>} : vector<64x3xf32>, vector<3x8xf32>, vector<64x8xf32> -> vector<64x8xf32>
    %c0_7 = arith.constant 0 : index
    %c0_8 = arith.constant 0 : index
    %c0_9 = arith.constant 0 : index
    %7 = vector.load %arg3[%c0_7, %c0_8, %c0_9] : memref<3x32x64xf32, #tpu.memory_space<vmem>>, vector<1x32x64xf32>
    %8 = vector.shape_cast %7 : vector<1x32x64xf32> to vector<32x64xf32>
    %cst_10 = arith.constant dense<0.000000e+00> : vector<32x8xf32>
    %9 = tpu.matmul %8, %6, %cst_10 {dimension_numbers = #tpu.dot_dimension_numbers<[1], [0], [0], [1], [0, 0, 1, 1], [], []>} : vector<32x64xf32>, vector<64x8xf32>, vector<32x8xf32> -> vector<32x8xf32>
    %10 = arith.addf %3, %9 : vector<32x8xf32>
    %c1 = arith.constant 1 : index
    %c0_11 = arith.constant 0 : index
    %c0_12 = arith.constant 0 : index
    %11 = vector.load %arg2[%c1, %c0_11, %c0_12] : memref<3x3x8xf32, #tpu.memory_space<vmem>>, vector<1x3x8xf32>
    %12 = vector.shape_cast %11 : vector<1x3x8xf32> to vector<3x8xf32>
    %cst_13 = arith.constant dense<0.000000e+00> : vector<64x8xf32>
    %13 = tpu.matmul %2, %12, %cst_13 {dimension_numbers = #tpu.dot_dimension_numbers<[1], [0], [0], [1], [0, 0, 1, 1], [], []>} : vector<64x3xf32>, vector<3x8xf32>, vector<64x8xf32> -> vector<64x8xf32>
    %c1_14 = arith.constant 1 : index
    %c0_15 = arith.constant 0 : index
    %c0_16 = arith.constant 0 : index
    %14 = vector.load %arg3[%c1_14, %c0_15, %c0_16] : memref<3x32x64xf32, #tpu.memory_space<vmem>>, vector<1x32x64xf32>
    %15 = vector.shape_cast %14 : vector<1x32x64xf32> to vector<32x64xf32>
    %cst_17 = arith.constant dense<0.000000e+00> : vector<32x8xf32>
    %16 = tpu.matmul %15, %13, %cst_17 {dimension_numbers = #tpu.dot_dimension_numbers<[1], [0], [0], [1], [0, 0, 1, 1], [], []>} : vector<32x64xf32>, vector<64x8xf32>, vector<32x8xf32> -> vector<32x8xf32>
    %17 = arith.addf %10, %16 : vector<32x8xf32>
    %c2 = arith.constant 2 : index
    %c0_18 = arith.constant 0 : index
    %c0_19 = arith.constant 0 : index
    %18 = vector.load %arg2[%c2, %c0_18, %c0_19] : memref<3x3x8xf32, #tpu.memory_space<vmem>>, vector<1x3x8xf32>
    %19 = vector.shape_cast %18 : vector<1x3x8xf32> to vector<3x8xf32>
    %cst_20 = arith.constant dense<0.000000e+00> : vector<64x8xf32>
    %20 = tpu.matmul %2, %19, %cst_20 {dimension_numbers = #tpu.dot_dimension_numbers<[1], [0], [0], [1], [0, 0, 1, 1], [], []>} : vector<64x3xf32>, vector<3x8xf32>, vector<64x8xf32> -> vector<64x8xf32>
    %c2_21 = arith.constant 2 : index
    %c0_22 = arith.constant 0 : index
    %c0_23 = arith.constant 0 : index
    %21 = vector.load %arg3[%c2_21, %c0_22, %c0_23] : memref<3x32x64xf32, #tpu.memory_space<vmem>>, vector<1x32x64xf32>
    %22 = vector.shape_cast %21 : vector<1x32x64xf32> to vector<32x64xf32>
    %cst_24 = arith.constant dense<0.000000e+00> : vector<32x8xf32>
    %23 = tpu.matmul %22, %20, %cst_24 {dimension_numbers = #tpu.dot_dimension_numbers<[1], [0], [0], [1], [0, 0, 1, 1], [], []>} : vector<32x64xf32>, vector<64x8xf32>, vector<32x8xf32> -> vector<32x8xf32>
    %24 = arith.addf %17, %23 : vector<32x8xf32>
    %cst_25 = arith.constant 0.000000e+00 : f32
    %25 = vector.broadcast %cst_25 : f32 to vector<32x8xf32>
    %26 = arith.cmpf oge, %24, %25 : vector<32x8xf32>
    %cst_26 = arith.constant 0.00999999977 : f32
    %27 = vector.broadcast %cst_26 : f32 to vector<32x8xf32>
    %28 = arith.mulf %27, %24 : vector<32x8xf32>
    %29 = arith.select %26, %24, %28 : vector<32x8xi1>, vector<32x8xf32>
    %c0_27 = arith.constant 0 : index
    %c0_28 = arith.constant 0 : index
    %30 = vector.load %arg5[%c0_27, %c0_28] : memref<1x8xf32, #tpu.memory_space<vmem>>, vector<1x8xf32>
    %31 = vector.broadcast %30 : vector<1x8xf32> to vector<32x8xf32>
    %32 = arith.mulf %29, %31 : vector<32x8xf32>
    %c0_29 = arith.constant 0 : index
    %c0_30 = arith.constant 0 : index
    %33 = vector.load %arg6[%c0_29, %c0_30] : memref<1x8xf32, #tpu.memory_space<vmem>>, vector<1x8xf32>
    %34 = vector.broadcast %33 : vector<1x8xf32> to vector<32x8xf32>
    %35 = arith.addf %32, %34 : vector<32x8xf32>
    %c0_31 = arith.constant 0 : index
    %c0_32 = arith.constant 0 : index
    %36 = vector.load %arg9[%c0_31, %c0_32] : memref<16x16xf32, #tpu.memory_space<vmem>>, vector<16x16xf32>
    %c0_33 = arith.constant 0 : index
    %c0_34 = arith.constant 0 : index
    %c0_35 = arith.constant 0 : index
    %37 = vector.load %arg7[%c0_33, %c0_34, %c0_35] : memref<3x8x16xf32, #tpu.memory_space<vmem>>, vector<1x8x16xf32>
    %38 = vector.shape_cast %37 : vector<1x8x16xf32> to vector<8x16xf32>
    %cst_36 = arith.constant dense<0.000000e+00> : vector<32x16xf32>
    %39 = tpu.matmul %35, %38, %cst_36 {dimension_numbers = #tpu.dot_dimension_numbers<[1], [0], [0], [1], [0, 0, 1, 1], [], []>} : vector<32x8xf32>, vector<8x16xf32>, vector<32x16xf32> -> vector<32x16xf32>
    %c0_37 = arith.constant 0 : index
    %c0_38 = arith.constant 0 : index
    %c0_39 = arith.constant 0 : index
    %40 = vector.load %arg8[%c0_37, %c0_38, %c0_39] : memref<3x16x32xf32, #tpu.memory_space<vmem>>, vector<1x16x32xf32>
    %41 = vector.shape_cast %40 : vector<1x16x32xf32> to vector<16x32xf32>
    %cst_40 = arith.constant dense<0.000000e+00> : vector<16x16xf32>
    %42 = tpu.matmul %41, %39, %cst_40 {dimension_numbers = #tpu.dot_dimension_numbers<[1], [0], [0], [1], [0, 0, 1, 1], [], []>} : vector<16x32xf32>, vector<32x16xf32>, vector<16x16xf32> -> vector<16x16xf32>
    %43 = arith.addf %36, %42 : vector<16x16xf32>
    %c1_41 = arith.constant 1 : index
    %c0_42 = arith.constant 0 : index
    %c0_43 = arith.constant 0 : index
    %44 = vector.load %arg7[%c1_41, %c0_42, %c0_43] : memref<3x8x16xf32, #tpu.memory_space<vmem>>, vector<1x8x16xf32>
    %45 = vector.shape_cast %44 : vector<1x8x16xf32> to vector<8x16xf32>
    %cst_44 = arith.constant dense<0.000000e+00> : vector<32x16xf32>
    %46 = tpu.matmul %35, %45, %cst_44 {dimension_numbers = #tpu.dot_dimension_numbers<[1], [0], [0], [1], [0, 0, 1, 1], [], []>} : vector<32x8xf32>, vector<8x16xf32>, vector<32x16xf32> -> vector<32x16xf32>
    %c1_45 = arith.constant 1 : index
    %c0_46 = arith.constant 0 : index
    %c0_47 = arith.constant 0 : index
    %47 = vector.load %arg8[%c1_45, %c0_46, %c0_47] : memref<3x16x32xf32, #tpu.memory_space<vmem>>, vector<1x16x32xf32>
    %48 = vector.shape_cast %47 : vector<1x16x32xf32> to vector<16x32xf32>
    %cst_48 = arith.constant dense<0.000000e+00> : vector<16x16xf32>
    %49 = tpu.matmul %48, %46, %cst_48 {dimension_numbers = #tpu.dot_dimension_numbers<[1], [0], [0], [1], [0, 0, 1, 1], [], []>} : vector<16x32xf32>, vector<32x16xf32>, vector<16x16xf32> -> vector<16x16xf32>
    %50 = arith.addf %43, %49 : vector<16x16xf32>
    %c2_49 = arith.constant 2 : index
    %c0_50 = arith.constant 0 : index
    %c0_51 = arith.constant 0 : index
    %51 = vector.load %arg7[%c2_49, %c0_50, %c0_51] : memref<3x8x16xf32, #tpu.memory_space<vmem>>, vector<1x8x16xf32>
    %52 = vector.shape_cast %51 : vector<1x8x16xf32> to vector<8x16xf32>
    %cst_52 = arith.constant dense<0.000000e+00> : vector<32x16xf32>
    %53 = tpu.matmul %35, %52, %cst_52 {dimension_numbers = #tpu.dot_dimension_numbers<[1], [0], [0], [1], [0, 0, 1, 1], [], []>} : vector<32x8xf32>, vector<8x16xf32>, vector<32x16xf32> -> vector<32x16xf32>
    %c2_53 = arith.constant 2 : index
    %c0_54 = arith.constant 0 : index
    %c0_55 = arith.constant 0 : index
    %54 = vector.load %arg8[%c2_53, %c0_54, %c0_55] : memref<3x16x32xf32, #tpu.memory_space<vmem>>, vector<1x16x32xf32>
    %55 = vector.shape_cast %54 : vector<1x16x32xf32> to vector<16x32xf32>
    %cst_56 = arith.constant dense<0.000000e+00> : vector<16x16xf32>
    %56 = tpu.matmul %55, %53, %cst_56 {dimension_numbers = #tpu.dot_dimension_numbers<[1], [0], [0], [1], [0, 0, 1, 1], [], []>} : vector<16x32xf32>, vector<32x16xf32>, vector<16x16xf32> -> vector<16x16xf32>
    %57 = arith.addf %50, %56 : vector<16x16xf32>
    %cst_57 = arith.constant 0.000000e+00 : f32
    %58 = vector.broadcast %cst_57 : f32 to vector<16x16xf32>
    %59 = arith.cmpf oge, %57, %58 : vector<16x16xf32>
    %cst_58 = arith.constant 0.00999999977 : f32
    %60 = vector.broadcast %cst_58 : f32 to vector<16x16xf32>
    %61 = arith.mulf %60, %57 : vector<16x16xf32>
    %62 = arith.select %59, %57, %61 : vector<16x16xi1>, vector<16x16xf32>
    %c0_59 = arith.constant 0 : index
    %c0_60 = arith.constant 0 : index
    %63 = vector.load %arg10[%c0_59, %c0_60] : memref<1x16xf32, #tpu.memory_space<vmem>>, vector<1x16xf32>
    %64 = vector.broadcast %63 : vector<1x16xf32> to vector<16x16xf32>
    %65 = arith.mulf %62, %64 : vector<16x16xf32>
    %c0_61 = arith.constant 0 : index
    %c0_62 = arith.constant 0 : index
    %66 = vector.load %arg11[%c0_61, %c0_62] : memref<1x16xf32, #tpu.memory_space<vmem>>, vector<1x16xf32>
    %67 = vector.broadcast %66 : vector<1x16xf32> to vector<16x16xf32>
    %68 = arith.addf %65, %67 : vector<16x16xf32>
    %c0_63 = arith.constant 0 : index
    %c0_64 = arith.constant 0 : index
    %69 = vector.load %arg14[%c0_63, %c0_64] : memref<8x32xf32, #tpu.memory_space<vmem>>, vector<8x32xf32>
    %c0_65 = arith.constant 0 : index
    %c0_66 = arith.constant 0 : index
    %c0_67 = arith.constant 0 : index
    %70 = vector.load %arg12[%c0_65, %c0_66, %c0_67] : memref<3x16x32xf32, #tpu.memory_space<vmem>>, vector<1x16x32xf32>
    %71 = vector.shape_cast %70 : vector<1x16x32xf32> to vector<16x32xf32>
    %cst_68 = arith.constant dense<0.000000e+00> : vector<16x32xf32>
    %72 = tpu.matmul %68, %71, %cst_68 {dimension_numbers = #tpu.dot_dimension_numbers<[1], [0], [0], [1], [0, 0, 1, 1], [], []>} : vector<16x16xf32>, vector<16x32xf32>, vector<16x32xf32> -> vector<16x32xf32>
    %c0_69 = arith.constant 0 : index
    %c0_70 = arith.constant 0 : index
    %c0_71 = arith.constant 0 : index
    %73 = vector.load %arg13[%c0_69, %c0_70, %c0_71] : memref<3x8x16xf32, #tpu.memory_space<vmem>>, vector<1x8x16xf32>
    %74 = vector.shape_cast %73 : vector<1x8x16xf32> to vector<8x16xf32>
    %cst_72 = arith.constant dense<0.000000e+00> : vector<8x32xf32>
    %75 = tpu.matmul %74, %72, %cst_72 {dimension_numbers = #tpu.dot_dimension_numbers<[1], [0], [0], [1], [0, 0, 1, 1], [], []>} : vector<8x16xf32>, vector<16x32xf32>, vector<8x32xf32> -> vector<8x32xf32>
    %76 = arith.addf %69, %75 : vector<8x32xf32>
    %c1_73 = arith.constant 1 : index
    %c0_74 = arith.constant 0 : index
    %c0_75 = arith.constant 0 : index
    %77 = vector.load %arg12[%c1_73, %c0_74, %c0_75] : memref<3x16x32xf32, #tpu.memory_space<vmem>>, vector<1x16x32xf32>
    %78 = vector.shape_cast %77 : vector<1x16x32xf32> to vector<16x32xf32>
    %cst_76 = arith.constant dense<0.000000e+00> : vector<16x32xf32>
    %79 = tpu.matmul %68, %78, %cst_76 {dimension_numbers = #tpu.dot_dimension_numbers<[1], [0], [0], [1], [0, 0, 1, 1], [], []>} : vector<16x16xf32>, vector<16x32xf32>, vector<16x32xf32> -> vector<16x32xf32>
    %c1_77 = arith.constant 1 : index
    %c0_78 = arith.constant 0 : index
    %c0_79 = arith.constant 0 : index
    %80 = vector.load %arg13[%c1_77, %c0_78, %c0_79] : memref<3x8x16xf32, #tpu.memory_space<vmem>>, vector<1x8x16xf32>
    %81 = vector.shape_cast %80 : vector<1x8x16xf32> to vector<8x16xf32>
    %cst_80 = arith.constant dense<0.000000e+00> : vector<8x32xf32>
    %82 = tpu.matmul %81, %79, %cst_80 {dimension_numbers = #tpu.dot_dimension_numbers<[1], [0], [0], [1], [0, 0, 1, 1], [], []>} : vector<8x16xf32>, vector<16x32xf32>, vector<8x32xf32> -> vector<8x32xf32>
    %83 = arith.addf %76, %82 : vector<8x32xf32>
    %c2_81 = arith.constant 2 : index
    %c0_82 = arith.constant 0 : index
    %c0_83 = arith.constant 0 : index
    %84 = vector.load %arg12[%c2_81, %c0_82, %c0_83] : memref<3x16x32xf32, #tpu.memory_space<vmem>>, vector<1x16x32xf32>
    %85 = vector.shape_cast %84 : vector<1x16x32xf32> to vector<16x32xf32>
    %cst_84 = arith.constant dense<0.000000e+00> : vector<16x32xf32>
    %86 = tpu.matmul %68, %85, %cst_84 {dimension_numbers = #tpu.dot_dimension_numbers<[1], [0], [0], [1], [0, 0, 1, 1], [], []>} : vector<16x16xf32>, vector<16x32xf32>, vector<16x32xf32> -> vector<16x32xf32>
    %c2_85 = arith.constant 2 : index
    %c0_86 = arith.constant 0 : index
    %c0_87 = arith.constant 0 : index
    %87 = vector.load %arg13[%c2_85, %c0_86, %c0_87] : memref<3x8x16xf32, #tpu.memory_space<vmem>>, vector<1x8x16xf32>
    %88 = vector.shape_cast %87 : vector<1x8x16xf32> to vector<8x16xf32>
    %cst_88 = arith.constant dense<0.000000e+00> : vector<8x32xf32>
    %89 = tpu.matmul %88, %86, %cst_88 {dimension_numbers = #tpu.dot_dimension_numbers<[1], [0], [0], [1], [0, 0, 1, 1], [], []>} : vector<8x16xf32>, vector<16x32xf32>, vector<8x32xf32> -> vector<8x32xf32>
    %90 = arith.addf %83, %89 : vector<8x32xf32>
    %cst_89 = arith.constant 0.000000e+00 : f32
    %91 = vector.broadcast %cst_89 : f32 to vector<8x32xf32>
    %92 = arith.cmpf oge, %90, %91 : vector<8x32xf32>
    %cst_90 = arith.constant 0.00999999977 : f32
    %93 = vector.broadcast %cst_90 : f32 to vector<8x32xf32>
    %94 = arith.mulf %93, %90 : vector<8x32xf32>
    %95 = arith.select %92, %90, %94 : vector<8x32xi1>, vector<8x32xf32>
    %c0_91 = arith.constant 0 : index
    %c0_92 = arith.constant 0 : index
    %96 = vector.load %arg15[%c0_91, %c0_92] : memref<1x32xf32, #tpu.memory_space<vmem>>, vector<1x32xf32>
    %97 = vector.broadcast %96 : vector<1x32xf32> to vector<8x32xf32>
    %98 = arith.mulf %95, %97 : vector<8x32xf32>
    %c0_93 = arith.constant 0 : index
    %c0_94 = arith.constant 0 : index
    %99 = vector.load %arg16[%c0_93, %c0_94] : memref<1x32xf32, #tpu.memory_space<vmem>>, vector<1x32xf32>
    %100 = vector.broadcast %99 : vector<1x32xf32> to vector<8x32xf32>
    %101 = arith.addf %98, %100 : vector<8x32xf32>
    %c0_95 = arith.constant 0 : index
    %c0_96 = arith.constant 0 : index
    %102 = vector.load %arg33[%c0_95, %c0_96] : memref<1x8xf32, #tpu.memory_space<vmem>>, vector<1x8xf32>
    %c0_i32 = arith.constant 0 : i32
    %103 = vector.broadcast %c0_i32 : i32 to vector<8x32xi32>
    %104 = arith.cmpi eq, %0, %103 : vector<8x32xi32>
    %cst_97 = arith.constant 0.000000e+00 : f32
    %105 = vector.broadcast %cst_97 : f32 to vector<8x32xf32>
    %106 = arith.select %104, %101, %105 : vector<8x32xi1>, vector<8x32xf32>
    %cst_98 = arith.constant dense<0.000000e+00> : vector<32xf32>
    %107 = vector.multi_reduction <add>, %106, %cst_98 [0] : vector<8x32xf32> to vector<32xf32>
    %108 = vector.shape_cast %107 : vector<32xf32> to vector<1x32xf32>
    %c0_99 = arith.constant 0 : index
    %c0_100 = arith.constant 0 : index
    %c0_101 = arith.constant 0 : index
    %109 = vector.load %arg32[%c0_99, %c0_100, %c0_101] : memref<8x32x8xf32, #tpu.memory_space<vmem>>, vector<1x32x8xf32>
    %110 = vector.shape_cast %109 : vector<1x32x8xf32> to vector<32x8xf32>
    %cst_102 = arith.constant dense<0.000000e+00> : vector<1x8xf32>
    %111 = tpu.matmul %108, %110, %cst_102 {dimension_numbers = #tpu.dot_dimension_numbers<[1], [0], [0], [1], [0, 0, 1, 1], [], []>} : vector<1x32xf32>, vector<32x8xf32>, vector<1x8xf32> -> vector<1x8xf32>
    %112 = arith.addf %102, %111 : vector<1x8xf32>
    %c1_i32 = arith.constant 1 : i32
    %113 = vector.broadcast %c1_i32 : i32 to vector<8x32xi32>
    %114 = arith.cmpi eq, %0, %113 : vector<8x32xi32>
    %cst_103 = arith.constant 0.000000e+00 : f32
    %115 = vector.broadcast %cst_103 : f32 to vector<8x32xf32>
    %116 = arith.select %114, %101, %115 : vector<8x32xi1>, vector<8x32xf32>
    %cst_104 = arith.constant dense<0.000000e+00> : vector<32xf32>
    %117 = vector.multi_reduction <add>, %116, %cst_104 [0] : vector<8x32xf32> to vector<32xf32>
    %118 = vector.shape_cast %117 : vector<32xf32> to vector<1x32xf32>
    %c1_105 = arith.constant 1 : index
    %c0_106 = arith.constant 0 : index
    %c0_107 = arith.constant 0 : index
    %119 = vector.load %arg32[%c1_105, %c0_106, %c0_107] : memref<8x32x8xf32, #tpu.memory_space<vmem>>, vector<1x32x8xf32>
    %120 = vector.shape_cast %119 : vector<1x32x8xf32> to vector<32x8xf32>
    %cst_108 = arith.constant dense<0.000000e+00> : vector<1x8xf32>
    %121 = tpu.matmul %118, %120, %cst_108 {dimension_numbers = #tpu.dot_dimension_numbers<[1], [0], [0], [1], [0, 0, 1, 1], [], []>} : vector<1x32xf32>, vector<32x8xf32>, vector<1x8xf32> -> vector<1x8xf32>
    %122 = arith.addf %112, %121 : vector<1x8xf32>
    %c2_i32 = arith.constant 2 : i32
    %123 = vector.broadcast %c2_i32 : i32 to vector<8x32xi32>
    %124 = arith.cmpi eq, %0, %123 : vector<8x32xi32>
    %cst_109 = arith.constant 0.000000e+00 : f32
    %125 = vector.broadcast %cst_109 : f32 to vector<8x32xf32>
    %126 = arith.select %124, %101, %125 : vector<8x32xi1>, vector<8x32xf32>
    %cst_110 = arith.constant dense<0.000000e+00> : vector<32xf32>
    %127 = vector.multi_reduction <add>, %126, %cst_110 [0] : vector<8x32xf32> to vector<32xf32>
    %128 = vector.shape_cast %127 : vector<32xf32> to vector<1x32xf32>
    %c2_111 = arith.constant 2 : index
    %c0_112 = arith.constant 0 : index
    %c0_113 = arith.constant 0 : index
    %129 = vector.load %arg32[%c2_111, %c0_112, %c0_113] : memref<8x32x8xf32, #tpu.memory_space<vmem>>, vector<1x32x8xf32>
    %130 = vector.shape_cast %129 : vector<1x32x8xf32> to vector<32x8xf32>
    %cst_114 = arith.constant dense<0.000000e+00> : vector<1x8xf32>
    %131 = tpu.matmul %128, %130, %cst_114 {dimension_numbers = #tpu.dot_dimension_numbers<[1], [0], [0], [1], [0, 0, 1, 1], [], []>} : vector<1x32xf32>, vector<32x8xf32>, vector<1x8xf32> -> vector<1x8xf32>
    %132 = arith.addf %122, %131 : vector<1x8xf32>
    %c3_i32 = arith.constant 3 : i32
    %133 = vector.broadcast %c3_i32 : i32 to vector<8x32xi32>
    %134 = arith.cmpi eq, %0, %133 : vector<8x32xi32>
    %cst_115 = arith.constant 0.000000e+00 : f32
    %135 = vector.broadcast %cst_115 : f32 to vector<8x32xf32>
    %136 = arith.select %134, %101, %135 : vector<8x32xi1>, vector<8x32xf32>
    %cst_116 = arith.constant dense<0.000000e+00> : vector<32xf32>
    %137 = vector.multi_reduction <add>, %136, %cst_116 [0] : vector<8x32xf32> to vector<32xf32>
    %138 = vector.shape_cast %137 : vector<32xf32> to vector<1x32xf32>
    %c3 = arith.constant 3 : index
    %c0_117 = arith.constant 0 : index
    %c0_118 = arith.constant 0 : index
    %139 = vector.load %arg32[%c3, %c0_117, %c0_118] : memref<8x32x8xf32, #tpu.memory_space<vmem>>, vector<1x32x8xf32>
    %140 = vector.shape_cast %139 : vector<1x32x8xf32> to vector<32x8xf32>
    %cst_119 = arith.constant dense<0.000000e+00> : vector<1x8xf32>
    %141 = tpu.matmul %138, %140, %cst_119 {dimension_numbers = #tpu.dot_dimension_numbers<[1], [0], [0], [1], [0, 0, 1, 1], [], []>} : vector<1x32xf32>, vector<32x8xf32>, vector<1x8xf32> -> vector<1x8xf32>
    %142 = arith.addf %132, %141 : vector<1x8xf32>
    %c4_i32 = arith.constant 4 : i32
    %143 = vector.broadcast %c4_i32 : i32 to vector<8x32xi32>
    %144 = arith.cmpi eq, %0, %143 : vector<8x32xi32>
    %cst_120 = arith.constant 0.000000e+00 : f32
    %145 = vector.broadcast %cst_120 : f32 to vector<8x32xf32>
    %146 = arith.select %144, %101, %145 : vector<8x32xi1>, vector<8x32xf32>
    %cst_121 = arith.constant dense<0.000000e+00> : vector<32xf32>
    %147 = vector.multi_reduction <add>, %146, %cst_121 [0] : vector<8x32xf32> to vector<32xf32>
    %148 = vector.shape_cast %147 : vector<32xf32> to vector<1x32xf32>
    %c4 = arith.constant 4 : index
    %c0_122 = arith.constant 0 : index
    %c0_123 = arith.constant 0 : index
    %149 = vector.load %arg32[%c4, %c0_122, %c0_123] : memref<8x32x8xf32, #tpu.memory_space<vmem>>, vector<1x32x8xf32>
    %150 = vector.shape_cast %149 : vector<1x32x8xf32> to vector<32x8xf32>
    %cst_124 = arith.constant dense<0.000000e+00> : vector<1x8xf32>
    %151 = tpu.matmul %148, %150, %cst_124 {dimension_numbers = #tpu.dot_dimension_numbers<[1], [0], [0], [1], [0, 0, 1, 1], [], []>} : vector<1x32xf32>, vector<32x8xf32>, vector<1x8xf32> -> vector<1x8xf32>
    %152 = arith.addf %142, %151 : vector<1x8xf32>
    %c5_i32 = arith.constant 5 : i32
    %153 = vector.broadcast %c5_i32 : i32 to vector<8x32xi32>
    %154 = arith.cmpi eq, %0, %153 : vector<8x32xi32>
    %cst_125 = arith.constant 0.000000e+00 : f32
    %155 = vector.broadcast %cst_125 : f32 to vector<8x32xf32>
    %156 = arith.select %154, %101, %155 : vector<8x32xi1>, vector<8x32xf32>
    %cst_126 = arith.constant dense<0.000000e+00> : vector<32xf32>
    %157 = vector.multi_reduction <add>, %156, %cst_126 [0] : vector<8x32xf32> to vector<32xf32>
    %158 = vector.shape_cast %157 : vector<32xf32> to vector<1x32xf32>
    %c5 = arith.constant 5 : index
    %c0_127 = arith.constant 0 : index
    %c0_128 = arith.constant 0 : index
    %159 = vector.load %arg32[%c5, %c0_127, %c0_128] : memref<8x32x8xf32, #tpu.memory_space<vmem>>, vector<1x32x8xf32>
    %160 = vector.shape_cast %159 : vector<1x32x8xf32> to vector<32x8xf32>
    %cst_129 = arith.constant dense<0.000000e+00> : vector<1x8xf32>
    %161 = tpu.matmul %158, %160, %cst_129 {dimension_numbers = #tpu.dot_dimension_numbers<[1], [0], [0], [1], [0, 0, 1, 1], [], []>} : vector<1x32xf32>, vector<32x8xf32>, vector<1x8xf32> -> vector<1x8xf32>
    %162 = arith.addf %152, %161 : vector<1x8xf32>
    %c6_i32 = arith.constant 6 : i32
    %163 = vector.broadcast %c6_i32 : i32 to vector<8x32xi32>
    %164 = arith.cmpi eq, %0, %163 : vector<8x32xi32>
    %cst_130 = arith.constant 0.000000e+00 : f32
    %165 = vector.broadcast %cst_130 : f32 to vector<8x32xf32>
    %166 = arith.select %164, %101, %165 : vector<8x32xi1>, vector<8x32xf32>
    %cst_131 = arith.constant dense<0.000000e+00> : vector<32xf32>
    %167 = vector.multi_reduction <add>, %166, %cst_131 [0] : vector<8x32xf32> to vector<32xf32>
    %168 = vector.shape_cast %167 : vector<32xf32> to vector<1x32xf32>
    %c6 = arith.constant 6 : index
    %c0_132 = arith.constant 0 : index
    %c0_133 = arith.constant 0 : index
    %169 = vector.load %arg32[%c6, %c0_132, %c0_133] : memref<8x32x8xf32, #tpu.memory_space<vmem>>, vector<1x32x8xf32>
    %170 = vector.shape_cast %169 : vector<1x32x8xf32> to vector<32x8xf32>
    %cst_134 = arith.constant dense<0.000000e+00> : vector<1x8xf32>
    %171 = tpu.matmul %168, %170, %cst_134 {dimension_numbers = #tpu.dot_dimension_numbers<[1], [0], [0], [1], [0, 0, 1, 1], [], []>} : vector<1x32xf32>, vector<32x8xf32>, vector<1x8xf32> -> vector<1x8xf32>
    %172 = arith.addf %162, %171 : vector<1x8xf32>
    %c7_i32 = arith.constant 7 : i32
    %173 = vector.broadcast %c7_i32 : i32 to vector<8x32xi32>
    %174 = arith.cmpi eq, %0, %173 : vector<8x32xi32>
    %cst_135 = arith.constant 0.000000e+00 : f32
    %175 = vector.broadcast %cst_135 : f32 to vector<8x32xf32>
    %176 = arith.select %174, %101, %175 : vector<8x32xi1>, vector<8x32xf32>
    %cst_136 = arith.constant dense<0.000000e+00> : vector<32xf32>
    %177 = vector.multi_reduction <add>, %176, %cst_136 [0] : vector<8x32xf32> to vector<32xf32>
    %178 = vector.shape_cast %177 : vector<32xf32> to vector<1x32xf32>
    %c7 = arith.constant 7 : index
    %c0_137 = arith.constant 0 : index
    %c0_138 = arith.constant 0 : index
    %179 = vector.load %arg32[%c7, %c0_137, %c0_138] : memref<8x32x8xf32, #tpu.memory_space<vmem>>, vector<1x32x8xf32>
    %180 = vector.shape_cast %179 : vector<1x32x8xf32> to vector<32x8xf32>
    %cst_139 = arith.constant dense<0.000000e+00> : vector<1x8xf32>
    %181 = tpu.matmul %178, %180, %cst_139 {dimension_numbers = #tpu.dot_dimension_numbers<[1], [0], [0], [1], [0, 0, 1, 1], [], []>} : vector<1x32xf32>, vector<32x8xf32>, vector<1x8xf32> -> vector<1x8xf32>
    %182 = arith.addf %172, %181 : vector<1x8xf32>
    %c0_140 = arith.constant 0 : index
    %c0_141 = arith.constant 0 : index
    %183 = vector.load %arg34[%c0_140, %c0_141] : memref<8x8xf32, #tpu.memory_space<vmem>>, vector<8x8xf32>
    %cst_142 = arith.constant dense<0.000000e+00> : vector<1x8xf32>
    %184 = tpu.matmul %182, %183, %cst_142 {dimension_numbers = #tpu.dot_dimension_numbers<[1], [0], [0], [1], [0, 0, 1, 1], [], []>} : vector<1x8xf32>, vector<8x8xf32>, vector<1x8xf32> -> vector<1x8xf32>
    %c0_143 = arith.constant 0 : index
    %c0_144 = arith.constant 0 : index
    %185 = vector.load %arg35[%c0_143, %c0_144] : memref<1x8xf32, #tpu.memory_space<vmem>>, vector<1x8xf32>
    %186 = arith.addf %184, %185 : vector<1x8xf32>
    %c0_145 = arith.constant 0 : index
    %c0_146 = arith.constant 0 : index
    %187 = vector.load %arg36[%c0_145, %c0_146] : memref<8x8xf32, #tpu.memory_space<vmem>>, vector<8x8xf32>
    %cst_147 = arith.constant dense<0.000000e+00> : vector<1x8xf32>
    %188 = tpu.matmul %182, %187, %cst_147 {dimension_numbers = #tpu.dot_dimension_numbers<[1], [0], [0], [1], [0, 0, 1, 1], [], []>} : vector<1x8xf32>, vector<8x8xf32>, vector<1x8xf32> -> vector<1x8xf32>
    %c0_148 = arith.constant 0 : index
    %c0_149 = arith.constant 0 : index
    %189 = vector.load %arg37[%c0_148, %c0_149] : memref<1x8xf32, #tpu.memory_space<vmem>>, vector<1x8xf32>
    %190 = arith.addf %188, %189 : vector<1x8xf32>
    %c0_150 = arith.constant 0 : index
    %c0_151 = arith.constant 0 : index
    %c0_152 = arith.constant 0 : index
    %191 = vector.load %arg1[%c0_150, %c0_151, %c0_152] : memref<2x1x8xf32, #tpu.memory_space<vmem>>, vector<1x1x8xf32>
    %192 = vector.shape_cast %191 : vector<1x1x8xf32> to vector<1x8xf32>
    %cst_153 = arith.constant 5.000000e-01 : f32
    %193 = vector.broadcast %cst_153 : f32 to vector<1x8xf32>
    %194 = arith.mulf %193, %190 : vector<1x8xf32>
    %195 = math.exp %194 : vector<1x8xf32>
    %196 = arith.mulf %192, %195 : vector<1x8xf32>
    %197 = arith.addf %186, %196 : vector<1x8xf32>
    %c0_154 = arith.constant 0 : index
    %c0_155 = arith.constant 0 : index
    %198 = vector.load %arg39[%c0_154, %c0_155] : memref<8x32xf32, #tpu.memory_space<vmem>>, vector<8x32xf32>
    %c0_156 = arith.constant 0 : index
    %c0_157 = arith.constant 0 : index
    %c0_158 = arith.constant 0 : index
    %199 = vector.load %arg38[%c0_156, %c0_157, %c0_158] : memref<8x8x32xf32, #tpu.memory_space<vmem>>, vector<1x8x32xf32>
    %200 = vector.shape_cast %199 : vector<1x8x32xf32> to vector<8x32xf32>
    %cst_159 = arith.constant dense<0.000000e+00> : vector<1x32xf32>
    %201 = tpu.matmul %197, %200, %cst_159 {dimension_numbers = #tpu.dot_dimension_numbers<[1], [0], [0], [1], [0, 0, 1, 1], [], []>} : vector<1x8xf32>, vector<8x32xf32>, vector<1x32xf32> -> vector<1x32xf32>
    %c0_i32_160 = arith.constant 0 : i32
    %202 = vector.broadcast %c0_i32_160 : i32 to vector<8x32xi32>
    %203 = arith.cmpi eq, %0, %202 : vector<8x32xi32>
    %cst_161 = arith.constant 1.000000e+00 : f32
    %cst_162 = arith.constant 0.000000e+00 : f32
    %204 = vector.broadcast %cst_161 : f32 to vector<8x32xf32>
    %205 = vector.broadcast %cst_162 : f32 to vector<8x32xf32>
    %206 = arith.select %203, %204, %205 : vector<8x32xi1>, vector<8x32xf32>
    %207 = vector.broadcast %201 : vector<1x32xf32> to vector<8x32xf32>
    %208 = arith.mulf %206, %207 : vector<8x32xf32>
    %209 = arith.addf %198, %208 : vector<8x32xf32>
    %c1_163 = arith.constant 1 : index
    %c0_164 = arith.constant 0 : index
    %c0_165 = arith.constant 0 : index
    %210 = vector.load %arg38[%c1_163, %c0_164, %c0_165] : memref<8x8x32xf32, #tpu.memory_space<vmem>>, vector<1x8x32xf32>
    %211 = vector.shape_cast %210 : vector<1x8x32xf32> to vector<8x32xf32>
    %cst_166 = arith.constant dense<0.000000e+00> : vector<1x32xf32>
    %212 = tpu.matmul %197, %211, %cst_166 {dimension_numbers = #tpu.dot_dimension_numbers<[1], [0], [0], [1], [0, 0, 1, 1], [], []>} : vector<1x8xf32>, vector<8x32xf32>, vector<1x32xf32> -> vector<1x32xf32>
    %c1_i32_167 = arith.constant 1 : i32
    %213 = vector.broadcast %c1_i32_167 : i32 to vector<8x32xi32>
    %214 = arith.cmpi eq, %0, %213 : vector<8x32xi32>
    %cst_168 = arith.constant 1.000000e+00 : f32
    %cst_169 = arith.constant 0.000000e+00 : f32
    %215 = vector.broadcast %cst_168 : f32 to vector<8x32xf32>
    %216 = vector.broadcast %cst_169 : f32 to vector<8x32xf32>
    %217 = arith.select %214, %215, %216 : vector<8x32xi1>, vector<8x32xf32>
    %218 = vector.broadcast %212 : vector<1x32xf32> to vector<8x32xf32>
    %219 = arith.mulf %217, %218 : vector<8x32xf32>
    %220 = arith.addf %209, %219 : vector<8x32xf32>
    %c2_170 = arith.constant 2 : index
    %c0_171 = arith.constant 0 : index
    %c0_172 = arith.constant 0 : index
    %221 = vector.load %arg38[%c2_170, %c0_171, %c0_172] : memref<8x8x32xf32, #tpu.memory_space<vmem>>, vector<1x8x32xf32>
    %222 = vector.shape_cast %221 : vector<1x8x32xf32> to vector<8x32xf32>
    %cst_173 = arith.constant dense<0.000000e+00> : vector<1x32xf32>
    %223 = tpu.matmul %197, %222, %cst_173 {dimension_numbers = #tpu.dot_dimension_numbers<[1], [0], [0], [1], [0, 0, 1, 1], [], []>} : vector<1x8xf32>, vector<8x32xf32>, vector<1x32xf32> -> vector<1x32xf32>
    %c2_i32_174 = arith.constant 2 : i32
    %224 = vector.broadcast %c2_i32_174 : i32 to vector<8x32xi32>
    %225 = arith.cmpi eq, %0, %224 : vector<8x32xi32>
    %cst_175 = arith.constant 1.000000e+00 : f32
    %cst_176 = arith.constant 0.000000e+00 : f32
    %226 = vector.broadcast %cst_175 : f32 to vector<8x32xf32>
    %227 = vector.broadcast %cst_176 : f32 to vector<8x32xf32>
    %228 = arith.select %225, %226, %227 : vector<8x32xi1>, vector<8x32xf32>
    %229 = vector.broadcast %223 : vector<1x32xf32> to vector<8x32xf32>
    %230 = arith.mulf %228, %229 : vector<8x32xf32>
    %231 = arith.addf %220, %230 : vector<8x32xf32>
    %c3_177 = arith.constant 3 : index
    %c0_178 = arith.constant 0 : index
    %c0_179 = arith.constant 0 : index
    %232 = vector.load %arg38[%c3_177, %c0_178, %c0_179] : memref<8x8x32xf32, #tpu.memory_space<vmem>>, vector<1x8x32xf32>
    %233 = vector.shape_cast %232 : vector<1x8x32xf32> to vector<8x32xf32>
    %cst_180 = arith.constant dense<0.000000e+00> : vector<1x32xf32>
    %234 = tpu.matmul %197, %233, %cst_180 {dimension_numbers = #tpu.dot_dimension_numbers<[1], [0], [0], [1], [0, 0, 1, 1], [], []>} : vector<1x8xf32>, vector<8x32xf32>, vector<1x32xf32> -> vector<1x32xf32>
    %c3_i32_181 = arith.constant 3 : i32
    %235 = vector.broadcast %c3_i32_181 : i32 to vector<8x32xi32>
    %236 = arith.cmpi eq, %0, %235 : vector<8x32xi32>
    %cst_182 = arith.constant 1.000000e+00 : f32
    %cst_183 = arith.constant 0.000000e+00 : f32
    %237 = vector.broadcast %cst_182 : f32 to vector<8x32xf32>
    %238 = vector.broadcast %cst_183 : f32 to vector<8x32xf32>
    %239 = arith.select %236, %237, %238 : vector<8x32xi1>, vector<8x32xf32>
    %240 = vector.broadcast %234 : vector<1x32xf32> to vector<8x32xf32>
    %241 = arith.mulf %239, %240 : vector<8x32xf32>
    %242 = arith.addf %231, %241 : vector<8x32xf32>
    %c4_184 = arith.constant 4 : index
    %c0_185 = arith.constant 0 : index
    %c0_186 = arith.constant 0 : index
    %243 = vector.load %arg38[%c4_184, %c0_185, %c0_186] : memref<8x8x32xf32, #tpu.memory_space<vmem>>, vector<1x8x32xf32>
    %244 = vector.shape_cast %243 : vector<1x8x32xf32> to vector<8x32xf32>
    %cst_187 = arith.constant dense<0.000000e+00> : vector<1x32xf32>
    %245 = tpu.matmul %197, %244, %cst_187 {dimension_numbers = #tpu.dot_dimension_numbers<[1], [0], [0], [1], [0, 0, 1, 1], [], []>} : vector<1x8xf32>, vector<8x32xf32>, vector<1x32xf32> -> vector<1x32xf32>
    %c4_i32_188 = arith.constant 4 : i32
    %246 = vector.broadcast %c4_i32_188 : i32 to vector<8x32xi32>
    %247 = arith.cmpi eq, %0, %246 : vector<8x32xi32>
    %cst_189 = arith.constant 1.000000e+00 : f32
    %cst_190 = arith.constant 0.000000e+00 : f32
    %248 = vector.broadcast %cst_189 : f32 to vector<8x32xf32>
    %249 = vector.broadcast %cst_190 : f32 to vector<8x32xf32>
    %250 = arith.select %247, %248, %249 : vector<8x32xi1>, vector<8x32xf32>
    %251 = vector.broadcast %245 : vector<1x32xf32> to vector<8x32xf32>
    %252 = arith.mulf %250, %251 : vector<8x32xf32>
    %253 = arith.addf %242, %252 : vector<8x32xf32>
    %c5_191 = arith.constant 5 : index
    %c0_192 = arith.constant 0 : index
    %c0_193 = arith.constant 0 : index
    %254 = vector.load %arg38[%c5_191, %c0_192, %c0_193] : memref<8x8x32xf32, #tpu.memory_space<vmem>>, vector<1x8x32xf32>
    %255 = vector.shape_cast %254 : vector<1x8x32xf32> to vector<8x32xf32>
    %cst_194 = arith.constant dense<0.000000e+00> : vector<1x32xf32>
    %256 = tpu.matmul %197, %255, %cst_194 {dimension_numbers = #tpu.dot_dimension_numbers<[1], [0], [0], [1], [0, 0, 1, 1], [], []>} : vector<1x8xf32>, vector<8x32xf32>, vector<1x32xf32> -> vector<1x32xf32>
    %c5_i32_195 = arith.constant 5 : i32
    %257 = vector.broadcast %c5_i32_195 : i32 to vector<8x32xi32>
    %258 = arith.cmpi eq, %0, %257 : vector<8x32xi32>
    %cst_196 = arith.constant 1.000000e+00 : f32
    %cst_197 = arith.constant 0.000000e+00 : f32
    %259 = vector.broadcast %cst_196 : f32 to vector<8x32xf32>
    %260 = vector.broadcast %cst_197 : f32 to vector<8x32xf32>
    %261 = arith.select %258, %259, %260 : vector<8x32xi1>, vector<8x32xf32>
    %262 = vector.broadcast %256 : vector<1x32xf32> to vector<8x32xf32>
    %263 = arith.mulf %261, %262 : vector<8x32xf32>
    %264 = arith.addf %253, %263 : vector<8x32xf32>
    %c6_198 = arith.constant 6 : index
    %c0_199 = arith.constant 0 : index
    %c0_200 = arith.constant 0 : index
    %265 = vector.load %arg38[%c6_198, %c0_199, %c0_200] : memref<8x8x32xf32, #tpu.memory_space<vmem>>, vector<1x8x32xf32>
    %266 = vector.shape_cast %265 : vector<1x8x32xf32> to vector<8x32xf32>
    %cst_201 = arith.constant dense<0.000000e+00> : vector<1x32xf32>
    %267 = tpu.matmul %197, %266, %cst_201 {dimension_numbers = #tpu.dot_dimension_numbers<[1], [0], [0], [1], [0, 0, 1, 1], [], []>} : vector<1x8xf32>, vector<8x32xf32>, vector<1x32xf32> -> vector<1x32xf32>
    %c6_i32_202 = arith.constant 6 : i32
    %268 = vector.broadcast %c6_i32_202 : i32 to vector<8x32xi32>
    %269 = arith.cmpi eq, %0, %268 : vector<8x32xi32>
    %cst_203 = arith.constant 1.000000e+00 : f32
    %cst_204 = arith.constant 0.000000e+00 : f32
    %270 = vector.broadcast %cst_203 : f32 to vector<8x32xf32>
    %271 = vector.broadcast %cst_204 : f32 to vector<8x32xf32>
    %272 = arith.select %269, %270, %271 : vector<8x32xi1>, vector<8x32xf32>
    %273 = vector.broadcast %267 : vector<1x32xf32> to vector<8x32xf32>
    %274 = arith.mulf %272, %273 : vector<8x32xf32>
    %275 = arith.addf %264, %274 : vector<8x32xf32>
    %c7_205 = arith.constant 7 : index
    %c0_206 = arith.constant 0 : index
    %c0_207 = arith.constant 0 : index
    %276 = vector.load %arg38[%c7_205, %c0_206, %c0_207] : memref<8x8x32xf32, #tpu.memory_space<vmem>>, vector<1x8x32xf32>
    %277 = vector.shape_cast %276 : vector<1x8x32xf32> to vector<8x32xf32>
    %cst_208 = arith.constant dense<0.000000e+00> : vector<1x32xf32>
    %278 = tpu.matmul %197, %277, %cst_208 {dimension_numbers = #tpu.dot_dimension_numbers<[1], [0], [0], [1], [0, 0, 1, 1], [], []>} : vector<1x8xf32>, vector<8x32xf32>, vector<1x32xf32> -> vector<1x32xf32>
    %c7_i32_209 = arith.constant 7 : i32
    %279 = vector.broadcast %c7_i32_209 : i32 to vector<8x32xi32>
    %280 = arith.cmpi eq, %0, %279 : vector<8x32xi32>
    %cst_210 = arith.constant 1.000000e+00 : f32
    %cst_211 = arith.constant 0.000000e+00 : f32
    %281 = vector.broadcast %cst_210 : f32 to vector<8x32xf32>
    %282 = vector.broadcast %cst_211 : f32 to vector<8x32xf32>
    %283 = arith.select %280, %281, %282 : vector<8x32xi1>, vector<8x32xf32>
    %284 = vector.broadcast %278 : vector<1x32xf32> to vector<8x32xf32>
    %285 = arith.mulf %283, %284 : vector<8x32xf32>
    %286 = arith.addf %275, %285 : vector<8x32xf32>
    %c0_212 = arith.constant 0 : index
    %c0_213 = arith.constant 0 : index
    %287 = vector.load %arg19[%c0_212, %c0_213] : memref<16x16xf32, #tpu.memory_space<vmem>>, vector<16x16xf32>
    %c0_214 = arith.constant 0 : index
    %c0_215 = arith.constant 0 : index
    %c0_216 = arith.constant 0 : index
    %288 = vector.load %arg17[%c0_214, %c0_215, %c0_216] : memref<3x32x16xf32, #tpu.memory_space<vmem>>, vector<1x32x16xf32>
    %289 = vector.shape_cast %288 : vector<1x32x16xf32> to vector<32x16xf32>
    %cst_217 = arith.constant dense<0.000000e+00> : vector<8x16xf32>
    %290 = tpu.matmul %286, %289, %cst_217 {dimension_numbers = #tpu.dot_dimension_numbers<[1], [0], [0], [1], [0, 0, 1, 1], [], []>} : vector<8x32xf32>, vector<32x16xf32>, vector<8x16xf32> -> vector<8x16xf32>
    %c0_218 = arith.constant 0 : index
    %c0_219 = arith.constant 0 : index
    %c0_220 = arith.constant 0 : index
    %291 = vector.load %arg18[%c0_218, %c0_219, %c0_220] : memref<3x16x8xf32, #tpu.memory_space<vmem>>, vector<1x16x8xf32>
    %292 = vector.shape_cast %291 : vector<1x16x8xf32> to vector<16x8xf32>
    %cst_221 = arith.constant dense<0.000000e+00> : vector<16x16xf32>
    %293 = tpu.matmul %292, %290, %cst_221 {dimension_numbers = #tpu.dot_dimension_numbers<[1], [0], [0], [1], [0, 0, 1, 1], [], []>} : vector<16x8xf32>, vector<8x16xf32>, vector<16x16xf32> -> vector<16x16xf32>
    %294 = arith.addf %287, %293 : vector<16x16xf32>
    %c1_222 = arith.constant 1 : index
    %c0_223 = arith.constant 0 : index
    %c0_224 = arith.constant 0 : index
    %295 = vector.load %arg17[%c1_222, %c0_223, %c0_224] : memref<3x32x16xf32, #tpu.memory_space<vmem>>, vector<1x32x16xf32>
    %296 = vector.shape_cast %295 : vector<1x32x16xf32> to vector<32x16xf32>
    %cst_225 = arith.constant dense<0.000000e+00> : vector<8x16xf32>
    %297 = tpu.matmul %286, %296, %cst_225 {dimension_numbers = #tpu.dot_dimension_numbers<[1], [0], [0], [1], [0, 0, 1, 1], [], []>} : vector<8x32xf32>, vector<32x16xf32>, vector<8x16xf32> -> vector<8x16xf32>
    %c1_226 = arith.constant 1 : index
    %c0_227 = arith.constant 0 : index
    %c0_228 = arith.constant 0 : index
    %298 = vector.load %arg18[%c1_226, %c0_227, %c0_228] : memref<3x16x8xf32, #tpu.memory_space<vmem>>, vector<1x16x8xf32>
    %299 = vector.shape_cast %298 : vector<1x16x8xf32> to vector<16x8xf32>
    %cst_229 = arith.constant dense<0.000000e+00> : vector<16x16xf32>
    %300 = tpu.matmul %299, %297, %cst_229 {dimension_numbers = #tpu.dot_dimension_numbers<[1], [0], [0], [1], [0, 0, 1, 1], [], []>} : vector<16x8xf32>, vector<8x16xf32>, vector<16x16xf32> -> vector<16x16xf32>
    %301 = arith.addf %294, %300 : vector<16x16xf32>
    %c2_230 = arith.constant 2 : index
    %c0_231 = arith.constant 0 : index
    %c0_232 = arith.constant 0 : index
    %302 = vector.load %arg17[%c2_230, %c0_231, %c0_232] : memref<3x32x16xf32, #tpu.memory_space<vmem>>, vector<1x32x16xf32>
    %303 = vector.shape_cast %302 : vector<1x32x16xf32> to vector<32x16xf32>
    %cst_233 = arith.constant dense<0.000000e+00> : vector<8x16xf32>
    %304 = tpu.matmul %286, %303, %cst_233 {dimension_numbers = #tpu.dot_dimension_numbers<[1], [0], [0], [1], [0, 0, 1, 1], [], []>} : vector<8x32xf32>, vector<32x16xf32>, vector<8x16xf32> -> vector<8x16xf32>
    %c2_234 = arith.constant 2 : index
    %c0_235 = arith.constant 0 : index
    %c0_236 = arith.constant 0 : index
    %305 = vector.load %arg18[%c2_234, %c0_235, %c0_236] : memref<3x16x8xf32, #tpu.memory_space<vmem>>, vector<1x16x8xf32>
    %306 = vector.shape_cast %305 : vector<1x16x8xf32> to vector<16x8xf32>
    %cst_237 = arith.constant dense<0.000000e+00> : vector<16x16xf32>
    %307 = tpu.matmul %306, %304, %cst_237 {dimension_numbers = #tpu.dot_dimension_numbers<[1], [0], [0], [1], [0, 0, 1, 1], [], []>} : vector<16x8xf32>, vector<8x16xf32>, vector<16x16xf32> -> vector<16x16xf32>
    %308 = arith.addf %301, %307 : vector<16x16xf32>
    %cst_238 = arith.constant 0.000000e+00 : f32
    %309 = vector.broadcast %cst_238 : f32 to vector<16x16xf32>
    %310 = arith.cmpf oge, %308, %309 : vector<16x16xf32>
    %cst_239 = arith.constant 0.00999999977 : f32
    %311 = vector.broadcast %cst_239 : f32 to vector<16x16xf32>
    %312 = arith.mulf %311, %308 : vector<16x16xf32>
    %313 = arith.select %310, %308, %312 : vector<16x16xi1>, vector<16x16xf32>
    %c0_240 = arith.constant 0 : index
    %c0_241 = arith.constant 0 : index
    %314 = vector.load %arg20[%c0_240, %c0_241] : memref<1x16xf32, #tpu.memory_space<vmem>>, vector<1x16xf32>
    %315 = vector.broadcast %314 : vector<1x16xf32> to vector<16x16xf32>
    %316 = arith.mulf %313, %315 : vector<16x16xf32>
    %c0_242 = arith.constant 0 : index
    %c0_243 = arith.constant 0 : index
    %317 = vector.load %arg21[%c0_242, %c0_243] : memref<1x16xf32, #tpu.memory_space<vmem>>, vector<1x16xf32>
    %318 = vector.broadcast %317 : vector<1x16xf32> to vector<16x16xf32>
    %319 = arith.addf %316, %318 : vector<16x16xf32>
    %c0_244 = arith.constant 0 : index
    %c0_245 = arith.constant 0 : index
    %320 = vector.load %arg25[%c0_244, %c0_245] : memref<32x8xf32, #tpu.memory_space<vmem>>, vector<32x8xf32>
    %c0_246 = arith.constant 0 : index
    %c0_247 = arith.constant 0 : index
    %c0_248 = arith.constant 0 : index
    %321 = vector.load %arg22[%c0_246, %c0_247, %c0_248] : memref<3x16x8xf32, #tpu.memory_space<vmem>>, vector<1x16x8xf32>
    %322 = vector.shape_cast %321 : vector<1x16x8xf32> to vector<16x8xf32>
    %cst_249 = arith.constant dense<0.000000e+00> : vector<16x8xf32>
    %323 = tpu.matmul %319, %322, %cst_249 {dimension_numbers = #tpu.dot_dimension_numbers<[1], [0], [0], [1], [0, 0, 1, 1], [], []>} : vector<16x16xf32>, vector<16x8xf32>, vector<16x8xf32> -> vector<16x8xf32>
    %c0_250 = arith.constant 0 : index
    %c0_251 = arith.constant 0 : index
    %c0_252 = arith.constant 0 : index
    %324 = vector.load %arg23[%c0_250, %c0_251, %c0_252] : memref<3x16x8xf32, #tpu.memory_space<vmem>>, vector<1x16x8xf32>
    %325 = vector.shape_cast %324 : vector<1x16x8xf32> to vector<16x8xf32>
    %cst_253 = arith.constant dense<0.000000e+00> : vector<16x8xf32>
    %326 = tpu.matmul %68, %325, %cst_253 {dimension_numbers = #tpu.dot_dimension_numbers<[1], [0], [0], [1], [0, 0, 1, 1], [], []>} : vector<16x16xf32>, vector<16x8xf32>, vector<16x8xf32> -> vector<16x8xf32>
    %327 = arith.addf %323, %326 : vector<16x8xf32>
    %c0_254 = arith.constant 0 : index
    %c0_255 = arith.constant 0 : index
    %c0_256 = arith.constant 0 : index
    %328 = vector.load %arg24[%c0_254, %c0_255, %c0_256] : memref<3x32x16xf32, #tpu.memory_space<vmem>>, vector<1x32x16xf32>
    %329 = vector.shape_cast %328 : vector<1x32x16xf32> to vector<32x16xf32>
    %cst_257 = arith.constant dense<0.000000e+00> : vector<32x8xf32>
    %330 = tpu.matmul %329, %327, %cst_257 {dimension_numbers = #tpu.dot_dimension_numbers<[1], [0], [0], [1], [0, 0, 1, 1], [], []>} : vector<32x16xf32>, vector<16x8xf32>, vector<32x8xf32> -> vector<32x8xf32>
    %331 = arith.addf %320, %330 : vector<32x8xf32>
    %c1_258 = arith.constant 1 : index
    %c0_259 = arith.constant 0 : index
    %c0_260 = arith.constant 0 : index
    %332 = vector.load %arg22[%c1_258, %c0_259, %c0_260] : memref<3x16x8xf32, #tpu.memory_space<vmem>>, vector<1x16x8xf32>
    %333 = vector.shape_cast %332 : vector<1x16x8xf32> to vector<16x8xf32>
    %cst_261 = arith.constant dense<0.000000e+00> : vector<16x8xf32>
    %334 = tpu.matmul %319, %333, %cst_261 {dimension_numbers = #tpu.dot_dimension_numbers<[1], [0], [0], [1], [0, 0, 1, 1], [], []>} : vector<16x16xf32>, vector<16x8xf32>, vector<16x8xf32> -> vector<16x8xf32>
    %c1_262 = arith.constant 1 : index
    %c0_263 = arith.constant 0 : index
    %c0_264 = arith.constant 0 : index
    %335 = vector.load %arg23[%c1_262, %c0_263, %c0_264] : memref<3x16x8xf32, #tpu.memory_space<vmem>>, vector<1x16x8xf32>
    %336 = vector.shape_cast %335 : vector<1x16x8xf32> to vector<16x8xf32>
    %cst_265 = arith.constant dense<0.000000e+00> : vector<16x8xf32>
    %337 = tpu.matmul %68, %336, %cst_265 {dimension_numbers = #tpu.dot_dimension_numbers<[1], [0], [0], [1], [0, 0, 1, 1], [], []>} : vector<16x16xf32>, vector<16x8xf32>, vector<16x8xf32> -> vector<16x8xf32>
    %338 = arith.addf %334, %337 : vector<16x8xf32>
    %c1_266 = arith.constant 1 : index
    %c0_267 = arith.constant 0 : index
    %c0_268 = arith.constant 0 : index
    %339 = vector.load %arg24[%c1_266, %c0_267, %c0_268] : memref<3x32x16xf32, #tpu.memory_space<vmem>>, vector<1x32x16xf32>
    %340 = vector.shape_cast %339 : vector<1x32x16xf32> to vector<32x16xf32>
    %cst_269 = arith.constant dense<0.000000e+00> : vector<32x8xf32>
    %341 = tpu.matmul %340, %338, %cst_269 {dimension_numbers = #tpu.dot_dimension_numbers<[1], [0], [0], [1], [0, 0, 1, 1], [], []>} : vector<32x16xf32>, vector<16x8xf32>, vector<32x8xf32> -> vector<32x8xf32>
    %342 = arith.addf %331, %341 : vector<32x8xf32>
    %c2_270 = arith.constant 2 : index
    %c0_271 = arith.constant 0 : index
    %c0_272 = arith.constant 0 : index
    %343 = vector.load %arg22[%c2_270, %c0_271, %c0_272] : memref<3x16x8xf32, #tpu.memory_space<vmem>>, vector<1x16x8xf32>
    %344 = vector.shape_cast %343 : vector<1x16x8xf32> to vector<16x8xf32>
    %cst_273 = arith.constant dense<0.000000e+00> : vector<16x8xf32>
    %345 = tpu.matmul %319, %344, %cst_273 {dimension_numbers = #tpu.dot_dimension_numbers<[1], [0], [0], [1], [0, 0, 1, 1], [], []>} : vector<16x16xf32>, vector<16x8xf32>, vector<16x8xf32> -> vector<16x8xf32>
    %c2_274 = arith.constant 2 : index
    %c0_275 = arith.constant 0 : index
    %c0_276 = arith.constant 0 : index
    %346 = vector.load %arg23[%c2_274, %c0_275, %c0_276] : memref<3x16x8xf32, #tpu.memory_space<vmem>>, vector<1x16x8xf32>
    %347 = vector.shape_cast %346 : vector<1x16x8xf32> to vector<16x8xf32>
    %cst_277 = arith.constant dense<0.000000e+00> : vector<16x8xf32>
    %348 = tpu.matmul %68, %347, %cst_277 {dimension_numbers = #tpu.dot_dimension_numbers<[1], [0], [0], [1], [0, 0, 1, 1], [], []>} : vector<16x16xf32>, vector<16x8xf32>, vector<16x8xf32> -> vector<16x8xf32>
    %349 = arith.addf %345, %348 : vector<16x8xf32>
    %c2_278 = arith.constant 2 : index
    %c0_279 = arith.constant 0 : index
    %c0_280 = arith.constant 0 : index
    %350 = vector.load %arg24[%c2_278, %c0_279, %c0_280] : memref<3x32x16xf32, #tpu.memory_space<vmem>>, vector<1x32x16xf32>
    %351 = vector.shape_cast %350 : vector<1x32x16xf32> to vector<32x16xf32>
    %cst_281 = arith.constant dense<0.000000e+00> : vector<32x8xf32>
    %352 = tpu.matmul %351, %349, %cst_281 {dimension_numbers = #tpu.dot_dimension_numbers<[1], [0], [0], [1], [0, 0, 1, 1], [], []>} : vector<32x16xf32>, vector<16x8xf32>, vector<32x8xf32> -> vector<32x8xf32>
    %353 = arith.addf %342, %352 : vector<32x8xf32>
    %cst_282 = arith.constant 0.000000e+00 : f32
    %354 = vector.broadcast %cst_282 : f32 to vector<32x8xf32>
    %355 = arith.cmpf oge, %353, %354 : vector<32x8xf32>
    %cst_283 = arith.constant 0.00999999977 : f32
    %356 = vector.broadcast %cst_283 : f32 to vector<32x8xf32>
    %357 = arith.mulf %356, %353 : vector<32x8xf32>
    %358 = arith.select %355, %353, %357 : vector<32x8xi1>, vector<32x8xf32>
    %c0_284 = arith.constant 0 : index
    %c0_285 = arith.constant 0 : index
    %359 = vector.load %arg26[%c0_284, %c0_285] : memref<1x8xf32, #tpu.memory_space<vmem>>, vector<1x8xf32>
    %360 = vector.broadcast %359 : vector<1x8xf32> to vector<32x8xf32>
    %361 = arith.mulf %358, %360 : vector<32x8xf32>
    %c0_286 = arith.constant 0 : index
    %c0_287 = arith.constant 0 : index
    %362 = vector.load %arg27[%c0_286, %c0_287] : memref<1x8xf32, #tpu.memory_space<vmem>>, vector<1x8xf32>
    %363 = vector.broadcast %362 : vector<1x8xf32> to vector<32x8xf32>
    %364 = arith.addf %361, %363 : vector<32x8xf32>
    %c0_288 = arith.constant 0 : index
    %c0_289 = arith.constant 0 : index
    %365 = vector.load %arg31[%c0_288, %c0_289] : memref<64x3xf32, #tpu.memory_space<vmem>>, vector<64x3xf32>
    %c0_290 = arith.constant 0 : index
    %c0_291 = arith.constant 0 : index
    %c0_292 = arith.constant 0 : index
    %366 = vector.load %arg28[%c0_290, %c0_291, %c0_292] : memref<3x8x3xf32, #tpu.memory_space<vmem>>, vector<1x8x3xf32>
    %367 = vector.shape_cast %366 : vector<1x8x3xf32> to vector<8x3xf32>
    %cst_293 = arith.constant dense<0.000000e+00> : vector<32x3xf32>
    %368 = tpu.matmul %364, %367, %cst_293 {dimension_numbers = #tpu.dot_dimension_numbers<[1], [0], [0], [1], [0, 0, 1, 1], [], []>} : vector<32x8xf32>, vector<8x3xf32>, vector<32x3xf32> -> vector<32x3xf32>
    %c0_294 = arith.constant 0 : index
    %c0_295 = arith.constant 0 : index
    %c0_296 = arith.constant 0 : index
    %369 = vector.load %arg29[%c0_294, %c0_295, %c0_296] : memref<3x8x3xf32, #tpu.memory_space<vmem>>, vector<1x8x3xf32>
    %370 = vector.shape_cast %369 : vector<1x8x3xf32> to vector<8x3xf32>
    %cst_297 = arith.constant dense<0.000000e+00> : vector<32x3xf32>
    %371 = tpu.matmul %35, %370, %cst_297 {dimension_numbers = #tpu.dot_dimension_numbers<[1], [0], [0], [1], [0, 0, 1, 1], [], []>} : vector<32x8xf32>, vector<8x3xf32>, vector<32x3xf32> -> vector<32x3xf32>
    %372 = arith.addf %368, %371 : vector<32x3xf32>
    %c0_298 = arith.constant 0 : index
    %c0_299 = arith.constant 0 : index
    %c0_300 = arith.constant 0 : index
    %373 = vector.load %arg30[%c0_298, %c0_299, %c0_300] : memref<3x64x32xf32, #tpu.memory_space<vmem>>, vector<1x64x32xf32>
    %374 = vector.shape_cast %373 : vector<1x64x32xf32> to vector<64x32xf32>
    %cst_301 = arith.constant dense<0.000000e+00> : vector<64x3xf32>
    %375 = tpu.matmul %374, %372, %cst_301 {dimension_numbers = #tpu.dot_dimension_numbers<[1], [0], [0], [1], [0, 0, 1, 1], [], []>} : vector<64x32xf32>, vector<32x3xf32>, vector<64x3xf32> -> vector<64x3xf32>
    %376 = arith.addf %365, %375 : vector<64x3xf32>
    %c1_302 = arith.constant 1 : index
    %c0_303 = arith.constant 0 : index
    %c0_304 = arith.constant 0 : index
    %377 = vector.load %arg28[%c1_302, %c0_303, %c0_304] : memref<3x8x3xf32, #tpu.memory_space<vmem>>, vector<1x8x3xf32>
    %378 = vector.shape_cast %377 : vector<1x8x3xf32> to vector<8x3xf32>
    %cst_305 = arith.constant dense<0.000000e+00> : vector<32x3xf32>
    %379 = tpu.matmul %364, %378, %cst_305 {dimension_numbers = #tpu.dot_dimension_numbers<[1], [0], [0], [1], [0, 0, 1, 1], [], []>} : vector<32x8xf32>, vector<8x3xf32>, vector<32x3xf32> -> vector<32x3xf32>
    %c1_306 = arith.constant 1 : index
    %c0_307 = arith.constant 0 : index
    %c0_308 = arith.constant 0 : index
    %380 = vector.load %arg29[%c1_306, %c0_307, %c0_308] : memref<3x8x3xf32, #tpu.memory_space<vmem>>, vector<1x8x3xf32>
    %381 = vector.shape_cast %380 : vector<1x8x3xf32> to vector<8x3xf32>
    %cst_309 = arith.constant dense<0.000000e+00> : vector<32x3xf32>
    %382 = tpu.matmul %35, %381, %cst_309 {dimension_numbers = #tpu.dot_dimension_numbers<[1], [0], [0], [1], [0, 0, 1, 1], [], []>} : vector<32x8xf32>, vector<8x3xf32>, vector<32x3xf32> -> vector<32x3xf32>
    %383 = arith.addf %379, %382 : vector<32x3xf32>
    %c1_310 = arith.constant 1 : index
    %c0_311 = arith.constant 0 : index
    %c0_312 = arith.constant 0 : index
    %384 = vector.load %arg30[%c1_310, %c0_311, %c0_312] : memref<3x64x32xf32, #tpu.memory_space<vmem>>, vector<1x64x32xf32>
    %385 = vector.shape_cast %384 : vector<1x64x32xf32> to vector<64x32xf32>
    %cst_313 = arith.constant dense<0.000000e+00> : vector<64x3xf32>
    %386 = tpu.matmul %385, %383, %cst_313 {dimension_numbers = #tpu.dot_dimension_numbers<[1], [0], [0], [1], [0, 0, 1, 1], [], []>} : vector<64x32xf32>, vector<32x3xf32>, vector<64x3xf32> -> vector<64x3xf32>
    %387 = arith.addf %376, %386 : vector<64x3xf32>
    %c2_314 = arith.constant 2 : index
    %c0_315 = arith.constant 0 : index
    %c0_316 = arith.constant 0 : index
    %388 = vector.load %arg28[%c2_314, %c0_315, %c0_316] : memref<3x8x3xf32, #tpu.memory_space<vmem>>, vector<1x8x3xf32>
    %389 = vector.shape_cast %388 : vector<1x8x3xf32> to vector<8x3xf32>
    %cst_317 = arith.constant dense<0.000000e+00> : vector<32x3xf32>
    %390 = tpu.matmul %364, %389, %cst_317 {dimension_numbers = #tpu.dot_dimension_numbers<[1], [0], [0], [1], [0, 0, 1, 1], [], []>} : vector<32x8xf32>, vector<8x3xf32>, vector<32x3xf32> -> vector<32x3xf32>
    %c2_318 = arith.constant 2 : index
    %c0_319 = arith.constant 0 : index
    %c0_320 = arith.constant 0 : index
    %391 = vector.load %arg29[%c2_318, %c0_319, %c0_320] : memref<3x8x3xf32, #tpu.memory_space<vmem>>, vector<1x8x3xf32>
    %392 = vector.shape_cast %391 : vector<1x8x3xf32> to vector<8x3xf32>
    %cst_321 = arith.constant dense<0.000000e+00> : vector<32x3xf32>
    %393 = tpu.matmul %35, %392, %cst_321 {dimension_numbers = #tpu.dot_dimension_numbers<[1], [0], [0], [1], [0, 0, 1, 1], [], []>} : vector<32x8xf32>, vector<8x3xf32>, vector<32x3xf32> -> vector<32x3xf32>
    %394 = arith.addf %390, %393 : vector<32x3xf32>
    %c2_322 = arith.constant 2 : index
    %c0_323 = arith.constant 0 : index
    %c0_324 = arith.constant 0 : index
    %395 = vector.load %arg30[%c2_322, %c0_323, %c0_324] : memref<3x64x32xf32, #tpu.memory_space<vmem>>, vector<1x64x32xf32>
    %396 = vector.shape_cast %395 : vector<1x64x32xf32> to vector<64x32xf32>
    %cst_325 = arith.constant dense<0.000000e+00> : vector<64x3xf32>
    %397 = tpu.matmul %396, %394, %cst_325 {dimension_numbers = #tpu.dot_dimension_numbers<[1], [0], [0], [1], [0, 0, 1, 1], [], []>} : vector<64x32xf32>, vector<32x3xf32>, vector<64x3xf32> -> vector<64x3xf32>
    %398 = arith.addf %387, %397 : vector<64x3xf32>
    %c0_326 = arith.constant 0 : index
    %c0_327 = arith.constant 0 : index
    %c0_328 = arith.constant 0 : index
    %399 = vector.load %arg40[%c0_326, %c0_327, %c0_328] : memref<2x64x3xf32, #tpu.memory_space<vmem>>, vector<1x64x3xf32>
    %400 = vector.shape_cast %399 : vector<1x64x3xf32> to vector<64x3xf32>
    %401 = vector.shape_cast %398 : vector<64x3xf32> to vector<1x64x3xf32>
    tpu.vector_store %arg40[%c0_326, %c0_327, %c0_328], %401 {strides = array<i32>} : memref<2x64x3xf32, #tpu.memory_space<vmem>>, vector<1x64x3xf32>,
    %c1_329 = arith.constant 1 : index
    %c0_330 = arith.constant 0 : index
    %c0_331 = arith.constant 0 : index
    %402 = vector.load %arg0[%c1_329, %c0_330, %c0_331] : memref<2x64x3xf32, #tpu.memory_space<vmem>>, vector<1x64x3xf32>
    %403 = vector.shape_cast %402 : vector<1x64x3xf32> to vector<64x3xf32>
    %c0_332 = arith.constant 0 : index
    %c0_333 = arith.constant 0 : index
    %404 = vector.load %arg4[%c0_332, %c0_333] : memref<32x8xf32, #tpu.memory_space<vmem>>, vector<32x8xf32>
    %c0_334 = arith.constant 0 : index
    %c0_335 = arith.constant 0 : index
    %c0_336 = arith.constant 0 : index
    %405 = vector.load %arg2[%c0_334, %c0_335, %c0_336] : memref<3x3x8xf32, #tpu.memory_space<vmem>>, vector<1x3x8xf32>
    %406 = vector.shape_cast %405 : vector<1x3x8xf32> to vector<3x8xf32>
    %cst_337 = arith.constant dense<0.000000e+00> : vector<64x8xf32>
    %407 = tpu.matmul %403, %406, %cst_337 {dimension_numbers = #tpu.dot_dimension_numbers<[1], [0], [0], [1], [0, 0, 1, 1], [], []>} : vector<64x3xf32>, vector<3x8xf32>, vector<64x8xf32> -> vector<64x8xf32>
    %c0_338 = arith.constant 0 : index
    %c0_339 = arith.constant 0 : index
    %c0_340 = arith.constant 0 : index
    %408 = vector.load %arg3[%c0_338, %c0_339, %c0_340] : memref<3x32x64xf32, #tpu.memory_space<vmem>>, vector<1x32x64xf32>
    %409 = vector.shape_cast %408 : vector<1x32x64xf32> to vector<32x64xf32>
    %cst_341 = arith.constant dense<0.000000e+00> : vector<32x8xf32>
    %410 = tpu.matmul %409, %407, %cst_341 {dimension_numbers = #tpu.dot_dimension_numbers<[1], [0], [0], [1], [0, 0, 1, 1], [], []>} : vector<32x64xf32>, vector<64x8xf32>, vector<32x8xf32> -> vector<32x8xf32>
    %411 = arith.addf %404, %410 : vector<32x8xf32>
    %c1_342 = arith.constant 1 : index
    %c0_343 = arith.constant 0 : index
    %c0_344 = arith.constant 0 : index
    %412 = vector.load %arg2[%c1_342, %c0_343, %c0_344] : memref<3x3x8xf32, #tpu.memory_space<vmem>>, vector<1x3x8xf32>
    %413 = vector.shape_cast %412 : vector<1x3x8xf32> to vector<3x8xf32>
    %cst_345 = arith.constant dense<0.000000e+00> : vector<64x8xf32>
    %414 = tpu.matmul %403, %413, %cst_345 {dimension_numbers = #tpu.dot_dimension_numbers<[1], [0], [0], [1], [0, 0, 1, 1], [], []>} : vector<64x3xf32>, vector<3x8xf32>, vector<64x8xf32> -> vector<64x8xf32>
    %c1_346 = arith.constant 1 : index
    %c0_347 = arith.constant 0 : index
    %c0_348 = arith.constant 0 : index
    %415 = vector.load %arg3[%c1_346, %c0_347, %c0_348] : memref<3x32x64xf32, #tpu.memory_space<vmem>>, vector<1x32x64xf32>
    %416 = vector.shape_cast %415 : vector<1x32x64xf32> to vector<32x64xf32>
    %cst_349 = arith.constant dense<0.000000e+00> : vector<32x8xf32>
    %417 = tpu.matmul %416, %414, %cst_349 {dimension_numbers = #tpu.dot_dimension_numbers<[1], [0], [0], [1], [0, 0, 1, 1], [], []>} : vector<32x64xf32>, vector<64x8xf32>, vector<32x8xf32> -> vector<32x8xf32>
    %418 = arith.addf %411, %417 : vector<32x8xf32>
    %c2_350 = arith.constant 2 : index
    %c0_351 = arith.constant 0 : index
    %c0_352 = arith.constant 0 : index
    %419 = vector.load %arg2[%c2_350, %c0_351, %c0_352] : memref<3x3x8xf32, #tpu.memory_space<vmem>>, vector<1x3x8xf32>
    %420 = vector.shape_cast %419 : vector<1x3x8xf32> to vector<3x8xf32>
    %cst_353 = arith.constant dense<0.000000e+00> : vector<64x8xf32>
    %421 = tpu.matmul %403, %420, %cst_353 {dimension_numbers = #tpu.dot_dimension_numbers<[1], [0], [0], [1], [0, 0, 1, 1], [], []>} : vector<64x3xf32>, vector<3x8xf32>, vector<64x8xf32> -> vector<64x8xf32>
    %c2_354 = arith.constant 2 : index
    %c0_355 = arith.constant 0 : index
    %c0_356 = arith.constant 0 : index
    %422 = vector.load %arg3[%c2_354, %c0_355, %c0_356] : memref<3x32x64xf32, #tpu.memory_space<vmem>>, vector<1x32x64xf32>
    %423 = vector.shape_cast %422 : vector<1x32x64xf32> to vector<32x64xf32>
    %cst_357 = arith.constant dense<0.000000e+00> : vector<32x8xf32>
    %424 = tpu.matmul %423, %421, %cst_357 {dimension_numbers = #tpu.dot_dimension_numbers<[1], [0], [0], [1], [0, 0, 1, 1], [], []>} : vector<32x64xf32>, vector<64x8xf32>, vector<32x8xf32> -> vector<32x8xf32>
    %425 = arith.addf %418, %424 : vector<32x8xf32>
    %cst_358 = arith.constant 0.000000e+00 : f32
    %426 = vector.broadcast %cst_358 : f32 to vector<32x8xf32>
    %427 = arith.cmpf oge, %425, %426 : vector<32x8xf32>
    %cst_359 = arith.constant 0.00999999977 : f32
    %428 = vector.broadcast %cst_359 : f32 to vector<32x8xf32>
    %429 = arith.mulf %428, %425 : vector<32x8xf32>
    %430 = arith.select %427, %425, %429 : vector<32x8xi1>, vector<32x8xf32>
    %c0_360 = arith.constant 0 : index
    %c0_361 = arith.constant 0 : index
    %431 = vector.load %arg5[%c0_360, %c0_361] : memref<1x8xf32, #tpu.memory_space<vmem>>, vector<1x8xf32>
    %432 = vector.broadcast %431 : vector<1x8xf32> to vector<32x8xf32>
    %433 = arith.mulf %430, %432 : vector<32x8xf32>
    %c0_362 = arith.constant 0 : index
    %c0_363 = arith.constant 0 : index
    %434 = vector.load %arg6[%c0_362, %c0_363] : memref<1x8xf32, #tpu.memory_space<vmem>>, vector<1x8xf32>
    %435 = vector.broadcast %434 : vector<1x8xf32> to vector<32x8xf32>
    %436 = arith.addf %433, %435 : vector<32x8xf32>
    %c0_364 = arith.constant 0 : index
    %c0_365 = arith.constant 0 : index
    %437 = vector.load %arg9[%c0_364, %c0_365] : memref<16x16xf32, #tpu.memory_space<vmem>>, vector<16x16xf32>
    %c0_366 = arith.constant 0 : index
    %c0_367 = arith.constant 0 : index
    %c0_368 = arith.constant 0 : index
    %438 = vector.load %arg7[%c0_366, %c0_367, %c0_368] : memref<3x8x16xf32, #tpu.memory_space<vmem>>, vector<1x8x16xf32>
    %439 = vector.shape_cast %438 : vector<1x8x16xf32> to vector<8x16xf32>
    %cst_369 = arith.constant dense<0.000000e+00> : vector<32x16xf32>
    %440 = tpu.matmul %436, %439, %cst_369 {dimension_numbers = #tpu.dot_dimension_numbers<[1], [0], [0], [1], [0, 0, 1, 1], [], []>} : vector<32x8xf32>, vector<8x16xf32>, vector<32x16xf32> -> vector<32x16xf32>
    %c0_370 = arith.constant 0 : index
    %c0_371 = arith.constant 0 : index
    %c0_372 = arith.constant 0 : index
    %441 = vector.load %arg8[%c0_370, %c0_371, %c0_372] : memref<3x16x32xf32, #tpu.memory_space<vmem>>, vector<1x16x32xf32>
    %442 = vector.shape_cast %441 : vector<1x16x32xf32> to vector<16x32xf32>
    %cst_373 = arith.constant dense<0.000000e+00> : vector<16x16xf32>
    %443 = tpu.matmul %442, %440, %cst_373 {dimension_numbers = #tpu.dot_dimension_numbers<[1], [0], [0], [1], [0, 0, 1, 1], [], []>} : vector<16x32xf32>, vector<32x16xf32>, vector<16x16xf32> -> vector<16x16xf32>
    %444 = arith.addf %437, %443 : vector<16x16xf32>
    %c1_374 = arith.constant 1 : index
    %c0_375 = arith.constant 0 : index
    %c0_376 = arith.constant 0 : index
    %445 = vector.load %arg7[%c1_374, %c0_375, %c0_376] : memref<3x8x16xf32, #tpu.memory_space<vmem>>, vector<1x8x16xf32>
    %446 = vector.shape_cast %445 : vector<1x8x16xf32> to vector<8x16xf32>
    %cst_377 = arith.constant dense<0.000000e+00> : vector<32x16xf32>
    %447 = tpu.matmul %436, %446, %cst_377 {dimension_numbers = #tpu.dot_dimension_numbers<[1], [0], [0], [1], [0, 0, 1, 1], [], []>} : vector<32x8xf32>, vector<8x16xf32>, vector<32x16xf32> -> vector<32x16xf32>
    %c1_378 = arith.constant 1 : index
    %c0_379 = arith.constant 0 : index
    %c0_380 = arith.constant 0 : index
    %448 = vector.load %arg8[%c1_378, %c0_379, %c0_380] : memref<3x16x32xf32, #tpu.memory_space<vmem>>, vector<1x16x32xf32>
    %449 = vector.shape_cast %448 : vector<1x16x32xf32> to vector<16x32xf32>
    %cst_381 = arith.constant dense<0.000000e+00> : vector<16x16xf32>
    %450 = tpu.matmul %449, %447, %cst_381 {dimension_numbers = #tpu.dot_dimension_numbers<[1], [0], [0], [1], [0, 0, 1, 1], [], []>} : vector<16x32xf32>, vector<32x16xf32>, vector<16x16xf32> -> vector<16x16xf32>
    %451 = arith.addf %444, %450 : vector<16x16xf32>
    %c2_382 = arith.constant 2 : index
    %c0_383 = arith.constant 0 : index
    %c0_384 = arith.constant 0 : index
    %452 = vector.load %arg7[%c2_382, %c0_383, %c0_384] : memref<3x8x16xf32, #tpu.memory_space<vmem>>, vector<1x8x16xf32>
    %453 = vector.shape_cast %452 : vector<1x8x16xf32> to vector<8x16xf32>
    %cst_385 = arith.constant dense<0.000000e+00> : vector<32x16xf32>
    %454 = tpu.matmul %436, %453, %cst_385 {dimension_numbers = #tpu.dot_dimension_numbers<[1], [0], [0], [1], [0, 0, 1, 1], [], []>} : vector<32x8xf32>, vector<8x16xf32>, vector<32x16xf32> -> vector<32x16xf32>
    %c2_386 = arith.constant 2 : index
    %c0_387 = arith.constant 0 : index
    %c0_388 = arith.constant 0 : index
    %455 = vector.load %arg8[%c2_386, %c0_387, %c0_388] : memref<3x16x32xf32, #tpu.memory_space<vmem>>, vector<1x16x32xf32>
    %456 = vector.shape_cast %455 : vector<1x16x32xf32> to vector<16x32xf32>
    %cst_389 = arith.constant dense<0.000000e+00> : vector<16x16xf32>
    %457 = tpu.matmul %456, %454, %cst_389 {dimension_numbers = #tpu.dot_dimension_numbers<[1], [0], [0], [1], [0, 0, 1, 1], [], []>} : vector<16x32xf32>, vector<32x16xf32>, vector<16x16xf32> -> vector<16x16xf32>
    %458 = arith.addf %451, %457 : vector<16x16xf32>
    %cst_390 = arith.constant 0.000000e+00 : f32
    %459 = vector.broadcast %cst_390 : f32 to vector<16x16xf32>
    %460 = arith.cmpf oge, %458, %459 : vector<16x16xf32>
    %cst_391 = arith.constant 0.00999999977 : f32
    %461 = vector.broadcast %cst_391 : f32 to vector<16x16xf32>
    %462 = arith.mulf %461, %458 : vector<16x16xf32>
    %463 = arith.select %460, %458, %462 : vector<16x16xi1>, vector<16x16xf32>
    %c0_392 = arith.constant 0 : index
    %c0_393 = arith.constant 0 : index
    %464 = vector.load %arg10[%c0_392, %c0_393] : memref<1x16xf32, #tpu.memory_space<vmem>>, vector<1x16xf32>
    %465 = vector.broadcast %464 : vector<1x16xf32> to vector<16x16xf32>
    %466 = arith.mulf %463, %465 : vector<16x16xf32>
    %c0_394 = arith.constant 0 : index
    %c0_395 = arith.constant 0 : index
    %467 = vector.load %arg11[%c0_394, %c0_395] : memref<1x16xf32, #tpu.memory_space<vmem>>, vector<1x16xf32>
    %468 = vector.broadcast %467 : vector<1x16xf32> to vector<16x16xf32>
    %469 = arith.addf %466, %468 : vector<16x16xf32>
    %c0_396 = arith.constant 0 : index
    %c0_397 = arith.constant 0 : index
    %470 = vector.load %arg14[%c0_396, %c0_397] : memref<8x32xf32, #tpu.memory_space<vmem>>, vector<8x32xf32>
    %c0_398 = arith.constant 0 : index
    %c0_399 = arith.constant 0 : index
    %c0_400 = arith.constant 0 : index
    %471 = vector.load %arg12[%c0_398, %c0_399, %c0_400] : memref<3x16x32xf32, #tpu.memory_space<vmem>>, vector<1x16x32xf32>
    %472 = vector.shape_cast %471 : vector<1x16x32xf32> to vector<16x32xf32>
    %cst_401 = arith.constant dense<0.000000e+00> : vector<16x32xf32>
    %473 = tpu.matmul %469, %472, %cst_401 {dimension_numbers = #tpu.dot_dimension_numbers<[1], [0], [0], [1], [0, 0, 1, 1], [], []>} : vector<16x16xf32>, vector<16x32xf32>, vector<16x32xf32> -> vector<16x32xf32>
    %c0_402 = arith.constant 0 : index
    %c0_403 = arith.constant 0 : index
    %c0_404 = arith.constant 0 : index
    %474 = vector.load %arg13[%c0_402, %c0_403, %c0_404] : memref<3x8x16xf32, #tpu.memory_space<vmem>>, vector<1x8x16xf32>
    %475 = vector.shape_cast %474 : vector<1x8x16xf32> to vector<8x16xf32>
    %cst_405 = arith.constant dense<0.000000e+00> : vector<8x32xf32>
    %476 = tpu.matmul %475, %473, %cst_405 {dimension_numbers = #tpu.dot_dimension_numbers<[1], [0], [0], [1], [0, 0, 1, 1], [], []>} : vector<8x16xf32>, vector<16x32xf32>, vector<8x32xf32> -> vector<8x32xf32>
    %477 = arith.addf %470, %476 : vector<8x32xf32>
    %c1_406 = arith.constant 1 : index
    %c0_407 = arith.constant 0 : index
    %c0_408 = arith.constant 0 : index
    %478 = vector.load %arg12[%c1_406, %c0_407, %c0_408] : memref<3x16x32xf32, #tpu.memory_space<vmem>>, vector<1x16x32xf32>
    %479 = vector.shape_cast %478 : vector<1x16x32xf32> to vector<16x32xf32>
    %cst_409 = arith.constant dense<0.000000e+00> : vector<16x32xf32>
    %480 = tpu.matmul %469, %479, %cst_409 {dimension_numbers = #tpu.dot_dimension_numbers<[1], [0], [0], [1], [0, 0, 1, 1], [], []>} : vector<16x16xf32>, vector<16x32xf32>, vector<16x32xf32> -> vector<16x32xf32>
    %c1_410 = arith.constant 1 : index
    %c0_411 = arith.constant 0 : index
    %c0_412 = arith.constant 0 : index
    %481 = vector.load %arg13[%c1_410, %c0_411, %c0_412] : memref<3x8x16xf32, #tpu.memory_space<vmem>>, vector<1x8x16xf32>
    %482 = vector.shape_cast %481 : vector<1x8x16xf32> to vector<8x16xf32>
    %cst_413 = arith.constant dense<0.000000e+00> : vector<8x32xf32>
    %483 = tpu.matmul %482, %480, %cst_413 {dimension_numbers = #tpu.dot_dimension_numbers<[1], [0], [0], [1], [0, 0, 1, 1], [], []>} : vector<8x16xf32>, vector<16x32xf32>, vector<8x32xf32> -> vector<8x32xf32>
    %484 = arith.addf %477, %483 : vector<8x32xf32>
    %c2_414 = arith.constant 2 : index
    %c0_415 = arith.constant 0 : index
    %c0_416 = arith.constant 0 : index
    %485 = vector.load %arg12[%c2_414, %c0_415, %c0_416] : memref<3x16x32xf32, #tpu.memory_space<vmem>>, vector<1x16x32xf32>
    %486 = vector.shape_cast %485 : vector<1x16x32xf32> to vector<16x32xf32>
    %cst_417 = arith.constant dense<0.000000e+00> : vector<16x32xf32>
    %487 = tpu.matmul %469, %486, %cst_417 {dimension_numbers = #tpu.dot_dimension_numbers<[1], [0], [0], [1], [0, 0, 1, 1], [], []>} : vector<16x16xf32>, vector<16x32xf32>, vector<16x32xf32> -> vector<16x32xf32>
    %c2_418 = arith.constant 2 : index
    %c0_419 = arith.constant 0 : index
    %c0_420 = arith.constant 0 : index
    %488 = vector.load %arg13[%c2_418, %c0_419, %c0_420] : memref<3x8x16xf32, #tpu.memory_space<vmem>>, vector<1x8x16xf32>
    %489 = vector.shape_cast %488 : vector<1x8x16xf32> to vector<8x16xf32>
    %cst_421 = arith.constant dense<0.000000e+00> : vector<8x32xf32>
    %490 = tpu.matmul %489, %487, %cst_421 {dimension_numbers = #tpu.dot_dimension_numbers<[1], [0], [0], [1], [0, 0, 1, 1], [], []>} : vector<8x16xf32>, vector<16x32xf32>, vector<8x32xf32> -> vector<8x32xf32>
    %491 = arith.addf %484, %490 : vector<8x32xf32>
    %cst_422 = arith.constant 0.000000e+00 : f32
    %492 = vector.broadcast %cst_422 : f32 to vector<8x32xf32>
    %493 = arith.cmpf oge, %491, %492 : vector<8x32xf32>
    %cst_423 = arith.constant 0.00999999977 : f32
    %494 = vector.broadcast %cst_423 : f32 to vector<8x32xf32>
    %495 = arith.mulf %494, %491 : vector<8x32xf32>
    %496 = arith.select %493, %491, %495 : vector<8x32xi1>, vector<8x32xf32>
    %c0_424 = arith.constant 0 : index
    %c0_425 = arith.constant 0 : index
    %497 = vector.load %arg15[%c0_424, %c0_425] : memref<1x32xf32, #tpu.memory_space<vmem>>, vector<1x32xf32>
    %498 = vector.broadcast %497 : vector<1x32xf32> to vector<8x32xf32>
    %499 = arith.mulf %496, %498 : vector<8x32xf32>
    %c0_426 = arith.constant 0 : index
    %c0_427 = arith.constant 0 : index
    %500 = vector.load %arg16[%c0_426, %c0_427] : memref<1x32xf32, #tpu.memory_space<vmem>>, vector<1x32xf32>
    %501 = vector.broadcast %500 : vector<1x32xf32> to vector<8x32xf32>
    %502 = arith.addf %499, %501 : vector<8x32xf32>
    %c0_428 = arith.constant 0 : index
    %c0_429 = arith.constant 0 : index
    %503 = vector.load %arg33[%c0_428, %c0_429] : memref<1x8xf32, #tpu.memory_space<vmem>>, vector<1x8xf32>
    %c0_i32_430 = arith.constant 0 : i32
    %504 = vector.broadcast %c0_i32_430 : i32 to vector<8x32xi32>
    %505 = arith.cmpi eq, %0, %504 : vector<8x32xi32>
    %cst_431 = arith.constant 0.000000e+00 : f32
    %506 = vector.broadcast %cst_431 : f32 to vector<8x32xf32>
    %507 = arith.select %505, %502, %506 : vector<8x32xi1>, vector<8x32xf32>
    %cst_432 = arith.constant dense<0.000000e+00> : vector<32xf32>
    %508 = vector.multi_reduction <add>, %507, %cst_432 [0] : vector<8x32xf32> to vector<32xf32>
    %509 = vector.shape_cast %508 : vector<32xf32> to vector<1x32xf32>
    %c0_433 = arith.constant 0 : index
    %c0_434 = arith.constant 0 : index
    %c0_435 = arith.constant 0 : index
    %510 = vector.load %arg32[%c0_433, %c0_434, %c0_435] : memref<8x32x8xf32, #tpu.memory_space<vmem>>, vector<1x32x8xf32>
    %511 = vector.shape_cast %510 : vector<1x32x8xf32> to vector<32x8xf32>
    %cst_436 = arith.constant dense<0.000000e+00> : vector<1x8xf32>
    %512 = tpu.matmul %509, %511, %cst_436 {dimension_numbers = #tpu.dot_dimension_numbers<[1], [0], [0], [1], [0, 0, 1, 1], [], []>} : vector<1x32xf32>, vector<32x8xf32>, vector<1x8xf32> -> vector<1x8xf32>
    %513 = arith.addf %503, %512 : vector<1x8xf32>
    %c1_i32_437 = arith.constant 1 : i32
    %514 = vector.broadcast %c1_i32_437 : i32 to vector<8x32xi32>
    %515 = arith.cmpi eq, %0, %514 : vector<8x32xi32>
    %cst_438 = arith.constant 0.000000e+00 : f32
    %516 = vector.broadcast %cst_438 : f32 to vector<8x32xf32>
    %517 = arith.select %515, %502, %516 : vector<8x32xi1>, vector<8x32xf32>
    %cst_439 = arith.constant dense<0.000000e+00> : vector<32xf32>
    %518 = vector.multi_reduction <add>, %517, %cst_439 [0] : vector<8x32xf32> to vector<32xf32>
    %519 = vector.shape_cast %518 : vector<32xf32> to vector<1x32xf32>
    %c1_440 = arith.constant 1 : index
    %c0_441 = arith.constant 0 : index
    %c0_442 = arith.constant 0 : index
    %520 = vector.load %arg32[%c1_440, %c0_441, %c0_442] : memref<8x32x8xf32, #tpu.memory_space<vmem>>, vector<1x32x8xf32>
    %521 = vector.shape_cast %520 : vector<1x32x8xf32> to vector<32x8xf32>
    %cst_443 = arith.constant dense<0.000000e+00> : vector<1x8xf32>
    %522 = tpu.matmul %519, %521, %cst_443 {dimension_numbers = #tpu.dot_dimension_numbers<[1], [0], [0], [1], [0, 0, 1, 1], [], []>} : vector<1x32xf32>, vector<32x8xf32>, vector<1x8xf32> -> vector<1x8xf32>
    %523 = arith.addf %513, %522 : vector<1x8xf32>
    %c2_i32_444 = arith.constant 2 : i32
    %524 = vector.broadcast %c2_i32_444 : i32 to vector<8x32xi32>
    %525 = arith.cmpi eq, %0, %524 : vector<8x32xi32>
    %cst_445 = arith.constant 0.000000e+00 : f32
    %526 = vector.broadcast %cst_445 : f32 to vector<8x32xf32>
    %527 = arith.select %525, %502, %526 : vector<8x32xi1>, vector<8x32xf32>
    %cst_446 = arith.constant dense<0.000000e+00> : vector<32xf32>
    %528 = vector.multi_reduction <add>, %527, %cst_446 [0] : vector<8x32xf32> to vector<32xf32>
    %529 = vector.shape_cast %528 : vector<32xf32> to vector<1x32xf32>
    %c2_447 = arith.constant 2 : index
    %c0_448 = arith.constant 0 : index
    %c0_449 = arith.constant 0 : index
    %530 = vector.load %arg32[%c2_447, %c0_448, %c0_449] : memref<8x32x8xf32, #tpu.memory_space<vmem>>, vector<1x32x8xf32>
    %531 = vector.shape_cast %530 : vector<1x32x8xf32> to vector<32x8xf32>
    %cst_450 = arith.constant dense<0.000000e+00> : vector<1x8xf32>
    %532 = tpu.matmul %529, %531, %cst_450 {dimension_numbers = #tpu.dot_dimension_numbers<[1], [0], [0], [1], [0, 0, 1, 1], [], []>} : vector<1x32xf32>, vector<32x8xf32>, vector<1x8xf32> -> vector<1x8xf32>
    %533 = arith.addf %523, %532 : vector<1x8xf32>
    %c3_i32_451 = arith.constant 3 : i32
    %534 = vector.broadcast %c3_i32_451 : i32 to vector<8x32xi32>
    %535 = arith.cmpi eq, %0, %534 : vector<8x32xi32>
    %cst_452 = arith.constant 0.000000e+00 : f32
    %536 = vector.broadcast %cst_452 : f32 to vector<8x32xf32>
    %537 = arith.select %535, %502, %536 : vector<8x32xi1>, vector<8x32xf32>
    %cst_453 = arith.constant dense<0.000000e+00> : vector<32xf32>
    %538 = vector.multi_reduction <add>, %537, %cst_453 [0] : vector<8x32xf32> to vector<32xf32>
    %539 = vector.shape_cast %538 : vector<32xf32> to vector<1x32xf32>
    %c3_454 = arith.constant 3 : index
    %c0_455 = arith.constant 0 : index
    %c0_456 = arith.constant 0 : index
    %540 = vector.load %arg32[%c3_454, %c0_455, %c0_456] : memref<8x32x8xf32, #tpu.memory_space<vmem>>, vector<1x32x8xf32>
    %541 = vector.shape_cast %540 : vector<1x32x8xf32> to vector<32x8xf32>
    %cst_457 = arith.constant dense<0.000000e+00> : vector<1x8xf32>
    %542 = tpu.matmul %539, %541, %cst_457 {dimension_numbers = #tpu.dot_dimension_numbers<[1], [0], [0], [1], [0, 0, 1, 1], [], []>} : vector<1x32xf32>, vector<32x8xf32>, vector<1x8xf32> -> vector<1x8xf32>
    %543 = arith.addf %533, %542 : vector<1x8xf32>
    %c4_i32_458 = arith.constant 4 : i32
    %544 = vector.broadcast %c4_i32_458 : i32 to vector<8x32xi32>
    %545 = arith.cmpi eq, %0, %544 : vector<8x32xi32>
    %cst_459 = arith.constant 0.000000e+00 : f32
    %546 = vector.broadcast %cst_459 : f32 to vector<8x32xf32>
    %547 = arith.select %545, %502, %546 : vector<8x32xi1>, vector<8x32xf32>
    %cst_460 = arith.constant dense<0.000000e+00> : vector<32xf32>
    %548 = vector.multi_reduction <add>, %547, %cst_460 [0] : vector<8x32xf32> to vector<32xf32>
    %549 = vector.shape_cast %548 : vector<32xf32> to vector<1x32xf32>
    %c4_461 = arith.constant 4 : index
    %c0_462 = arith.constant 0 : index
    %c0_463 = arith.constant 0 : index
    %550 = vector.load %arg32[%c4_461, %c0_462, %c0_463] : memref<8x32x8xf32, #tpu.memory_space<vmem>>, vector<1x32x8xf32>
    %551 = vector.shape_cast %550 : vector<1x32x8xf32> to vector<32x8xf32>
    %cst_464 = arith.constant dense<0.000000e+00> : vector<1x8xf32>
    %552 = tpu.matmul %549, %551, %cst_464 {dimension_numbers = #tpu.dot_dimension_numbers<[1], [0], [0], [1], [0, 0, 1, 1], [], []>} : vector<1x32xf32>, vector<32x8xf32>, vector<1x8xf32> -> vector<1x8xf32>
    %553 = arith.addf %543, %552 : vector<1x8xf32>
    %c5_i32_465 = arith.constant 5 : i32
    %554 = vector.broadcast %c5_i32_465 : i32 to vector<8x32xi32>
    %555 = arith.cmpi eq, %0, %554 : vector<8x32xi32>
    %cst_466 = arith.constant 0.000000e+00 : f32
    %556 = vector.broadcast %cst_466 : f32 to vector<8x32xf32>
    %557 = arith.select %555, %502, %556 : vector<8x32xi1>, vector<8x32xf32>
    %cst_467 = arith.constant dense<0.000000e+00> : vector<32xf32>
    %558 = vector.multi_reduction <add>, %557, %cst_467 [0] : vector<8x32xf32> to vector<32xf32>
    %559 = vector.shape_cast %558 : vector<32xf32> to vector<1x32xf32>
    %c5_468 = arith.constant 5 : index
    %c0_469 = arith.constant 0 : index
    %c0_470 = arith.constant 0 : index
    %560 = vector.load %arg32[%c5_468, %c0_469, %c0_470] : memref<8x32x8xf32, #tpu.memory_space<vmem>>, vector<1x32x8xf32>
    %561 = vector.shape_cast %560 : vector<1x32x8xf32> to vector<32x8xf32>
    %cst_471 = arith.constant dense<0.000000e+00> : vector<1x8xf32>
    %562 = tpu.matmul %559, %561, %cst_471 {dimension_numbers = #tpu.dot_dimension_numbers<[1], [0], [0], [1], [0, 0, 1, 1], [], []>} : vector<1x32xf32>, vector<32x8xf32>, vector<1x8xf32> -> vector<1x8xf32>
    %563 = arith.addf %553, %562 : vector<1x8xf32>
    %c6_i32_472 = arith.constant 6 : i32
    %564 = vector.broadcast %c6_i32_472 : i32 to vector<8x32xi32>
    %565 = arith.cmpi eq, %0, %564 : vector<8x32xi32>
    %cst_473 = arith.constant 0.000000e+00 : f32
    %566 = vector.broadcast %cst_473 : f32 to vector<8x32xf32>
    %567 = arith.select %565, %502, %566 : vector<8x32xi1>, vector<8x32xf32>
    %cst_474 = arith.constant dense<0.000000e+00> : vector<32xf32>
    %568 = vector.multi_reduction <add>, %567, %cst_474 [0] : vector<8x32xf32> to vector<32xf32>
    %569 = vector.shape_cast %568 : vector<32xf32> to vector<1x32xf32>
    %c6_475 = arith.constant 6 : index
    %c0_476 = arith.constant 0 : index
    %c0_477 = arith.constant 0 : index
    %570 = vector.load %arg32[%c6_475, %c0_476, %c0_477] : memref<8x32x8xf32, #tpu.memory_space<vmem>>, vector<1x32x8xf32>
    %571 = vector.shape_cast %570 : vector<1x32x8xf32> to vector<32x8xf32>
    %cst_478 = arith.constant dense<0.000000e+00> : vector<1x8xf32>
    %572 = tpu.matmul %569, %571, %cst_478 {dimension_numbers = #tpu.dot_dimension_numbers<[1], [0], [0], [1], [0, 0, 1, 1], [], []>} : vector<1x32xf32>, vector<32x8xf32>, vector<1x8xf32> -> vector<1x8xf32>
    %573 = arith.addf %563, %572 : vector<1x8xf32>
    %c7_i32_479 = arith.constant 7 : i32
    %574 = vector.broadcast %c7_i32_479 : i32 to vector<8x32xi32>
    %575 = arith.cmpi eq, %0, %574 : vector<8x32xi32>
    %cst_480 = arith.constant 0.000000e+00 : f32
    %576 = vector.broadcast %cst_480 : f32 to vector<8x32xf32>
    %577 = arith.select %575, %502, %576 : vector<8x32xi1>, vector<8x32xf32>
    %cst_481 = arith.constant dense<0.000000e+00> : vector<32xf32>
    %578 = vector.multi_reduction <add>, %577, %cst_481 [0] : vector<8x32xf32> to vector<32xf32>
    %579 = vector.shape_cast %578 : vector<32xf32> to vector<1x32xf32>
    %c7_482 = arith.constant 7 : index
    %c0_483 = arith.constant 0 : index
    %c0_484 = arith.constant 0 : index
    %580 = vector.load %arg32[%c7_482, %c0_483, %c0_484] : memref<8x32x8xf32, #tpu.memory_space<vmem>>, vector<1x32x8xf32>
    %581 = vector.shape_cast %580 : vector<1x32x8xf32> to vector<32x8xf32>
    %cst_485 = arith.constant dense<0.000000e+00> : vector<1x8xf32>
    %582 = tpu.matmul %579, %581, %cst_485 {dimension_numbers = #tpu.dot_dimension_numbers<[1], [0], [0], [1], [0, 0, 1, 1], [], []>} : vector<1x32xf32>, vector<32x8xf32>, vector<1x8xf32> -> vector<1x8xf32>
    %583 = arith.addf %573, %582 : vector<1x8xf32>
    %c0_486 = arith.constant 0 : index
    %c0_487 = arith.constant 0 : index
    %584 = vector.load %arg34[%c0_486, %c0_487] : memref<8x8xf32, #tpu.memory_space<vmem>>, vector<8x8xf32>
    %cst_488 = arith.constant dense<0.000000e+00> : vector<1x8xf32>
    %585 = tpu.matmul %583, %584, %cst_488 {dimension_numbers = #tpu.dot_dimension_numbers<[1], [0], [0], [1], [0, 0, 1, 1], [], []>} : vector<1x8xf32>, vector<8x8xf32>, vector<1x8xf32> -> vector<1x8xf32>
    %c0_489 = arith.constant 0 : index
    %c0_490 = arith.constant 0 : index
    %586 = vector.load %arg35[%c0_489, %c0_490] : memref<1x8xf32, #tpu.memory_space<vmem>>, vector<1x8xf32>
    %587 = arith.addf %585, %586 : vector<1x8xf32>
    %c0_491 = arith.constant 0 : index
    %c0_492 = arith.constant 0 : index
    %588 = vector.load %arg36[%c0_491, %c0_492] : memref<8x8xf32, #tpu.memory_space<vmem>>, vector<8x8xf32>
    %cst_493 = arith.constant dense<0.000000e+00> : vector<1x8xf32>
    %589 = tpu.matmul %583, %588, %cst_493 {dimension_numbers = #tpu.dot_dimension_numbers<[1], [0], [0], [1], [0, 0, 1, 1], [], []>} : vector<1x8xf32>, vector<8x8xf32>, vector<1x8xf32> -> vector<1x8xf32>
    %c0_494 = arith.constant 0 : index
    %c0_495 = arith.constant 0 : index
    %590 = vector.load %arg37[%c0_494, %c0_495] : memref<1x8xf32, #tpu.memory_space<vmem>>, vector<1x8xf32>
    %591 = arith.addf %589, %590 : vector<1x8xf32>
    %c1_496 = arith.constant 1 : index
    %c0_497 = arith.constant 0 : index
    %c0_498 = arith.constant 0 : index
    %592 = vector.load %arg1[%c1_496, %c0_497, %c0_498] : memref<2x1x8xf32, #tpu.memory_space<vmem>>, vector<1x1x8xf32>
    %593 = vector.shape_cast %592 : vector<1x1x8xf32> to vector<1x8xf32>
    %cst_499 = arith.constant 5.000000e-01 : f32
    %594 = vector.broadcast %cst_499 : f32 to vector<1x8xf32>
    %595 = arith.mulf %594, %591 : vector<1x8xf32>
    %596 = math.exp %595 : vector<1x8xf32>
    %597 = arith.mulf %593, %596 : vector<1x8xf32>
    %598 = arith.addf %587, %597 : vector<1x8xf32>
    %c0_500 = arith.constant 0 : index
    %c0_501 = arith.constant 0 : index
    %599 = vector.load %arg39[%c0_500, %c0_501] : memref<8x32xf32, #tpu.memory_space<vmem>>, vector<8x32xf32>
    %c0_502 = arith.constant 0 : index
    %c0_503 = arith.constant 0 : index
    %c0_504 = arith.constant 0 : index
    %600 = vector.load %arg38[%c0_502, %c0_503, %c0_504] : memref<8x8x32xf32, #tpu.memory_space<vmem>>, vector<1x8x32xf32>
    %601 = vector.shape_cast %600 : vector<1x8x32xf32> to vector<8x32xf32>
    %cst_505 = arith.constant dense<0.000000e+00> : vector<1x32xf32>
    %602 = tpu.matmul %598, %601, %cst_505 {dimension_numbers = #tpu.dot_dimension_numbers<[1], [0], [0], [1], [0, 0, 1, 1], [], []>} : vector<1x8xf32>, vector<8x32xf32>, vector<1x32xf32> -> vector<1x32xf32>
    %c0_i32_506 = arith.constant 0 : i32
    %603 = vector.broadcast %c0_i32_506 : i32 to vector<8x32xi32>
    %604 = arith.cmpi eq, %0, %603 : vector<8x32xi32>
    %cst_507 = arith.constant 1.000000e+00 : f32
    %cst_508 = arith.constant 0.000000e+00 : f32
    %605 = vector.broadcast %cst_507 : f32 to vector<8x32xf32>
    %606 = vector.broadcast %cst_508 : f32 to vector<8x32xf32>
    %607 = arith.select %604, %605, %606 : vector<8x32xi1>, vector<8x32xf32>
    %608 = vector.broadcast %602 : vector<1x32xf32> to vector<8x32xf32>
    %609 = arith.mulf %607, %608 : vector<8x32xf32>
    %610 = arith.addf %599, %609 : vector<8x32xf32>
    %c1_509 = arith.constant 1 : index
    %c0_510 = arith.constant 0 : index
    %c0_511 = arith.constant 0 : index
    %611 = vector.load %arg38[%c1_509, %c0_510, %c0_511] : memref<8x8x32xf32, #tpu.memory_space<vmem>>, vector<1x8x32xf32>
    %612 = vector.shape_cast %611 : vector<1x8x32xf32> to vector<8x32xf32>
    %cst_512 = arith.constant dense<0.000000e+00> : vector<1x32xf32>
    %613 = tpu.matmul %598, %612, %cst_512 {dimension_numbers = #tpu.dot_dimension_numbers<[1], [0], [0], [1], [0, 0, 1, 1], [], []>} : vector<1x8xf32>, vector<8x32xf32>, vector<1x32xf32> -> vector<1x32xf32>
    %c1_i32_513 = arith.constant 1 : i32
    %614 = vector.broadcast %c1_i32_513 : i32 to vector<8x32xi32>
    %615 = arith.cmpi eq, %0, %614 : vector<8x32xi32>
    %cst_514 = arith.constant 1.000000e+00 : f32
    %cst_515 = arith.constant 0.000000e+00 : f32
    %616 = vector.broadcast %cst_514 : f32 to vector<8x32xf32>
    %617 = vector.broadcast %cst_515 : f32 to vector<8x32xf32>
    %618 = arith.select %615, %616, %617 : vector<8x32xi1>, vector<8x32xf32>
    %619 = vector.broadcast %613 : vector<1x32xf32> to vector<8x32xf32>
    %620 = arith.mulf %618, %619 : vector<8x32xf32>
    %621 = arith.addf %610, %620 : vector<8x32xf32>
    %c2_516 = arith.constant 2 : index
    %c0_517 = arith.constant 0 : index
    %c0_518 = arith.constant 0 : index
    %622 = vector.load %arg38[%c2_516, %c0_517, %c0_518] : memref<8x8x32xf32, #tpu.memory_space<vmem>>, vector<1x8x32xf32>
    %623 = vector.shape_cast %622 : vector<1x8x32xf32> to vector<8x32xf32>
    %cst_519 = arith.constant dense<0.000000e+00> : vector<1x32xf32>
    %624 = tpu.matmul %598, %623, %cst_519 {dimension_numbers = #tpu.dot_dimension_numbers<[1], [0], [0], [1], [0, 0, 1, 1], [], []>} : vector<1x8xf32>, vector<8x32xf32>, vector<1x32xf32> -> vector<1x32xf32>
    %c2_i32_520 = arith.constant 2 : i32
    %625 = vector.broadcast %c2_i32_520 : i32 to vector<8x32xi32>
    %626 = arith.cmpi eq, %0, %625 : vector<8x32xi32>
    %cst_521 = arith.constant 1.000000e+00 : f32
    %cst_522 = arith.constant 0.000000e+00 : f32
    %627 = vector.broadcast %cst_521 : f32 to vector<8x32xf32>
    %628 = vector.broadcast %cst_522 : f32 to vector<8x32xf32>
    %629 = arith.select %626, %627, %628 : vector<8x32xi1>, vector<8x32xf32>
    %630 = vector.broadcast %624 : vector<1x32xf32> to vector<8x32xf32>
    %631 = arith.mulf %629, %630 : vector<8x32xf32>
    %632 = arith.addf %621, %631 : vector<8x32xf32>
    %c3_523 = arith.constant 3 : index
    %c0_524 = arith.constant 0 : index
    %c0_525 = arith.constant 0 : index
    %633 = vector.load %arg38[%c3_523, %c0_524, %c0_525] : memref<8x8x32xf32, #tpu.memory_space<vmem>>, vector<1x8x32xf32>
    %634 = vector.shape_cast %633 : vector<1x8x32xf32> to vector<8x32xf32>
    %cst_526 = arith.constant dense<0.000000e+00> : vector<1x32xf32>
    %635 = tpu.matmul %598, %634, %cst_526 {dimension_numbers = #tpu.dot_dimension_numbers<[1], [0], [0], [1], [0, 0, 1, 1], [], []>} : vector<1x8xf32>, vector<8x32xf32>, vector<1x32xf32> -> vector<1x32xf32>
    %c3_i32_527 = arith.constant 3 : i32
    %636 = vector.broadcast %c3_i32_527 : i32 to vector<8x32xi32>
    %637 = arith.cmpi eq, %0, %636 : vector<8x32xi32>
    %cst_528 = arith.constant 1.000000e+00 : f32
    %cst_529 = arith.constant 0.000000e+00 : f32
    %638 = vector.broadcast %cst_528 : f32 to vector<8x32xf32>
    %639 = vector.broadcast %cst_529 : f32 to vector<8x32xf32>
    %640 = arith.select %637, %638, %639 : vector<8x32xi1>, vector<8x32xf32>
    %641 = vector.broadcast %635 : vector<1x32xf32> to vector<8x32xf32>
    %642 = arith.mulf %640, %641 : vector<8x32xf32>
    %643 = arith.addf %632, %642 : vector<8x32xf32>
    %c4_530 = arith.constant 4 : index
    %c0_531 = arith.constant 0 : index
    %c0_532 = arith.constant 0 : index
    %644 = vector.load %arg38[%c4_530, %c0_531, %c0_532] : memref<8x8x32xf32, #tpu.memory_space<vmem>>, vector<1x8x32xf32>
    %645 = vector.shape_cast %644 : vector<1x8x32xf32> to vector<8x32xf32>
    %cst_533 = arith.constant dense<0.000000e+00> : vector<1x32xf32>
    %646 = tpu.matmul %598, %645, %cst_533 {dimension_numbers = #tpu.dot_dimension_numbers<[1], [0], [0], [1], [0, 0, 1, 1], [], []>} : vector<1x8xf32>, vector<8x32xf32>, vector<1x32xf32> -> vector<1x32xf32>
    %c4_i32_534 = arith.constant 4 : i32
    %647 = vector.broadcast %c4_i32_534 : i32 to vector<8x32xi32>
    %648 = arith.cmpi eq, %0, %647 : vector<8x32xi32>
    %cst_535 = arith.constant 1.000000e+00 : f32
    %cst_536 = arith.constant 0.000000e+00 : f32
    %649 = vector.broadcast %cst_535 : f32 to vector<8x32xf32>
    %650 = vector.broadcast %cst_536 : f32 to vector<8x32xf32>
    %651 = arith.select %648, %649, %650 : vector<8x32xi1>, vector<8x32xf32>
    %652 = vector.broadcast %646 : vector<1x32xf32> to vector<8x32xf32>
    %653 = arith.mulf %651, %652 : vector<8x32xf32>
    %654 = arith.addf %643, %653 : vector<8x32xf32>
    %c5_537 = arith.constant 5 : index
    %c0_538 = arith.constant 0 : index
    %c0_539 = arith.constant 0 : index
    %655 = vector.load %arg38[%c5_537, %c0_538, %c0_539] : memref<8x8x32xf32, #tpu.memory_space<vmem>>, vector<1x8x32xf32>
    %656 = vector.shape_cast %655 : vector<1x8x32xf32> to vector<8x32xf32>
    %cst_540 = arith.constant dense<0.000000e+00> : vector<1x32xf32>
    %657 = tpu.matmul %598, %656, %cst_540 {dimension_numbers = #tpu.dot_dimension_numbers<[1], [0], [0], [1], [0, 0, 1, 1], [], []>} : vector<1x8xf32>, vector<8x32xf32>, vector<1x32xf32> -> vector<1x32xf32>
    %c5_i32_541 = arith.constant 5 : i32
    %658 = vector.broadcast %c5_i32_541 : i32 to vector<8x32xi32>
    %659 = arith.cmpi eq, %0, %658 : vector<8x32xi32>
    %cst_542 = arith.constant 1.000000e+00 : f32
    %cst_543 = arith.constant 0.000000e+00 : f32
    %660 = vector.broadcast %cst_542 : f32 to vector<8x32xf32>
    %661 = vector.broadcast %cst_543 : f32 to vector<8x32xf32>
    %662 = arith.select %659, %660, %661 : vector<8x32xi1>, vector<8x32xf32>
    %663 = vector.broadcast %657 : vector<1x32xf32> to vector<8x32xf32>
    %664 = arith.mulf %662, %663 : vector<8x32xf32>
    %665 = arith.addf %654, %664 : vector<8x32xf32>
    %c6_544 = arith.constant 6 : index
    %c0_545 = arith.constant 0 : index
    %c0_546 = arith.constant 0 : index
    %666 = vector.load %arg38[%c6_544, %c0_545, %c0_546] : memref<8x8x32xf32, #tpu.memory_space<vmem>>, vector<1x8x32xf32>
    %667 = vector.shape_cast %666 : vector<1x8x32xf32> to vector<8x32xf32>
    %cst_547 = arith.constant dense<0.000000e+00> : vector<1x32xf32>
    %668 = tpu.matmul %598, %667, %cst_547 {dimension_numbers = #tpu.dot_dimension_numbers<[1], [0], [0], [1], [0, 0, 1, 1], [], []>} : vector<1x8xf32>, vector<8x32xf32>, vector<1x32xf32> -> vector<1x32xf32>
    %c6_i32_548 = arith.constant 6 : i32
    %669 = vector.broadcast %c6_i32_548 : i32 to vector<8x32xi32>
    %670 = arith.cmpi eq, %0, %669 : vector<8x32xi32>
    %cst_549 = arith.constant 1.000000e+00 : f32
    %cst_550 = arith.constant 0.000000e+00 : f32
    %671 = vector.broadcast %cst_549 : f32 to vector<8x32xf32>
    %672 = vector.broadcast %cst_550 : f32 to vector<8x32xf32>
    %673 = arith.select %670, %671, %672 : vector<8x32xi1>, vector<8x32xf32>
    %674 = vector.broadcast %668 : vector<1x32xf32> to vector<8x32xf32>
    %675 = arith.mulf %673, %674 : vector<8x32xf32>
    %676 = arith.addf %665, %675 : vector<8x32xf32>
    %c7_551 = arith.constant 7 : index
    %c0_552 = arith.constant 0 : index
    %c0_553 = arith.constant 0 : index
    %677 = vector.load %arg38[%c7_551, %c0_552, %c0_553] : memref<8x8x32xf32, #tpu.memory_space<vmem>>, vector<1x8x32xf32>
    %678 = vector.shape_cast %677 : vector<1x8x32xf32> to vector<8x32xf32>
    %cst_554 = arith.constant dense<0.000000e+00> : vector<1x32xf32>
    %679 = tpu.matmul %598, %678, %cst_554 {dimension_numbers = #tpu.dot_dimension_numbers<[1], [0], [0], [1], [0, 0, 1, 1], [], []>} : vector<1x8xf32>, vector<8x32xf32>, vector<1x32xf32> -> vector<1x32xf32>
    %c7_i32_555 = arith.constant 7 : i32
    %680 = vector.broadcast %c7_i32_555 : i32 to vector<8x32xi32>
    %681 = arith.cmpi eq, %0, %680 : vector<8x32xi32>
    %cst_556 = arith.constant 1.000000e+00 : f32
    %cst_557 = arith.constant 0.000000e+00 : f32
    %682 = vector.broadcast %cst_556 : f32 to vector<8x32xf32>
    %683 = vector.broadcast %cst_557 : f32 to vector<8x32xf32>
    %684 = arith.select %681, %682, %683 : vector<8x32xi1>, vector<8x32xf32>
    %685 = vector.broadcast %679 : vector<1x32xf32> to vector<8x32xf32>
    %686 = arith.mulf %684, %685 : vector<8x32xf32>
    %687 = arith.addf %676, %686 : vector<8x32xf32>
    %c0_558 = arith.constant 0 : index
    %c0_559 = arith.constant 0 : index
    %688 = vector.load %arg19[%c0_558, %c0_559] : memref<16x16xf32, #tpu.memory_space<vmem>>, vector<16x16xf32>
    %c0_560 = arith.constant 0 : index
    %c0_561 = arith.constant 0 : index
    %c0_562 = arith.constant 0 : index
    %689 = vector.load %arg17[%c0_560, %c0_561, %c0_562] : memref<3x32x16xf32, #tpu.memory_space<vmem>>, vector<1x32x16xf32>
    %690 = vector.shape_cast %689 : vector<1x32x16xf32> to vector<32x16xf32>
    %cst_563 = arith.constant dense<0.000000e+00> : vector<8x16xf32>
    %691 = tpu.matmul %687, %690, %cst_563 {dimension_numbers = #tpu.dot_dimension_numbers<[1], [0], [0], [1], [0, 0, 1, 1], [], []>} : vector<8x32xf32>, vector<32x16xf32>, vector<8x16xf32> -> vector<8x16xf32>
    %c0_564 = arith.constant 0 : index
    %c0_565 = arith.constant 0 : index
    %c0_566 = arith.constant 0 : index
    %692 = vector.load %arg18[%c0_564, %c0_565, %c0_566] : memref<3x16x8xf32, #tpu.memory_space<vmem>>, vector<1x16x8xf32>
    %693 = vector.shape_cast %692 : vector<1x16x8xf32> to vector<16x8xf32>
    %cst_567 = arith.constant dense<0.000000e+00> : vector<16x16xf32>
    %694 = tpu.matmul %693, %691, %cst_567 {dimension_numbers = #tpu.dot_dimension_numbers<[1], [0], [0], [1], [0, 0, 1, 1], [], []>} : vector<16x8xf32>, vector<8x16xf32>, vector<16x16xf32> -> vector<16x16xf32>
    %695 = arith.addf %688, %694 : vector<16x16xf32>
    %c1_568 = arith.constant 1 : index
    %c0_569 = arith.constant 0 : index
    %c0_570 = arith.constant 0 : index
    %696 = vector.load %arg17[%c1_568, %c0_569, %c0_570] : memref<3x32x16xf32, #tpu.memory_space<vmem>>, vector<1x32x16xf32>
    %697 = vector.shape_cast %696 : vector<1x32x16xf32> to vector<32x16xf32>
    %cst_571 = arith.constant dense<0.000000e+00> : vector<8x16xf32>
    %698 = tpu.matmul %687, %697, %cst_571 {dimension_numbers = #tpu.dot_dimension_numbers<[1], [0], [0], [1], [0, 0, 1, 1], [], []>} : vector<8x32xf32>, vector<32x16xf32>, vector<8x16xf32> -> vector<8x16xf32>
    %c1_572 = arith.constant 1 : index
    %c0_573 = arith.constant 0 : index
    %c0_574 = arith.constant 0 : index
    %699 = vector.load %arg18[%c1_572, %c0_573, %c0_574] : memref<3x16x8xf32, #tpu.memory_space<vmem>>, vector<1x16x8xf32>
    %700 = vector.shape_cast %699 : vector<1x16x8xf32> to vector<16x8xf32>
    %cst_575 = arith.constant dense<0.000000e+00> : vector<16x16xf32>
    %701 = tpu.matmul %700, %698, %cst_575 {dimension_numbers = #tpu.dot_dimension_numbers<[1], [0], [0], [1], [0, 0, 1, 1], [], []>} : vector<16x8xf32>, vector<8x16xf32>, vector<16x16xf32> -> vector<16x16xf32>
    %702 = arith.addf %695, %701 : vector<16x16xf32>
    %c2_576 = arith.constant 2 : index
    %c0_577 = arith.constant 0 : index
    %c0_578 = arith.constant 0 : index
    %703 = vector.load %arg17[%c2_576, %c0_577, %c0_578] : memref<3x32x16xf32, #tpu.memory_space<vmem>>, vector<1x32x16xf32>
    %704 = vector.shape_cast %703 : vector<1x32x16xf32> to vector<32x16xf32>
    %cst_579 = arith.constant dense<0.000000e+00> : vector<8x16xf32>
    %705 = tpu.matmul %687, %704, %cst_579 {dimension_numbers = #tpu.dot_dimension_numbers<[1], [0], [0], [1], [0, 0, 1, 1], [], []>} : vector<8x32xf32>, vector<32x16xf32>, vector<8x16xf32> -> vector<8x16xf32>
    %c2_580 = arith.constant 2 : index
    %c0_581 = arith.constant 0 : index
    %c0_582 = arith.constant 0 : index
    %706 = vector.load %arg18[%c2_580, %c0_581, %c0_582] : memref<3x16x8xf32, #tpu.memory_space<vmem>>, vector<1x16x8xf32>
    %707 = vector.shape_cast %706 : vector<1x16x8xf32> to vector<16x8xf32>
    %cst_583 = arith.constant dense<0.000000e+00> : vector<16x16xf32>
    %708 = tpu.matmul %707, %705, %cst_583 {dimension_numbers = #tpu.dot_dimension_numbers<[1], [0], [0], [1], [0, 0, 1, 1], [], []>} : vector<16x8xf32>, vector<8x16xf32>, vector<16x16xf32> -> vector<16x16xf32>
    %709 = arith.addf %702, %708 : vector<16x16xf32>
    %cst_584 = arith.constant 0.000000e+00 : f32
    %710 = vector.broadcast %cst_584 : f32 to vector<16x16xf32>
    %711 = arith.cmpf oge, %709, %710 : vector<16x16xf32>
    %cst_585 = arith.constant 0.00999999977 : f32
    %712 = vector.broadcast %cst_585 : f32 to vector<16x16xf32>
    %713 = arith.mulf %712, %709 : vector<16x16xf32>
    %714 = arith.select %711, %709, %713 : vector<16x16xi1>, vector<16x16xf32>
    %c0_586 = arith.constant 0 : index
    %c0_587 = arith.constant 0 : index
    %715 = vector.load %arg20[%c0_586, %c0_587] : memref<1x16xf32, #tpu.memory_space<vmem>>, vector<1x16xf32>
    %716 = vector.broadcast %715 : vector<1x16xf32> to vector<16x16xf32>
    %717 = arith.mulf %714, %716 : vector<16x16xf32>
    %c0_588 = arith.constant 0 : index
    %c0_589 = arith.constant 0 : index
    %718 = vector.load %arg21[%c0_588, %c0_589] : memref<1x16xf32, #tpu.memory_space<vmem>>, vector<1x16xf32>
    %719 = vector.broadcast %718 : vector<1x16xf32> to vector<16x16xf32>
    %720 = arith.addf %717, %719 : vector<16x16xf32>
    %c0_590 = arith.constant 0 : index
    %c0_591 = arith.constant 0 : index
    %721 = vector.load %arg25[%c0_590, %c0_591] : memref<32x8xf32, #tpu.memory_space<vmem>>, vector<32x8xf32>
    %c0_592 = arith.constant 0 : index
    %c0_593 = arith.constant 0 : index
    %c0_594 = arith.constant 0 : index
    %722 = vector.load %arg22[%c0_592, %c0_593, %c0_594] : memref<3x16x8xf32, #tpu.memory_space<vmem>>, vector<1x16x8xf32>
    %723 = vector.shape_cast %722 : vector<1x16x8xf32> to vector<16x8xf32>
    %cst_595 = arith.constant dense<0.000000e+00> : vector<16x8xf32>
    %724 = tpu.matmul %720, %723, %cst_595 {dimension_numbers = #tpu.dot_dimension_numbers<[1], [0], [0], [1], [0, 0, 1, 1], [], []>} : vector<16x16xf32>, vector<16x8xf32>, vector<16x8xf32> -> vector<16x8xf32>
    %c0_596 = arith.constant 0 : index
    %c0_597 = arith.constant 0 : index
    %c0_598 = arith.constant 0 : index
    %725 = vector.load %arg23[%c0_596, %c0_597, %c0_598] : memref<3x16x8xf32, #tpu.memory_space<vmem>>, vector<1x16x8xf32>
    %726 = vector.shape_cast %725 : vector<1x16x8xf32> to vector<16x8xf32>
    %cst_599 = arith.constant dense<0.000000e+00> : vector<16x8xf32>
    %727 = tpu.matmul %469, %726, %cst_599 {dimension_numbers = #tpu.dot_dimension_numbers<[1], [0], [0], [1], [0, 0, 1, 1], [], []>} : vector<16x16xf32>, vector<16x8xf32>, vector<16x8xf32> -> vector<16x8xf32>
    %728 = arith.addf %724, %727 : vector<16x8xf32>
    %c0_600 = arith.constant 0 : index
    %c0_601 = arith.constant 0 : index
    %c0_602 = arith.constant 0 : index
    %729 = vector.load %arg24[%c0_600, %c0_601, %c0_602] : memref<3x32x16xf32, #tpu.memory_space<vmem>>, vector<1x32x16xf32>
    %730 = vector.shape_cast %729 : vector<1x32x16xf32> to vector<32x16xf32>
    %cst_603 = arith.constant dense<0.000000e+00> : vector<32x8xf32>
    %731 = tpu.matmul %730, %728, %cst_603 {dimension_numbers = #tpu.dot_dimension_numbers<[1], [0], [0], [1], [0, 0, 1, 1], [], []>} : vector<32x16xf32>, vector<16x8xf32>, vector<32x8xf32> -> vector<32x8xf32>
    %732 = arith.addf %721, %731 : vector<32x8xf32>
    %c1_604 = arith.constant 1 : index
    %c0_605 = arith.constant 0 : index
    %c0_606 = arith.constant 0 : index
    %733 = vector.load %arg22[%c1_604, %c0_605, %c0_606] : memref<3x16x8xf32, #tpu.memory_space<vmem>>, vector<1x16x8xf32>
    %734 = vector.shape_cast %733 : vector<1x16x8xf32> to vector<16x8xf32>
    %cst_607 = arith.constant dense<0.000000e+00> : vector<16x8xf32>
    %735 = tpu.matmul %720, %734, %cst_607 {dimension_numbers = #tpu.dot_dimension_numbers<[1], [0], [0], [1], [0, 0, 1, 1], [], []>} : vector<16x16xf32>, vector<16x8xf32>, vector<16x8xf32> -> vector<16x8xf32>
    %c1_608 = arith.constant 1 : index
    %c0_609 = arith.constant 0 : index
    %c0_610 = arith.constant 0 : index
    %736 = vector.load %arg23[%c1_608, %c0_609, %c0_610] : memref<3x16x8xf32, #tpu.memory_space<vmem>>, vector<1x16x8xf32>
    %737 = vector.shape_cast %736 : vector<1x16x8xf32> to vector<16x8xf32>
    %cst_611 = arith.constant dense<0.000000e+00> : vector<16x8xf32>
    %738 = tpu.matmul %469, %737, %cst_611 {dimension_numbers = #tpu.dot_dimension_numbers<[1], [0], [0], [1], [0, 0, 1, 1], [], []>} : vector<16x16xf32>, vector<16x8xf32>, vector<16x8xf32> -> vector<16x8xf32>
    %739 = arith.addf %735, %738 : vector<16x8xf32>
    %c1_612 = arith.constant 1 : index
    %c0_613 = arith.constant 0 : index
    %c0_614 = arith.constant 0 : index
    %740 = vector.load %arg24[%c1_612, %c0_613, %c0_614] : memref<3x32x16xf32, #tpu.memory_space<vmem>>, vector<1x32x16xf32>
    %741 = vector.shape_cast %740 : vector<1x32x16xf32> to vector<32x16xf32>
    %cst_615 = arith.constant dense<0.000000e+00> : vector<32x8xf32>
    %742 = tpu.matmul %741, %739, %cst_615 {dimension_numbers = #tpu.dot_dimension_numbers<[1], [0], [0], [1], [0, 0, 1, 1], [], []>} : vector<32x16xf32>, vector<16x8xf32>, vector<32x8xf32> -> vector<32x8xf32>
    %743 = arith.addf %732, %742 : vector<32x8xf32>
    %c2_616 = arith.constant 2 : index
    %c0_617 = arith.constant 0 : index
    %c0_618 = arith.constant 0 : index
    %744 = vector.load %arg22[%c2_616, %c0_617, %c0_618] : memref<3x16x8xf32, #tpu.memory_space<vmem>>, vector<1x16x8xf32>
    %745 = vector.shape_cast %744 : vector<1x16x8xf32> to vector<16x8xf32>
    %cst_619 = arith.constant dense<0.000000e+00> : vector<16x8xf32>
    %746 = tpu.matmul %720, %745, %cst_619 {dimension_numbers = #tpu.dot_dimension_numbers<[1], [0], [0], [1], [0, 0, 1, 1], [], []>} : vector<16x16xf32>, vector<16x8xf32>, vector<16x8xf32> -> vector<16x8xf32>
    %c2_620 = arith.constant 2 : index
    %c0_621 = arith.constant 0 : index
    %c0_622 = arith.constant 0 : index
    %747 = vector.load %arg23[%c2_620, %c0_621, %c0_622] : memref<3x16x8xf32, #tpu.memory_space<vmem>>, vector<1x16x8xf32>
    %748 = vector.shape_cast %747 : vector<1x16x8xf32> to vector<16x8xf32>
    %cst_623 = arith.constant dense<0.000000e+00> : vector<16x8xf32>
    %749 = tpu.matmul %469, %748, %cst_623 {dimension_numbers = #tpu.dot_dimension_numbers<[1], [0], [0], [1], [0, 0, 1, 1], [], []>} : vector<16x16xf32>, vector<16x8xf32>, vector<16x8xf32> -> vector<16x8xf32>
    %750 = arith.addf %746, %749 : vector<16x8xf32>
    %c2_624 = arith.constant 2 : index
    %c0_625 = arith.constant 0 : index
    %c0_626 = arith.constant 0 : index
    %751 = vector.load %arg24[%c2_624, %c0_625, %c0_626] : memref<3x32x16xf32, #tpu.memory_space<vmem>>, vector<1x32x16xf32>
    %752 = vector.shape_cast %751 : vector<1x32x16xf32> to vector<32x16xf32>
    %cst_627 = arith.constant dense<0.000000e+00> : vector<32x8xf32>
    %753 = tpu.matmul %752, %750, %cst_627 {dimension_numbers = #tpu.dot_dimension_numbers<[1], [0], [0], [1], [0, 0, 1, 1], [], []>} : vector<32x16xf32>, vector<16x8xf32>, vector<32x8xf32> -> vector<32x8xf32>
    %754 = arith.addf %743, %753 : vector<32x8xf32>
    %cst_628 = arith.constant 0.000000e+00 : f32
    %755 = vector.broadcast %cst_628 : f32 to vector<32x8xf32>
    %756 = arith.cmpf oge, %754, %755 : vector<32x8xf32>
    %cst_629 = arith.constant 0.00999999977 : f32
    %757 = vector.broadcast %cst_629 : f32 to vector<32x8xf32>
    %758 = arith.mulf %757, %754 : vector<32x8xf32>
    %759 = arith.select %756, %754, %758 : vector<32x8xi1>, vector<32x8xf32>
    %c0_630 = arith.constant 0 : index
    %c0_631 = arith.constant 0 : index
    %760 = vector.load %arg26[%c0_630, %c0_631] : memref<1x8xf32, #tpu.memory_space<vmem>>, vector<1x8xf32>
    %761 = vector.broadcast %760 : vector<1x8xf32> to vector<32x8xf32>
    %762 = arith.mulf %759, %761 : vector<32x8xf32>
    %c0_632 = arith.constant 0 : index
    %c0_633 = arith.constant 0 : index
    %763 = vector.load %arg27[%c0_632, %c0_633] : memref<1x8xf32, #tpu.memory_space<vmem>>, vector<1x8xf32>
    %764 = vector.broadcast %763 : vector<1x8xf32> to vector<32x8xf32>
    %765 = arith.addf %762, %764 : vector<32x8xf32>
    %c0_634 = arith.constant 0 : index
    %c0_635 = arith.constant 0 : index
    %766 = vector.load %arg31[%c0_634, %c0_635] : memref<64x3xf32, #tpu.memory_space<vmem>>, vector<64x3xf32>
    %c0_636 = arith.constant 0 : index
    %c0_637 = arith.constant 0 : index
    %c0_638 = arith.constant 0 : index
    %767 = vector.load %arg28[%c0_636, %c0_637, %c0_638] : memref<3x8x3xf32, #tpu.memory_space<vmem>>, vector<1x8x3xf32>
    %768 = vector.shape_cast %767 : vector<1x8x3xf32> to vector<8x3xf32>
    %cst_639 = arith.constant dense<0.000000e+00> : vector<32x3xf32>
    %769 = tpu.matmul %765, %768, %cst_639 {dimension_numbers = #tpu.dot_dimension_numbers<[1], [0], [0], [1], [0, 0, 1, 1], [], []>} : vector<32x8xf32>, vector<8x3xf32>, vector<32x3xf32> -> vector<32x3xf32>
    %c0_640 = arith.constant 0 : index
    %c0_641 = arith.constant 0 : index
    %c0_642 = arith.constant 0 : index
    %770 = vector.load %arg29[%c0_640, %c0_641, %c0_642] : memref<3x8x3xf32, #tpu.memory_space<vmem>>, vector<1x8x3xf32>
    %771 = vector.shape_cast %770 : vector<1x8x3xf32> to vector<8x3xf32>
    %cst_643 = arith.constant dense<0.000000e+00> : vector<32x3xf32>
    %772 = tpu.matmul %436, %771, %cst_643 {dimension_numbers = #tpu.dot_dimension_numbers<[1], [0], [0], [1], [0, 0, 1, 1], [], []>} : vector<32x8xf32>, vector<8x3xf32>, vector<32x3xf32> -> vector<32x3xf32>
    %773 = arith.addf %769, %772 : vector<32x3xf32>
    %c0_644 = arith.constant 0 : index
    %c0_645 = arith.constant 0 : index
    %c0_646 = arith.constant 0 : index
    %774 = vector.load %arg30[%c0_644, %c0_645, %c0_646] : memref<3x64x32xf32, #tpu.memory_space<vmem>>, vector<1x64x32xf32>
    %775 = vector.shape_cast %774 : vector<1x64x32xf32> to vector<64x32xf32>
    %cst_647 = arith.constant dense<0.000000e+00> : vector<64x3xf32>
    %776 = tpu.matmul %775, %773, %cst_647 {dimension_numbers = #tpu.dot_dimension_numbers<[1], [0], [0], [1], [0, 0, 1, 1], [], []>} : vector<64x32xf32>, vector<32x3xf32>, vector<64x3xf32> -> vector<64x3xf32>
    %777 = arith.addf %766, %776 : vector<64x3xf32>
    %c1_648 = arith.constant 1 : index
    %c0_649 = arith.constant 0 : index
    %c0_650 = arith.constant 0 : index
    %778 = vector.load %arg28[%c1_648, %c0_649, %c0_650] : memref<3x8x3xf32, #tpu.memory_space<vmem>>, vector<1x8x3xf32>
    %779 = vector.shape_cast %778 : vector<1x8x3xf32> to vector<8x3xf32>
    %cst_651 = arith.constant dense<0.000000e+00> : vector<32x3xf32>
    %780 = tpu.matmul %765, %779, %cst_651 {dimension_numbers = #tpu.dot_dimension_numbers<[1], [0], [0], [1], [0, 0, 1, 1], [], []>} : vector<32x8xf32>, vector<8x3xf32>, vector<32x3xf32> -> vector<32x3xf32>
    %c1_652 = arith.constant 1 : index
    %c0_653 = arith.constant 0 : index
    %c0_654 = arith.constant 0 : index
    %781 = vector.load %arg29[%c1_652, %c0_653, %c0_654] : memref<3x8x3xf32, #tpu.memory_space<vmem>>, vector<1x8x3xf32>
    %782 = vector.shape_cast %781 : vector<1x8x3xf32> to vector<8x3xf32>
    %cst_655 = arith.constant dense<0.000000e+00> : vector<32x3xf32>
    %783 = tpu.matmul %436, %782, %cst_655 {dimension_numbers = #tpu.dot_dimension_numbers<[1], [0], [0], [1], [0, 0, 1, 1], [], []>} : vector<32x8xf32>, vector<8x3xf32>, vector<32x3xf32> -> vector<32x3xf32>
    %784 = arith.addf %780, %783 : vector<32x3xf32>
    %c1_656 = arith.constant 1 : index
    %c0_657 = arith.constant 0 : index
    %c0_658 = arith.constant 0 : index
    %785 = vector.load %arg30[%c1_656, %c0_657, %c0_658] : memref<3x64x32xf32, #tpu.memory_space<vmem>>, vector<1x64x32xf32>
    %786 = vector.shape_cast %785 : vector<1x64x32xf32> to vector<64x32xf32>
    %cst_659 = arith.constant dense<0.000000e+00> : vector<64x3xf32>
    %787 = tpu.matmul %786, %784, %cst_659 {dimension_numbers = #tpu.dot_dimension_numbers<[1], [0], [0], [1], [0, 0, 1, 1], [], []>} : vector<64x32xf32>, vector<32x3xf32>, vector<64x3xf32> -> vector<64x3xf32>
    %788 = arith.addf %777, %787 : vector<64x3xf32>
    %c2_660 = arith.constant 2 : index
    %c0_661 = arith.constant 0 : index
    %c0_662 = arith.constant 0 : index
    %789 = vector.load %arg28[%c2_660, %c0_661, %c0_662] : memref<3x8x3xf32, #tpu.memory_space<vmem>>, vector<1x8x3xf32>
    %790 = vector.shape_cast %789 : vector<1x8x3xf32> to vector<8x3xf32>
    %cst_663 = arith.constant dense<0.000000e+00> : vector<32x3xf32>
    %791 = tpu.matmul %765, %790, %cst_663 {dimension_numbers = #tpu.dot_dimension_numbers<[1], [0], [0], [1], [0, 0, 1, 1], [], []>} : vector<32x8xf32>, vector<8x3xf32>, vector<32x3xf32> -> vector<32x3xf32>
    %c2_664 = arith.constant 2 : index
    %c0_665 = arith.constant 0 : index
    %c0_666 = arith.constant 0 : index
    %792 = vector.load %arg29[%c2_664, %c0_665, %c0_666] : memref<3x8x3xf32, #tpu.memory_space<vmem>>, vector<1x8x3xf32>
    %793 = vector.shape_cast %792 : vector<1x8x3xf32> to vector<8x3xf32>
    %cst_667 = arith.constant dense<0.000000e+00> : vector<32x3xf32>
    %794 = tpu.matmul %436, %793, %cst_667 {dimension_numbers = #tpu.dot_dimension_numbers<[1], [0], [0], [1], [0, 0, 1, 1], [], []>} : vector<32x8xf32>, vector<8x3xf32>, vector<32x3xf32> -> vector<32x3xf32>
    %795 = arith.addf %791, %794 : vector<32x3xf32>
    %c2_668 = arith.constant 2 : index
    %c0_669 = arith.constant 0 : index
    %c0_670 = arith.constant 0 : index
    %796 = vector.load %arg30[%c2_668, %c0_669, %c0_670] : memref<3x64x32xf32, #tpu.memory_space<vmem>>, vector<1x64x32xf32>
    %797 = vector.shape_cast %796 : vector<1x64x32xf32> to vector<64x32xf32>
    %cst_671 = arith.constant dense<0.000000e+00> : vector<64x3xf32>
    %798 = tpu.matmul %797, %795, %cst_671 {dimension_numbers = #tpu.dot_dimension_numbers<[1], [0], [0], [1], [0, 0, 1, 1], [], []>} : vector<64x32xf32>, vector<32x3xf32>, vector<64x3xf32> -> vector<64x3xf32>
    %799 = arith.addf %788, %798 : vector<64x3xf32>
    %c1_672 = arith.constant 1 : index
    %c0_673 = arith.constant 0 : index
    %c0_674 = arith.constant 0 : index
    %800 = vector.load %arg40[%c1_672, %c0_673, %c0_674] : memref<2x64x3xf32, #tpu.memory_space<vmem>>, vector<1x64x3xf32>
    %801 = vector.shape_cast %800 : vector<1x64x3xf32> to vector<64x3xf32>
    %802 = vector.shape_cast %799 : vector<64x3xf32> to vector<1x64x3xf32>
    tpu.vector_store %arg40[%c1_672, %c0_673, %c0_674], %802 {strides = array<i32>} : memref<2x64x3xf32, #tpu.memory_space<vmem>>, vector<1x64x3xf32>,
    return
  }
}

</mosaic_0001>

<bundles_post_ra>
// kernel: tpu_custom_call.1
= control target key start
LH: loop header
LB: loop body
LE: loop exit
PB: predicated region body
PF: predicated region fallthrough
CT: control target
= control target key end

     0   :  { %s14327_s3 = smov 2   ;;  %vm206_vm0 = vcmask 1042432   ;;  %vm181_vm1 = vcmask 23552   ;;  %s14328_s10 = smov 3   ;;  %vm319_vm2 = vcmask 523264   ;;  %vm890_vm7 = vcmask 64512   ;;  %s15801_s0 = inlined_call_operand.smem [shape: u32[41], index: -1, kind: input, shape index: {}] }
   0x1   :  { %s14378_s6 = sld [smem:[%s15801_s0 + %s14327_s3]]   ;;  %s14329_s14 = smov 7   ;;  %vm990_vm8 = vcmask 261120   ;;  %vm1447_vm11 = vcmask 130048   ;;  %vm14339_vm12 = vmmov 0  }
   0x2   :  { %s14383_s9 = sld [smem:[%s15801_s0]]   ;;  %s14330_s18 = smov 4  }
   0x3   :  { %s14429_s13 = sld [smem:[%s15801_s0 + %s14328_s10]]   ;;  %s14331_s22 = smov 5  }
   0x4   :  { %s14458_s17 = sld [smem:[%s15801_s0 + %s14329_s14]]   ;;  %s14332_s26 = smov 6  }
   0x5   :  { %s14465_s21 = sld [smem:[%s15801_s0 + %s14330_s18]]   ;;  %s14333_s30 = smov 8  }
   0x6   :  { %s14470_s25 = sld [smem:[%s15801_s0 + %s14331_s22]]   ;;  %s14334_s4 = smov 12  }
   0x7   :  { %v180_v0 = vld [vmem:[%s14378_s6] sm:$0x7]  ;;  %v11318_v4 = vld [vmem:[%s14378_s6 + $0x4] sm:$0x7]  ;;  %v11336_v5 = vld [vmem:[%s14378_s6 + $0x8] sm:$0x7]  ;;  %s14475_s29 = sld [smem:[%s15801_s0 + %s14332_s26]]  }
   0x8   :  { %v168_v1 = vld [vmem:[%s14383_s9] sm:$0xff]  ;;  %v169_v2 = vld [vmem:[%s14383_s9 + $0x8] sm:$0xff]  ;;  %12500 = vmatprep.subr.msk.mxu0 %vm206_vm0, %v180_v0  ;;  %v170_v3 = vld [vmem:[%s14383_s9 + $0x10] sm:$0xff]  ;;  %s14519_s3 = sld [smem:[%s15801_s0 + %s14333_s30]]   ;;  %s14335_s10 = smov 9  }
   0x9   :  { %12502 = vmatprep.mubr.msk.f32.mxu0 %vm181_vm1, %v168_v1  ;;  %12501 = vmatpush3.msk.msra.mxu0 %vm206_vm0, %v180_v0  ;;  %v171_v6 = vld [vmem:[%s14383_s9 + $0x18] sm:$0xff]  ;;  %v172_v7 = vld [vmem:[%s14383_s9 + $0x20] sm:$0xff]  ;;  %v173_v8 = vld [vmem:[%s14383_s9 + $0x28] sm:$0xff]  ;;  %s14536_s8 = sld [smem:[%s15801_s0 + %s14334_s4]]   ;;  %s14336_s15 = smov 10  }
   0xa   :  { %12503 = vmatmul.mubr.msk.f32.vlgmr.msra.gmra.mrb[0].mxu0 %vm181_vm1, %v169_v2  ;;  %12536 = vmatprep.subr.msk.mxu0 %vm206_vm0, %v11318_v4  ;;  %v174_v9 = vld [vmem:[%s14383_s9 + $0x30] sm:$0xff]  ;;  %v175_v10 = vld [vmem:[%s14383_s9 + $0x38] sm:$0xff]  ;;  %v315_v11 = vld [vmem:[%s14429_s13] sm:$0xff]  ;;  %s14545_s14 = sld [smem:[%s15801_s0 + %s14335_s10]]   ;;  %s14337_s20 = smov 11  }
   0xb   :  { %12505 = vmatprep.mubr.msk.f32.mxu0 %vm181_vm1, %v170_v3  ;;  %12537 = vmatpush3.msk.msra.mxu0 %vm206_vm0, %v11318_v4  ;;  %v316_v26 = vld [vmem:[%s14429_s13 + $0x8] sm:$0xff]  ;;  %v317_v28 = vld [vmem:[%s14429_s13 + $0x10] sm:$0xff]  ;;  %v318_v31 = vld [vmem:[%s14429_s13 + $0x18] sm:$0xff]  ;;  %s14550_s19 = sld [smem:[%s15801_s0 + %s14336_s15]]   ;;  %s14341_s26 = smov 13  }
   0xc   :  { %12572 = vmatprep.subr.msk.mxu0 %vm206_vm0, %v11336_v5  ;;  %12530 = vmatprep.mubr.msk.f32.mxu1 %vm319_vm2, %v315_v11  ;;  %v11328_v33 = vld [vmem:[%s14429_s13 + $0x20] sm:$0xff]  ;;  %v11329_v42 = vld [vmem:[%s14429_s13 + $0x28] sm:$0xff]  ;;  %v11330_v44 = vld [vmem:[%s14429_s13 + $0x30] sm:$0xff]  ;;  %s14555_s24 = sld [smem:[%s15801_s0 + %s14337_s20]]   ;;  %s14342_s1 = smov 32  }
   0xd   :  { %v11331_v47 = vld [vmem:[%s14429_s13 + $0x38] sm:$0xff]  ;;  %v11346_v49 = vld [vmem:[%s14429_s13 + $0x40] sm:$0xff]  ;;  %v11347_v56 = vld [vmem:[%s14429_s13 + $0x48] sm:$0xff]  ;;  %s14588_s30 = sld [smem:[%s15801_s0 + %s14341_s26]]   ;;  %s14343_s7 = smov 14  }
   0xe   :  { %12506 = vmatmul.mubr.msk.f32.gmra.mrb[2].mxu0 %vm181_vm1, %v171_v6  ;;  %v11348_v57 = vld [vmem:[%s14429_s13 + $0x50] sm:$0xff]  ;;  %v11349_v58 = vld [vmem:[%s14429_s13 + $0x58] sm:$0xff]  ;;  %v889_v59 = vld [vmem:[%s14458_s17] sm:$0xff]  ;;  %s14608_s5 = sld [smem:[%s15801_s0 + %s14342_s1]]   ;;  %s14344_s15 = smov 15  }
   0xf   :  { %12508 = vmatprep.mubr.msk.f32.mxu0 %vm181_vm1, %v172_v7  ;;  %v11362_v60 = vld [vmem:[%s14458_s17 + $0x8] sm:$0xff]  ;;  %v176_v62 = vld [vmem:[%s14465_s21] sm:$0xff]  ;;  %s14619_s12 = sld [smem:[%s15801_s0 + %s14343_s7]]   ;;  %s14345_s22 = smov 16  }
  0x10   :  { %v177_v61 = vld [vmem:[%s14465_s21 + $0x8] sm:$0xff]  ;;  %s14624_s20 = sld [smem:[%s15801_s0 + %s14344_s15]]   ;;  %s14346_s28 = smov 34  }
  0x11   :  { %s14629_s27 = sld [smem:[%s15801_s0 + %s14345_s22]]   ;;  %s14347_s7 = smov 33  }
  0x12   :  { %12509 = vmatmul.mubr.msk.f32.gmra.mrb[4].mxu0 %vm181_vm1, %v173_v8  ;;  %s14747_s4 = sld [smem:[%s15801_s0 + %s14346_s28]]   ;;  %s14348_s16 = smov 36  }
  0x13   :  { %12511 = vmatprep.mubr.msk.f32.mxu0 %vm181_vm1, %v174_v9  ;;  %s14754_s15 = sld [smem:[%s15801_s0 + %s14347_s7]]   ;;  %s14349_s26 = smov 38  }
  0x14   :  { %s14759_s23 = sld [smem:[%s15801_s0 + %s14348_s16]]   ;;  %s14350_s7 = smov 37  }
  0x15   :  { %s14773_s2 = sld [smem:[%s15801_s0 + %s14349_s26]]   ;;  %s14351_s18 = smov 35  }
  0x16   :  { %12512 = vmatmul.mubr.msk.f32.gmra.mrb[6].mxu0 %vm181_vm1, %v175_v10  ;;  %s14780_s16 = sld [smem:[%s15801_s0 + %s14350_s7]]   ;;  %s14352_s1 = smov 1  }
  0x17   :  { %12538 = vmatprep.mubr.msk.f32.mxu0 %vm181_vm1, %v168_v1  ;;  %15829 = sst [smem:[#allocation2_spill]] %s14629_s27  ;;  %s14354_s7 = smov 39  }
  0x18   :  { %15830 = sst [smem:[#allocation3_spill]] %s14747_s4  ;;  %s14355_s26 = smov 18  }
  0x19   :  { %15831 = sst [smem:[#allocation4_spill]] %s14754_s15  ;;  %s14363_s10 = smov 28  }
  0x1a   :  { %12539 = vmatmul.mubr.msk.f32.vlgmr.msra.gmra.mrb[8].mxu0 %vm181_vm1, %v169_v2  ;;  %15832 = sst [smem:[#allocation5_spill]] %s14759_s23 }
  0x1b   :  { %12541 = vmatprep.mubr.msk.f32.mxu0 %vm181_vm1, %v170_v3  ;;  %12573 = vmatpush3.msk.msra.mxu0 %vm206_vm0, %v11336_v5  ;;  %v11354_v5 = vld [vmem:[%s14470_s25] ss:$0 sm:$0xff]  ;;  %15833 = sst [smem:[#allocation6_spill]] %s14773_s2 }
  0x1c   :  { %12608 = vmatprep.subr.mxu0 %v889_v59  ;;  %15834 = sst [smem:[#allocation7_spill]] %s14780_s16 }
  0x1d   :  { %s14786_s28 = sld [smem:[%s15801_s0 + %s14351_s18]]   ;;  %s14353_s18 = smov 17  }
  0x1e   :  { %12542 = vmatmul.mubr.msk.f32.gmra.mrb[10].mxu0 %vm181_vm1, %v171_v6  ;;  %s14791_s11 = sld [smem:[%s15801_s0 + %s14352_s1]]  }
  0x1f   :  { %12544 = vmatprep.mubr.msk.f32.mxu0 %vm181_vm1, %v172_v7  ;;  %s14836_s1 = sld [smem:[%s15801_s0 + %s14353_s18]]  }
  0x20   :  { %s14851_s22 = sld [smem:[%s15801_s0 + %s14354_s7]]  }
  0x21   :  { %s14918_s18 = sld [smem:[%s15801_s0 + %s14355_s26]]   ;;  %s14356_s26 = smov 23  }
  0x22   :  { %12545 = vmatmul.mubr.msk.f32.gmra.mrb[12].mxu0 %vm181_vm1, %v173_v8 }
  0x23   :  { %12547 = vmatprep.mubr.msk.f32.mxu0 %vm181_vm1, %v174_v9  ;;  %15835 = sst [smem:[#allocation8_spill]] %s14786_s28 }
  0x24   :  { %15836 = sst [smem:[#allocation9_spill]] %s14791_s11 }
  0x25   :  { %15837 = sst [smem:[#allocation10_spill]] %s14836_s1 }
  0x26   :  { %12548 = vmatmul.mubr.msk.f32.gmra.mrb[14].mxu0 %vm181_vm1, %v175_v10  ;;  %15838 = sst [smem:[#allocation11_spill]] %s14851_s22 }
  0x27   :  { %12574 = vmatprep.mubr.msk.f32.mxu0 %vm181_vm1, %v168_v1  ;;  %15839 = sst [smem:[#allocation12_spill]] %s14918_s18 }
  0x2a   :  { %12575 = vmatmul.mubr.msk.f32.vlgmr.msra.gmra.mrb[16].mxu0 %vm181_vm1, %v169_v2 }
  0x2b   :  { %12577 = vmatprep.mubr.msk.f32.mxu0 %vm181_vm1, %v170_v3  ;;  %12609 = vmatpush3.msra.mxu0 %v889_v59  ;;  %v179_v3 = vld [vmem:[%s14465_s21 + $0x18] sm:$0xff]  ;;  %v887_v59 = vld [vmem:[%s14545_s14] sm:$0xff] }
  0x2c   :  { %12627 = vmatprep.subr.mxu0 %v11362_v60 }
  0x2e   :  { %12578 = vmatmul.mubr.msk.f32.gmra.mrb[18].mxu0 %vm181_vm1, %v171_v6  ;;  %v178_v6 = vld [vmem:[%s14465_s21 + $0x10] sm:$0xff] }
  0x2f   :  { %12580 = vmatprep.mubr.msk.f32.mxu0 %vm181_vm1, %v172_v7 }
  0x32   :  { %12581 = vmatmul.mubr.msk.f32.gmra.mrb[20].mxu0 %vm181_vm1, %v173_v8 }
  0x33   :  { %12583 = vmatprep.mubr.msk.f32.mxu0 %vm181_vm1, %v174_v9 }
  0x36   :  { %12584 = vmatmul.mubr.msk.f32.gmra.mrb[22].mxu0 %vm181_vm1, %v175_v10 }
  0xdd   :  { %v12504_v12 = vpop.f32.mrb[0].mxu0 }
  0xde   :  { %v276_v13 = vpop.f32.mrb[1].mxu0 }
  0xdf   :  { %v13646_v14 = vpack.c.bf16 %v12504_v12, %v276_v13  ;;  %v11355_v13 = vld [vmem:[%s14475_s29] ss:$0 sm:$0xff] }
  0xe1   :  { %v12507_v15 = vpop.f32.mrb[2].mxu0  ;;  %13647 = vmatprep.subr.bf16.mxu1 %v13646_v14 }
  0xe2   :  { %v286_v16 = vpop.f32.mrb[3].mxu0  ;;  %13649 = vmatpush3.bf16.msra.mxu1 %v13646_v14 }
  0xe3   :  { %v13650_v17 = vpack.c.bf16 %v12507_v15, %v286_v16 }
  0xe5   :  { %v12510_v18 = vpop.f32.mrb[4].mxu0  ;;  %13651 = vmatprep.subr.bf16.mxu1 %v13650_v17 }
  0xe6   :  { %v296_v19 = vpop.f32.mrb[5].mxu0  ;;  %13653 = vmatpush3.bf16.msra.mxu1 %v13650_v17 }
  0xe7   :  { %v13654_v20 = vpack.c.bf16 %v12510_v18, %v296_v19 }
  0xe9   :  { %v12513_v21 = vpop.f32.mrb[6].mxu0  ;;  %13655 = vmatprep.subr.bf16.mxu1 %v13654_v20 }
  0xea   :  { %v306_v22 = vpop.f32.mrb[7].mxu0  ;;  %13657 = vmatpush3.bf16.msra.mxu1 %v13654_v20 }
  0xeb   :  { %v13658_v23 = vpack.c.bf16 %v12513_v21, %v306_v22 }
  0xed   :  { %13659 = vmatprep.subr.bf16.mxu1 %v13658_v23  ;;  %v12540_v24 = vpop.f32.mrb[8].mxu0 }
  0xee   :  { %13661 = vmatpush3.bf16.msra.mxu1 %v13658_v23  ;;  %v492_v25 = vpop.f32.mrb[9].mxu0 }
  0xef   :  { %v13662_v27 = vpack.c.bf16 %v12540_v24, %v492_v25  ;;  %v11371_v25 = vld [vmem:[%s14458_s17 + $0x10] sm:$0xff] }
  0xf1   :  { %v12543_v29 = vpop.f32.mrb[10].mxu0  ;;  %13663 = vmatprep.subr.bf16.mxu1 %v13662_v27  ;;  %12531 = vmatmul.mubr.msk.f32.vlgmr.msra.gmra.mrb[0].mxu1 %vm319_vm2, %v316_v26 }
  0xf2   :  { %v502_v30 = vpop.f32.mrb[11].mxu0  ;;  %13665 = vmatpush3.bf16.msra.mxu1 %v13662_v27  ;;  %12533 = vmatprep.mubr.msk.f32.mxu1 %vm319_vm2, %v317_v28  ;;  %v988_v28 = vld [vmem:[%s14519_s3] sm:$0xff] }
  0xf3   :  { %v13666_v32 = vpack.c.bf16 %v12543_v29, %v502_v30 }
  0xf5   :  { %v12546_v34 = vpop.f32.mrb[12].mxu0  ;;  %13667 = vmatprep.subr.bf16.mxu1 %v13666_v32  ;;  %12534 = vmatmul.mubr.msk.f32.gmra.mrb[2].mxu1 %vm319_vm2, %v318_v31 }
  0xf6   :  { %v512_v35 = vpop.f32.mrb[13].mxu0  ;;  %13669 = vmatpush3.bf16.msra.mxu1 %v13666_v32  ;;  %12566 = vmatprep.mubr.msk.f32.mxu1 %vm319_vm2, %v11328_v33 }
  0xf7   :  { %v13670_v36 = vpack.c.bf16 %v12546_v34, %v512_v35 }
  0xf9   :  { %v12549_v37 = vpop.f32.mrb[14].mxu0  ;;  %13671 = vmatprep.subr.bf16.mxu1 %v13670_v36 }
  0xfa   :  { %v522_v38 = vpop.f32.mrb[15].mxu0  ;;  %13673 = vmatpush3.bf16.msra.mxu1 %v13670_v36 }
  0xfb   :  { %v13674_v39 = vpack.c.bf16 %v12549_v37, %v522_v38  ;;  %v989_v37 = vld [vmem:[%s14519_s3 + $0x8] sm:$0xff] }
  0xfd   :  { %13675 = vmatprep.subr.bf16.mxu1 %v13674_v39  ;;  %v12576_v40 = vpop.f32.mrb[16].mxu0 }
  0xfe   :  { %13677 = vmatpush3.bf16.msra.mxu1 %v13674_v39  ;;  %v708_v41 = vpop.f32.mrb[17].mxu0  ;;  %v11367_v39 = vld [vmem:[%s14519_s3 + $0x10] sm:$0xff] }
  0xff   :  { %v13678_v43 = vpack.c.bf16 %v12576_v40, %v708_v41 }
 0x101   :  { %v12579_v45 = vpop.f32.mrb[18].mxu0  ;;  %13679 = vmatprep.subr.bf16.mxu1 %v13678_v43  ;;  %12567 = vmatmul.mubr.msk.f32.vlgmr.msra.gmra.mrb[0].mxu1 %vm319_vm2, %v11329_v42 }
 0x102   :  { %v718_v46 = vpop.f32.mrb[19].mxu0  ;;  %13681 = vmatpush3.bf16.msra.mxu1 %v13678_v43  ;;  %12569 = vmatprep.mubr.msk.f32.mxu1 %vm319_vm2, %v11330_v44 }
 0x103   :  { %v13682_v48 = vpack.c.bf16 %v12579_v45, %v718_v46  ;;  %v11368_v45 = vld [vmem:[%s14519_s3 + $0x18] sm:$0xff] }
 0x105   :  { %v12582_v50 = vpop.f32.mrb[20].mxu0  ;;  %13683 = vmatprep.subr.bf16.mxu1 %v13682_v48  ;;  %12570 = vmatmul.mubr.msk.f32.gmra.mrb[2].mxu1 %vm319_vm2, %v11331_v47  ;;  %v11376_v47 = vld [vmem:[%s14519_s3 + $0x20] sm:$0xff] }
 0x106   :  { %v728_v51 = vpop.f32.mrb[21].mxu0  ;;  %13685 = vmatpush3.bf16.msra.mxu1 %v13682_v48  ;;  %12602 = vmatprep.mubr.msk.f32.mxu1 %vm319_vm2, %v11346_v49 }
 0x107   :  { %v13686_v52 = vpack.c.bf16 %v12582_v50, %v728_v51  ;;  %v11377_v51 = vld [vmem:[%s14519_s3 + $0x28] sm:$0xff] }
 0x109   :  { %v12585_v53 = vpop.f32.mrb[22].mxu0  ;;  %13687 = vmatprep.subr.bf16.mxu1 %v13686_v52 }
 0x10a   :  { %v738_v54 = vpop.f32.mrb[23].mxu0  ;;  %13689 = vmatpush3.bf16.msra.mxu1 %v13686_v52  ;;  %v1445_v52 = vld [vmem:[%s14536_s8] sm:$0xff] }
 0x10b   :  { %v13690_v55 = vpack.c.bf16 %v12585_v53, %v738_v54  ;;  %v1446_v53 = vld [vmem:[%s14536_s8 + $0x8] sm:$0xff] }
 0x10c   :  { %v13718_v54 = vpack.c.bf16 %v1446_v53, %v1445_v52 }
 0x10d   :  { %13691 = vmatprep.subr.bf16.mxu1 %v13690_v55 }
 0x10e   :  { %13693 = vmatpush3.bf16.msra.mxu1 %v13690_v55  ;;  %v11385_v55 = vld [vmem:[%s14536_s8 + $0x10] sm:$0xff] }
 0x111   :  { %12603 = vmatmul.mubr.msk.f32.vlgmr.msra.gmra.mrb[0].mxu1 %vm319_vm2, %v11347_v56  ;;  %v11386_v56 = vld [vmem:[%s14536_s8 + $0x18] sm:$0xff] }
 0x112   :  { %12605 = vmatprep.mubr.msk.f32.mxu1 %vm319_vm2, %v11348_v57  ;;  %v13725_v57 = vpack.c.bf16 %v11386_v56, %v11385_v55 }
 0x115   :  { %12606 = vmatmul.mubr.msk.f32.gmra.mrb[2].mxu1 %vm319_vm2, %v11349_v58  ;;  %v888_v58 = vld [vmem:[%s14545_s14 + $0x8] sm:$0xff] }
 0x116   :  { %12624 = vmatprep.mubr.msk.f32.mxu1 %vm990_vm8, %v988_v28 }
 0x1e4   :  { %v12604_v63 = vpop.f32.mrb[0].mxu1 }
 0x1e5   :  { %v14084_v0 = vadd.f32 %v12604_v63, %v177_v61  ;;  %v830_v1 = vpop.f32.mrb[1].mxu1 }
 0x1e6   :  { %v14085_v2 = vadd.f32 %v830_v1, %v176_v62  ;;  %v11380_v1 = vld [vmem:[%s14550_s19] ss:$0 sm:$0xff] }
 0x1e7   :  { %vm854_vm3 = vcmp.ge.f32.partialorder %v14084_v0, 0.0  ;;  %v858_v4 = vmul.f32 0.01, %v14084_v0 }
 0x1e8   :  { %vm853_vm4 = vcmp.ge.f32.partialorder %v14085_v2, 0.0  ;;  %v857_v7 = vmul.f32 0.01, %v14085_v2  ;;  %v12607_v8 = vpop.f32.mrb[2].mxu1 }
 0x1e9   :  { %v862_v9 = vsel %vm854_vm3, %v14084_v0, %v858_v4  ;;  %v14086_v10 = vadd.f32 %v12607_v8, %v179_v3  ;;  %v840_v11 = vpop.f32.mrb[3].mxu1  ;;  %v11391_v8 = vld [vmem:[%s14536_s8 + $0x20] sm:$0xff] }
 0x1ea   :  { %v873_v12 = vmul.f32 %v11354_v5, %v862_v9  ;;  %v861_v14 = vsel %vm853_vm4, %v14085_v2, %v857_v7  ;;  %v14087_v15 = vadd.f32 %v840_v11, %v178_v6  ;;  %v11392_v9 = vld [vmem:[%s14536_s8 + $0x28] sm:$0xff] }
 0x1eb   :  { %v872_v16 = vmul.f32 %v11354_v5, %v861_v14  ;;  %vm856_vm5 = vcmp.ge.f32.partialorder %v14086_v10, 0.0  ;;  %v860_v17 = vmul.f32 0.01, %v14086_v10  ;;  %v14340_v14 = vmov 0.0  }
 0x1ec   :  { %vm855_vm6 = vcmp.ge.f32.partialorder %v14087_v15, 0.0  ;;  %v859_v18 = vmul.f32 0.01, %v14087_v15  ;;  %v14485_v21 = vadd.f32 %v11355_v13, %v873_v12  ;;  %v13732_v12 = vpack.c.bf16 %v11392_v9, %v11391_v8 }
 0x1ed   :  { %v14483_v19 = vadd.f32 %v11355_v13, %v872_v16  ;;  %v864_v20 = vsel %vm856_vm5, %v14086_v10, %v860_v17 }
 0x1ee   :  { %v875_v22 = vmul.f32 %v11354_v5, %v864_v20  ;;  %v863_v23 = vsel %vm855_vm6, %v14087_v15, %v859_v18  ;;  %v1529_v20 = vld [vmem:[%s14588_s30] sm:$0xff] }
 0x1ef   :  { %v874_v24 = vmul.f32 %v11354_v5, %v863_v23  ;;  %12610 = vmatprep.mubr.msk.f32.mxu0 %vm890_vm7, %v14483_v19  ;;  %v11381_v5 = vld [vmem:[%s14555_s24] ss:$0 sm:$0xff] }
 0x1f0   :  { %12611 = vmatmul.mubr.msk.f32.vlgmr.msra.gmra.mrb[24].mxu0 %vm890_vm7, %v14485_v21  ;;  %v14494_v27 = vadd.f32 %v11355_v13, %v875_v22 }
 0x1f1   :  { %v14492_v26 = vadd.f32 %v11355_v13, %v874_v24  ;;  %12628 = vmatpush3.msra.mxu0 %v11362_v60  ;;  %v14338_v13 = vmov 0.0|0.0  }
 0x1f2   :  { %12646 = vmatprep.subr.mxu0 %v11371_v25 }
 0x1f3   :  { %12613 = vmatprep.mubr.msk.f32.mxu0 %vm890_vm7, %v14492_v26 }
 0x1f4   :  { %12614 = vmatmul.mubr.msk.f32.gmra.mrb[26].mxu0 %vm890_vm7, %v14494_v27 }
 0x1f5   :  { %12629 = vmatprep.mubr.msk.f32.mxu0 %vm890_vm7, %v14483_v19 }
 0x1f8   :  { %12630 = vmatmul.mubr.msk.f32.vlgmr.msra.gmra.mrb[28].mxu0 %vm890_vm7, %v14485_v21 }
 0x1f9   :  { %12632 = vmatprep.mubr.msk.f32.mxu0 %vm890_vm7, %v14492_v26  ;;  %12647 = vmatpush3.msra.mxu0 %v11371_v25 }
 0x1fa   :  { %13719 = vmatprep.subr.bf16.mxu0 %v13718_v54 }
 0x1fc   :  { %12633 = vmatmul.mubr.msk.f32.gmra.mrb[30].mxu0 %vm890_vm7, %v14494_v27 }
 0x1fd   :  { %12648 = vmatprep.mubr.msk.f32.mxu0 %vm890_vm7, %v14483_v19 }
 0x200   :  { %12649 = vmatmul.mubr.msk.f32.vlgmr.msra.gmra.mrb[32].mxu0 %vm890_vm7, %v14485_v21 }
 0x201   :  { %12651 = vmatprep.mubr.msk.f32.mxu0 %vm890_vm7, %v14492_v26  ;;  %13721 = vmatpush3.bf16.msra.mxu0 %v13718_v54 }
 0x202   :  { %13726 = vmatprep.subr.bf16.mxu0 %v13725_v57 }
 0x204   :  { %12652 = vmatmul.mubr.msk.f32.gmra.mrb[34].mxu0 %vm890_vm7, %v14494_v27 }
 0x2c3   :  { %v12612_v29 = vpop.f32.mrb[24].mxu0 }
 0x2c4   :  { %v969_v30 = vpop.f32.mrb[25].mxu0 }
 0x2c5   :  { %v13694_v31 = vpack.c.bf16 %v12612_v29, %v969_v30  ;;  %v11389_v29 = vld [vmem:[%s14588_s30 + $0x8] sm:$0xff]  ;;  %v11395_v30 = vld [vmem:[%s14588_s30 + $0x10] sm:$0xff] }
 0x2c7   :  { %v12615_v32 = vpop.f32.mrb[26].mxu0  ;;  %13695 = vmatprep.subr.bf16.mxu1 %v13694_v31 }
 0x2c8   :  { %v979_v33 = vpop.f32.mrb[27].mxu0  ;;  %13697 = vmatpush3.bf16.msra.mxu1 %v13694_v31  ;;  %v1941_v31 = vld [vmem:[%s14608_s5] sm:$0xff] }
 0x2c9   :  { %v13698_v34 = vpack.c.bf16 %v12615_v32, %v979_v33  ;;  %v1942_v32 = vld [vmem:[%s14608_s5 + $0x8] sm:$0xff]  ;;  %v1943_v33 = vld [vmem:[%s14608_s5 + $0x10] sm:$0xff] }
 0x2cb   :  { %13699 = vmatprep.subr.bf16.mxu1 %v13698_v34  ;;  %v12631_v35 = vpop.f32.mrb[28].mxu0 }
 0x2cc   :  { %13701 = vmatpush3.bf16.msra.mxu1 %v13698_v34  ;;  %v1142_v36 = vpop.f32.mrb[29].mxu0  ;;  %v13740_v34 = vpack.c.bf16 %v1942_v32, %v1941_v31 }
 0x2cd   :  { %v13702_v38 = vpack.c.bf16 %v12631_v35, %v1142_v36  ;;  %v1944_v35 = vld [vmem:[%s14608_s5 + $0x18] sm:$0xff] }
 0x2ce   :  { %v13743_v36 = vpack.c.bf16 %v1944_v35, %v1943_v33  ;;  %v11411_v35 = vld [vmem:[%s14608_s5 + $0x68] sm:$0xff] }
 0x2cf   :  { %12625 = vmatmul.mubr.msk.f32.vlgmr.msra.gmra.mrb[4].mxu1 %vm990_vm8, %v989_v37  ;;  %v12634_v40 = vpop.f32.mrb[30].mxu0  ;;  %13703 = vmatprep.subr.bf16.mxu1 %v13702_v38  ;;  %v1444_v37 = vld [vmem:[%s14619_s12] sm:$0xff] }
 0x2d0   :  { %v1152_v41 = vpop.f32.mrb[31].mxu0  ;;  %13705 = vmatpush3.bf16.msra.mxu1 %v13702_v38  ;;  %12643 = vmatprep.mubr.msk.f32.mxu1 %vm990_vm8, %v11367_v39  ;;  %v166_v38 = vlaneseq }
 0x2d1   :  { %v13706_v42 = vpack.c.bf16 %v12634_v40, %v1152_v41 }
 0x2d3   :  { %13707 = vmatprep.subr.bf16.mxu1 %v13706_v42  ;;  %v12650_v43 = vpop.f32.mrb[32].mxu0 }
 0x2d4   :  { %13709 = vmatpush3.bf16.msra.mxu1 %v13706_v42  ;;  %v1315_v44 = vpop.f32.mrb[33].mxu0 }
 0x2d5   :  { %v13710_v46 = vpack.c.bf16 %v12650_v43, %v1315_v44  ;;  %v11397_v43 = vld [vmem:[%s14624_s20] ss:$0 sm:$0xff]  ;;  %v14633_v44 = vshrl.u32 %v166_v38, 7 }
 0x2d7   :  { %12644 = vmatmul.mubr.msk.f32.vlgmr.msra.gmra.mrb[4].mxu1 %vm990_vm8, %v11368_v45  ;;  %v12653_v48 = vpop.f32.mrb[34].mxu0  ;;  %13711 = vmatprep.subr.bf16.mxu1 %v13710_v46  ;;  %vm1932_vm14 = vcmp.eq.s32.totalorder %v14633_v44, 0  ;;  %vm2019_vm15 = vcmp.eq.s32.totalorder %v14633_v44, 1  ;;  %vm2107_vm3 = vcmp.eq.s32.totalorder %v14633_v44, 2  ;;  %vm2195_vm4 = vcmp.eq.s32.totalorder %v14633_v44, 3 }
 0x2d8   :  { %v1325_v49 = vpop.f32.mrb[35].mxu0  ;;  %13713 = vmatpush3.bf16.msra.mxu1 %v13710_v46  ;;  %12662 = vmatprep.mubr.msk.f32.mxu1 %vm990_vm8, %v11376_v47  ;;  %v11398_v46 = vld [vmem:[%s14629_s27] ss:$0 sm:$0xff]  ;;  %vm2283_vm5 = vcmp.eq.s32.totalorder %v14633_v44, 4  ;;  %vm15828_vm6 = vcmp.eq.s32.totalorder %v14633_v44, 5 }
 0x2d9   :  { %v13714_v50 = vpack.c.bf16 %v12653_v48, %v1325_v49 }
 0x2db   :  { %13715 = vmatprep.subr.bf16.mxu1 %v13714_v50 }
 0x2dc   :  { %13717 = vmatpush3.bf16.msra.mxu1 %v13714_v50 }
 0x2dd   :  { %13722 = vmatprep.subr.bf16.mxu1 %v14338_v13 }
 0x2df   :  { %12663 = vmatmul.mubr.msk.f32.vlgmr.msra.gmra.mrb[4].mxu1 %vm990_vm8, %v11377_v51 }
 0x2e0   :  { %12676 = vmatprep.mubr.msk.f32.mxu1 %vm14339_vm12, %v14340_v14 }
 0x3b2   :  { %v12664_v60 = vpop.f32.mrb[4].mxu1 }
 0x3b3   :  { %v14088_v61 = vadd.f32 %v12664_v60, %v888_v58  ;;  %v1409_v62 = vpop.f32.mrb[5].mxu1 }
 0x3b4   :  { %v14089_v63 = vadd.f32 %v1409_v62, %v887_v59  ;;  %v11401_v62 = vld [vmem:[%s14608_s5 + $0x28] sm:$0xff] }
 0x3b5   :  { %vm1421_vm9 = vcmp.ge.f32.partialorder %v14088_v61, 0.0  ;;  %v1423_v0 = vmul.f32 0.01, %v14088_v61 }
 0x3b6   :  { %vm1420_vm10 = vcmp.ge.f32.partialorder %v14089_v63, 0.0  ;;  %v1422_v2 = vmul.f32 0.01, %v14089_v63 }
 0x3b7   :  { %v1425_v3 = vsel %vm1421_vm9, %v14088_v61, %v1423_v0  ;;  %v11400_v61 = vld [vmem:[%s14608_s5 + $0x20] sm:$0xff]  ;;  %vm15827_vm9 = vcmp.eq.s32.totalorder %v14633_v44, 6 }
 0x3b8   :  { %v1434_v4 = vmul.f32 %v11380_v1, %v1425_v3  ;;  %v1424_v6 = vsel %vm1420_vm10, %v14089_v63, %v1422_v2  ;;  %v13746_v3 = vpack.c.bf16 %v11401_v62, %v11400_v61  ;;  %vm15816_vm10 = vcmp.eq.s32.totalorder %v14633_v44, 7 }
 0x3b9   :  { %v1433_v7 = vmul.f32 %v11380_v1, %v1424_v6  ;;  %v11403_v6 = vld [vmem:[%s14608_s5 + $0x38] sm:$0xff] }
 0x3ba   :  { %v14565_v11 = vadd.f32 %v11381_v5, %v1434_v4 }
 0x3bb   :  { %v14563_v10 = vadd.f32 %v11381_v5, %v1433_v7  ;;  %v11402_v5 = vld [vmem:[%s14608_s5 + $0x30] sm:$0xff] }
 0x3bd   :  { %12669 = vmatprep.mubr.msk.f32.mxu0 %vm1447_vm11, %v14563_v10 }
 0x3be   :  { %12670 = vmatmul.mubr.msk.f32.vlgmr.msra.gmra.mrb[36].mxu0 %vm1447_vm11, %v14565_v11 }
 0x3bf   :  { %13728 = vmatpush3.bf16.msra.mxu0 %v13725_v57  ;;  %12683 = vmatprep.mubr.msk.f32.mxu0 %vm1447_vm11, %v14563_v10 }
 0x3c0   :  { %13733 = vmatprep.subr.bf16.mxu0 %v13732_v12 }
 0x3c2   :  { %12684 = vmatmul.mubr.msk.f32.vlgmr.msra.gmra.mrb[38].mxu0 %vm1447_vm11, %v14565_v11 }
 0x3c3   :  { %13735 = vmatpush3.bf16.msra.mxu0 %v13732_v12  ;;  %12697 = vmatprep.mubr.msk.f32.mxu0 %vm1447_vm11, %v14563_v10  ;;  %v13749_v12 = vpack.c.bf16 %v11403_v6, %v11402_v5 }
 0x3c4   :  { %13739 = vmatprep.subr.bf16.mxu0 %v14338_v13 }
 0x3c6   :  { %12698 = vmatmul.mubr.msk.f32.vlgmr.msra.gmra.mrb[40].mxu0 %vm1447_vm11, %v14565_v11 }
 0x3c7   :  { %12715 = vmatprep.mubr.msk.f32.mxu0 %vm14339_vm12, %v14340_v14  ;;  %13741 = vmatpush3.bf16.msra.mxu0 %v13740_v34  ;;  %v11410_v34 = vld [vmem:[%s14608_s5 + $0x60] sm:$0xff] }
 0x3c8   :  { %13742 = vmatprep.subr.bf16.mxu0 %v14338_v13 }
 0x3cb   :  { %13744 = vmatpush3.bf16.msra.mxu0 %v13743_v36 }
 0x3cc   :  { %13745 = vmatprep.subr.bf16.mxu0 %v14338_v13 }
 0x491   :  { %v12671_v15 = vpop.f32.mrb[36].mxu0 }
 0x492   :  { %v1520_v16 = vpop.f32.mrb[37].mxu0 }
 0x493   :  { %v13723_v17 = vpack.c.bf16 %v12671_v15, %v1520_v16  ;;  %v11405_v16 = vld [vmem:[%s14608_s5 + $0x40] sm:$0xff] }
 0x495   :  { %13724 = vmatpush3.bf16.msra.mxu1 %v13723_v17  ;;  %v12685_v18 = vpop.f32.mrb[38].mxu0  ;;  %v11406_v17 = vld [vmem:[%s14608_s5 + $0x48] sm:$0xff] }
 0x496   :  { %v1673_v22 = vpop.f32.mrb[39].mxu0  ;;  %13729 = vmatprep.subr.bf16.mxu1 %v14338_v13 }
 0x497   :  { %v13730_v23 = vpack.c.bf16 %v12685_v18, %v1673_v22 }
 0x498   :  { %12677 = vmatmul.mubr.msk.f32.vlgmr.msra.gmra.mrb[6].mxu1 %vm1447_vm11, %v1529_v20 }
 0x499   :  { %13731 = vmatpush3.bf16.msra.mxu1 %v13730_v23  ;;  %v12699_v24 = vpop.f32.mrb[40].mxu0  ;;  %12690 = vmatprep.mubr.msk.f32.mxu1 %vm14339_vm12, %v14340_v14  ;;  %v13752_v23 = vpack.c.bf16 %v11406_v17, %v11405_v16  ;;  %v11425_v17 = vld [vmem:[%s14608_s5 + $0xc0] sm:$0xff] }
 0x49a   :  { %v1827_v25 = vpop.f32.mrb[41].mxu0  ;;  %13736 = vmatprep.subr.bf16.mxu1 %v14338_v13 }
 0x49b   :  { %v13737_v28 = vpack.c.bf16 %v12699_v24, %v1827_v25  ;;  %v11407_v25 = vld [vmem:[%s14608_s5 + $0x50] sm:$0xff] }
 0x4a0   :  { %12691 = vmatmul.mubr.msk.f32.vlgmr.msra.gmra.mrb[6].mxu1 %vm1447_vm11, %v11389_v29 }
 0x4a1   :  { %13738 = vmatpush3.bf16.msra.mxu1 %v13737_v28  ;;  %12704 = vmatprep.mubr.msk.f32.mxu1 %vm14339_vm12, %v14340_v14  ;;  %v11408_v28 = vld [vmem:[%s14608_s5 + $0x58] sm:$0xff] }
 0x4a2   :  { %12795 = vmatprep.subr.mxu1 %v14340_v14  ;;  %v13755_v32 = vpack.c.bf16 %v11408_v28, %v11407_v25  ;;  %v11427_v25 = vld [vmem:[%s14608_s5 + $0xd0] sm:$0xff]  ;;  %v11428_v28 = vld [vmem:[%s14608_s5 + $0xd8] sm:$0xff] }
 0x4a8   :  { %12705 = vmatmul.mubr.msk.f32.vlgmr.msra.gmra.mrb[6].mxu1 %vm1447_vm11, %v11395_v30 }
 0x4a9   :  { %12797 = vmatprep.mubr.msk.f32.mxu1 %vm14339_vm12, %v14340_v14 }
 0x57b   :  { %v1907_v39 = vpop.f32.mrb[6].mxu1 }
 0x57c   :  { %v14090_v40 = vadd.f32 %v1907_v39, %v1444_v37  ;;  %v12706_v41 = vpop.f32.mrb[7].mxu1  ;;  %v13758_v39 = vpack.c.bf16 %v11411_v35, %v11410_v34  ;;  %v11431_v34 = vld [vmem:[%s14608_s5 + $0xe8] sm:$0xff] }
 0x57d   :  { %v11412_v41 = vld [vmem:[%s14608_s5 + $0x70] sm:$0xff] }
 0x57e   :  { %vm1912_vm13 = vcmp.ge.f32.partialorder %v14090_v40, 0.0  ;;  %v1913_v42 = vmul.f32 0.01, %v14090_v40 }
 0x580   :  { %v1914_v45 = vsel %vm1912_vm13, %v14090_v40, %v1913_v42  ;;  %v11413_v42 = vld [vmem:[%s14608_s5 + $0x78] sm:$0xff] }
 0x581   :  { %v1922_v47 = vmul.f32 %v11397_v43, %v1914_v45 }
 0x583   :  { %v14638_v48 = vadd.f32 %v11398_v46, %v1922_v47  ;;  %v13761_v47 = vpack.c.bf16 %v11413_v42, %v11412_v41 }
 0x585   :  { %v1933_v49 = vsel %vm1932_vm14, %v14638_v48, 0.0  ;;  %v2020_v50 = vsel %vm2019_vm15, %v14638_v48, 0.0  ;;  %v2108_v55 = vsel %vm2107_vm3, %v14638_v48, 0.0  ;;  %v2196_v2 = vsel %vm2195_vm4, %v14638_v48, 0.0 }
 0x586   :  { %v1934_v51 = vsel %vm990_vm8, %v1933_v49, 0.0  ;;  %v2021_v52 = vsel %vm990_vm8, %v2020_v50, 0.0  ;;  %v2109_v58 = vsel %vm990_vm8, %v2108_v55, 0.0  ;;  %v2197_v9 = vsel %vm990_vm8, %v2196_v2, 0.0  ;;  %v11415_v50 = vld [vmem:[%s14608_s5 + $0x80] sm:$0xff] }
 0x587   :  { %v1935_v53 = vrot.slane %v1934_v51, 4  ;;  %v2022_v54 = vrot.slane %v2021_v52, 4  ;;  %v2110_v0 = vrot.slane %v2109_v58, 4  ;;  %v2198_v20 = vrot.slane %v2197_v9, 4 }
 0x588   :  { %v2284_v22 = vsel %vm2283_vm5, %v14638_v48, 0.0  ;;  %v2372_v38 = vsel %vm15828_vm6, %v14638_v48, 0.0 }
 0x589   :  { %v1936_v56 = vadd.f32 %v1935_v53, %v1934_v51  ;;  %v2023_v57 = vadd.f32 %v2022_v54, %v2021_v52  ;;  %v2111_v8 = vadd.f32 %v2110_v0, %v2109_v58  ;;  %v2199_v30 = vadd.f32 %v2198_v20, %v2197_v9  ;;  %v11416_v51 = vld [vmem:[%s14608_s5 + $0x88] sm:$0xff]  ;;  %v11418_v58 = vld [vmem:[%s14608_s5 + $0x98] sm:$0xff]  ;;  %v11420_v0 = vld [vmem:[%s14608_s5 + $0xa0] sm:$0xff] }
 0x58a   :  { %v2285_v31 = vsel %vm990_vm8, %v2284_v22, 0.0  ;;  %v2373_v46 = vsel %vm990_vm8, %v2372_v38, 0.0  ;;  %v2460_v54 = vsel %vm15827_vm9, %v14638_v48, 0.0  ;;  %v13764_v55 = vpack.c.bf16 %v11416_v51, %v11415_v50  ;;  %v11432_v38 = vld [vmem:[%s14608_s5 + $0xf0] sm:$0xff]  ;;  %v2710_v51 = vld [vmem:[%s14759_s23] sm:$0xff]  ;;  %s14360_s23 = smov 21  }
 0x58b   :  { %v1937_v59 = vrot.slane %v1936_v56, 2  ;;  %v2024_v63 = vrot.slane %v2023_v57, 2  ;;  %v2112_v18 = vrot.slane %v2111_v8, 2  ;;  %v2200_v36 = vrot.slane %v2199_v30, 2  ;;  %s14974_s27 = sld [smem:[%s15801_s0 + %s14360_s23]]  }
 0x58c   :  { %v2286_v37 = vrot.slane %v2285_v31, 4  ;;  %v2374_v53 = vrot.slane %v2373_v46, 4  ;;  %v2461_v61 = vsel %vm990_vm8, %v2460_v54, 0.0  ;;  %s15046_s23 = sld [smem:[%s15801_s0 + %s14363_s10]]  }
 0x58d   :  { %v1938_v60 = vadd.f32 %v1937_v59, %v1936_v56  ;;  %v2025_v7 = vadd.f32 %v2024_v63, %v2023_v57  ;;  %v2113_v29 = vadd.f32 %v2112_v18, %v2111_v8  ;;  %v2201_v43 = vadd.f32 %v2200_v36, %v2199_v30  ;;  %v11417_v57 = vld [vmem:[%s14608_s5 + $0x90] sm:$0xff]  ;;  %v11423_v8 = vld [vmem:[%s14608_s5 + $0xb8] sm:$0xff]  ;;  %v11426_v18 = vld [vmem:[%s14608_s5 + $0xc8] sm:$0xff] }
 0x58e   :  { %v2287_v45 = vadd.f32 %v2286_v37, %v2285_v31  ;;  %v13767_v62 = vpack.c.bf16 %v11418_v58, %v11417_v57  ;;  %v13779_v31 = vpack.c.bf16 %v11428_v28, %v11427_v25  ;;  %v11467_v25 = vld [vmem:[%s14836_s1 + $0x58] sm:$0xff] }
 0x58f   :  { %v1939_v1 = vrot.slane %v1938_v60, 1  ;;  %v2026_v15 = vrot.slane %v2025_v7, 1  ;;  %v2114_v33 = vrot.slane %v2113_v29, 1  ;;  %v2202_v49 = vrot.slane %v2201_v43, 1 }
 0x590   :  { %v2288_v52 = vrot.slane %v2287_v45, 2 }
 0x591   :  { %v1940_v4 = vadd.f32 %v1939_v1, %v1938_v60  ;;  %v2027_v24 = vadd.f32 %v2026_v15, %v2025_v7  ;;  %v2115_v40 = vadd.f32 %v2114_v33, %v2113_v29  ;;  %v2203_v56 = vadd.f32 %v2202_v49, %v2201_v43  ;;  %v11421_v1 = vld [vmem:[%s14608_s5 + $0xa8] sm:$0xff]  ;;  %v11422_v7 = vld [vmem:[%s14608_s5 + $0xb0] sm:$0xff]  ;;  %v11430_v33 = vld [vmem:[%s14608_s5 + $0xe0] sm:$0xff]  ;;  %15844 = sst [smem:[#allocation17_spill]] %s14974_s27 }
 0x592   :  { %v2289_v59 = vadd.f32 %v2288_v52, %v2287_v45  ;;  %v2375_v60 = vadd.f32 %v2374_v53, %v2373_v46  ;;  %v13770_v5 = vpack.c.bf16 %v11421_v1, %v11420_v0  ;;  %v13773_v16 = vpack.c.bf16 %v11423_v8, %v11422_v7  ;;  %v2635_v45 = vld [vmem:[%s14747_s4] sm:$0xff]  ;;  %v11446_v7 = vld [vmem:[%s14773_s2 + $0x28] sm:$0xff]  ;;  %v11448_v8 = vld [vmem:[%s14773_s2 + $0x30] sm:$0xff]  ;;  %s14361_s4 = smov 29  }
 0x593   :  { %12716 = vmatmul.mubr.msk.f32.vlgmr.msra.gmra.mrb[42].mxu0 %vm990_vm8, %v1940_v4  ;;  %v2548_v4 = vsel %vm15816_vm10, %v14638_v48, 0.0  ;;  %v13782_v36 = vpack.c.bf16 %v11431_v34, %v11430_v33  ;;  %12796 = vmatpush3.msra.mxu1 %v2635_v45  ;;  %v1931_v46 = vld [vmem:[%s14754_s15] sm:$0x1] }
 0x594   :  { %13747 = vmatpush3.bf16.msra.mxu0 %v13746_v3  ;;  %12726 = vmatprep.mubr.msk.f32.mxu0 %vm14339_vm12, %v14340_v14  ;;  %v2290_v63 = vrot.slane %v2289_v59, 1  ;;  %v2376_v2 = vrot.slane %v2375_v60, 2  ;;  %v2462_v3 = vrot.slane %v2461_v61, 4  ;;  %v2549_v15 = vsel %vm990_vm8, %v2548_v4, 0.0  ;;  %v2789_v52 = vld [vmem:[%s14773_s2] sm:$0xff]  ;;  %v11440_v4 = vld [vmem:[%s14773_s2 + $0x10] sm:$0xff] }
 0x595   :  { %13748 = vmatprep.subr.bf16.mxu0 %v14338_v13  ;;  %v2550_v22 = vrot.slane %v2549_v15, 4  ;;  %12800 = vmatprep.subr.mxu1 %v14340_v14 }
 0x596   :  { %v2291_v6 = vadd.f32 %v2290_v63, %v2289_v59  ;;  %v2377_v9 = vadd.f32 %v2376_v2, %v2375_v60 }
 0x597   :  { %v2551_v30 = vadd.f32 %v2550_v22, %v2549_v15  ;;  %v3426_v15 = vld [vmem:[%s14836_s1 + $0x8] sm:$0xff]  ;;  %v3428_v22 = vld [vmem:[%s14836_s1 + $0x18] sm:$0xff] }
 0x598   :  { %13750 = vmatpush3.bf16.msra.mxu0 %v13749_v12  ;;  %v2463_v12 = vadd.f32 %v2462_v3, %v2461_v61  ;;  %v2378_v48 = vrot.slane %v2377_v9, 1  ;;  %v2636_v61 = vld [vmem:[%s14786_s28] sm:$0x1]  ;;  %v11438_v3 = vld [vmem:[%s14773_s2 + $0x8] sm:$0xff]  ;;  %s14996_s28 = sld [smem:[%s15801_s0 + %s14361_s4]]  }
 0x599   :  { %13751 = vmatprep.subr.bf16.mxu0 %v14338_v13  ;;  %v2552_v35 = vrot.slane %v2551_v30, 2 }
 0x59a   :  { %v2464_v20 = vrot.slane %v2463_v12, 2 }
 0x59b   :  { %12727 = vmatmul.mubr.msk.f32.vlgmr.msra.gmra.mrb[42].mxu0 %vm990_vm8, %v2027_v24  ;;  %v2379_v24 = vadd.f32 %v2378_v48, %v2377_v9  ;;  %v11450_v9 = vld [vmem:[%s14773_s2 + $0x38] sm:$0xff] }
 0x59c   :  { %13753 = vmatpush3.bf16.msra.mxu0 %v13752_v23  ;;  %12737 = vmatprep.mubr.msk.f32.mxu0 %vm14339_vm12, %v14340_v14  ;;  %v13776_v23 = vpack.c.bf16 %v11426_v18, %v11425_v17  ;;  %v2465_v29 = vadd.f32 %v2464_v20, %v2463_v12  ;;  %v3425_v12 = vld [vmem:[%s14836_s1] sm:$0xff]  ;;  %v11465_v17 = vld [vmem:[%s14836_s1 + $0x48] sm:$0xff]  ;;  %v3427_v20 = vld [vmem:[%s14836_s1 + $0x10] sm:$0xff] }
 0x59d   :  { %13754 = vmatprep.subr.bf16.mxu0 %v14338_v13  ;;  %v13788_v48 = vpack.c.bf16 %v3426_v15, %v3425_v12  ;;  %v14909_v15 = vsel %vm15816_vm10, 1.0, %v14340_v14 }
 0x5a0   :  { %13756 = vmatpush3.bf16.msra.mxu0 %v13755_v32  ;;  %v2466_v32 = vrot.slane %v2465_v29, 1 }
 0x5a1   :  { %13757 = vmatprep.subr.bf16.mxu0 %v14338_v13 }
 0x5a2   :  { %v2467_v37 = vadd.f32 %v2466_v32, %v2465_v29  ;;  %v14854_v29 = vsub.s32 0, %v14633_v44 }
 0x5a3   :  { %12738 = vmatmul.mubr.msk.f32.vlgmr.msra.gmra.mrb[42].mxu0 %vm990_vm8, %v2115_v40  ;;  %v2553_v40 = vadd.f32 %v2552_v35, %v2551_v30  ;;  %v2788_v35 = vld [vmem:[%s14851_s22] sm:$0xff]  ;;  %s14938_s22 = sld [smem:[%s15801_s0 + %s14356_s26]]   ;;  %s14357_s26 = smov 22  }
 0x5a4   :  { %13759 = vmatpush3.bf16.msra.mxu0 %v13758_v39  ;;  %12748 = vmatprep.mubr.msk.f32.mxu0 %vm14339_vm12, %v14340_v14  ;;  %v11433_v39 = vld [vmem:[%s14608_s5 + $0xf8] sm:$0xff] }
 0x5a5   :  { %13760 = vmatprep.subr.bf16.mxu0 %v14338_v13  ;;  %v13785_v41 = vpack.c.bf16 %v11433_v39, %v11432_v38  ;;  %v2554_v42 = vrot.slane %v2553_v40, 1 }
 0x5a7   :  { %v2555_v43 = vadd.f32 %v2554_v42, %v2553_v40 }
 0x5a8   :  { %13762 = vmatpush3.bf16.msra.mxu0 %v13761_v47 }
 0x5a9   :  { %13763 = vmatprep.subr.bf16.mxu0 %v14338_v13  ;;  %15840 = sst [smem:[#allocation13_spill]] %s14938_s22 }
 0x5ab   :  { %12749 = vmatmul.mubr.msk.f32.vlgmr.msra.gmra.mrb[42].mxu0 %vm990_vm8, %v2203_v56 }
 0x5ac   :  { %13765 = vmatpush3.bf16.msra.mxu0 %v13764_v55  ;;  %12759 = vmatprep.mubr.msk.f32.mxu0 %vm14339_vm12, %v14340_v14  ;;  %v2711_v55 = vld [vmem:[%s14780_s16] sm:$0x1] }
 0x5ad   :  { %13766 = vmatprep.subr.bf16.mxu0 %v14338_v13 }
 0x5b0   :  { %13768 = vmatpush3.bf16.msra.mxu0 %v13767_v62  ;;  %v2782_v62 = vld [vmem:[%s14791_s11] sm:$0x1]  ;;  %s14362_s11 = smov 24  }
 0x5b1   :  { %13769 = vmatprep.subr.bf16.mxu0 %v14338_v13  ;;  %s15017_s7 = sld [smem:[%s15801_s0 + %s14362_s11]]   ;;  %s14364_s11 = smov 25  }
 0x5b3   :  { %12760 = vmatmul.mubr.msk.f32.vlgmr.msra.gmra.mrb[42].mxu0 %vm990_vm8, %v2291_v6  ;;  %v11444_v6 = vld [vmem:[%s14773_s2 + $0x20] sm:$0xff] }
 0x5b4   :  { %13771 = vmatpush3.bf16.msra.mxu0 %v13770_v5  ;;  %12770 = vmatprep.mubr.msk.f32.mxu0 %vm14339_vm12, %v14340_v14  ;;  %v11442_v5 = vld [vmem:[%s14773_s2 + $0x18] sm:$0xff] }
 0x5b5   :  { %13772 = vmatprep.subr.bf16.mxu0 %v14338_v13 }
 0x5b7   :  { %15845 = sst [smem:[#allocation18_spill]] %s15017_s7 }
 0x5b8   :  { %13774 = vmatpush3.bf16.msra.mxu0 %v13773_v16  ;;  %v11464_v16 = vld [vmem:[%s14836_s1 + $0x40] sm:$0xff] }
 0x5b9   :  { %13775 = vmatprep.subr.bf16.mxu0 %v14338_v13  ;;  %v13800_v18 = vpack.c.bf16 %v11465_v17, %v11464_v16 }
 0x5bb   :  { %12771 = vmatmul.mubr.msk.f32.vlgmr.msra.gmra.mrb[42].mxu0 %vm990_vm8, %v2379_v24  ;;  %v13791_v24 = vpack.c.bf16 %v3428_v22, %v3427_v20  ;;  %v3502_v22 = vld [vmem:[%s14918_s18] sm:$0xff] }
 0x5bc   :  { %13777 = vmatpush3.bf16.msra.mxu0 %v13776_v23  ;;  %12781 = vmatprep.mubr.msk.f32.mxu0 %vm14339_vm12, %v14340_v14  ;;  %v11466_v23 = vld [vmem:[%s14836_s1 + $0x50] sm:$0xff] }
 0x5bd   :  { %13778 = vmatprep.subr.bf16.mxu0 %v14338_v13  ;;  %v13803_v28 = vpack.c.bf16 %v11467_v25, %v11466_v23  ;;  %v11455_v23 = vld [vmem:[%s14836_s1 + $0x20] sm:$0xff] }
 0x5c0   :  { %13780 = vmatpush3.bf16.msra.mxu0 %v13779_v31  ;;  %v14859_v31 = vsel %vm1932_vm14, 1.0, %v14340_v14 }
 0x5c1   :  { %13781 = vmatprep.subr.bf16.mxu0 %v14338_v13 }
 0x5c3   :  { %12782 = vmatmul.mubr.msk.f32.vlgmr.msra.gmra.mrb[42].mxu0 %vm990_vm8, %v2467_v37  ;;  %v14867_v37 = vsel %vm2019_vm15, 1.0, %v14340_v14 }
 0x5c4   :  { %13783 = vmatpush3.bf16.msra.mxu0 %v13782_v36  ;;  %12792 = vmatprep.mubr.msk.f32.mxu0 %vm14339_vm12, %v14340_v14 }
 0x5c5   :  { %13784 = vmatprep.subr.bf16.mxu0 %v14338_v13 }
 0x5c8   :  { %13786 = vmatpush3.bf16.msra.mxu0 %v13785_v41 }
 0x5c9   :  { %13799 = vmatprep.subr.bf16.mxu0 %v14338_v13 }
 0x5cb   :  { %12793 = vmatmul.mubr.msk.f32.vlgmr.msra.gmra.mrb[42].mxu0 %vm990_vm8, %v2555_v43  ;;  %v14874_v43 = vsel %vm2107_vm3, 1.0, %v14340_v14 }
 0x5cc   :  { %12885 = vmatprep.mubr.msk.f32.mxu0 %vm14339_vm12, %v14340_v14  ;;  %13801 = vmatpush3.bf16.msra.mxu0 %v13800_v18 }
 0x5cd   :  { %13802 = vmatprep.subr.bf16.mxu0 %v14338_v13 }
 0x5d0   :  { %13804 = vmatpush3.bf16.msra.mxu0 %v13803_v28 }
 0x69e   :  { %v2630_v47 = vpop.f32.mrb[42].mxu0 }
 0x69f   :  { %v14091_v49 = vadd.f32 %v2630_v47, %v1931_v46  ;;  %v12794_v50 = vpop.f32.mrb[43].mxu0 }
 0x6a1   :  { %12798 = vmatmul.mubr.msk.f32.vlgmr.msra.gmra.mrb[8].mxu1 %vm890_vm7, %v14091_v49 }
 0x6a2   :  { %12801 = vmatpush3.msra.mxu1 %v2710_v51  ;;  %12802 = vmatprep.mubr.msk.f32.mxu1 %vm14339_vm12, %v14340_v14  ;;  %v14881_v51 = vsel %vm2195_vm4, 1.0, %v14340_v14 }
 0x6a3   :  { %12805 = vmatprep.subr.mxu1 %v14340_v14 }
 0x6a5   :  { %12803 = vmatmul.mubr.msk.f32.vlgmr.msra.gmra.mrb[10].mxu1 %vm890_vm7, %v14091_v49 }
 0x6a6   :  { %12807 = vmatprep.mubr.msk.f32.mxu1 %vm14339_vm12, %v14340_v14  ;;  %12806 = vmatpush3.msra.mxu1 %v2789_v52 }
 0x6a7   :  { %12810 = vmatprep.subr.mxu1 %v14340_v14 }
 0x774   :  { %v2706_v53 = vpop.f32.mrb[8].mxu1 }
 0x775   :  { %v12799_v54 = vpop.f32.mrb[9].mxu1  ;;  %v2707_v0 = vadd.f32 %v2706_v53, %v2636_v61 }
 0x778   :  { %v2778_v56 = vpop.f32.mrb[10].mxu1 }
 0x779   :  { %v2779_v57 = vadd.f32 %v2778_v56, %v2711_v55  ;;  %v12804_v58 = vpop.f32.mrb[11].mxu1 }
 0x77b   :  { %v2783_v59 = vmul.f32 0.5, %v2779_v57  ;;  %v14888_v57 = vsel %vm2283_vm5, 1.0, %v14340_v14 }
 0x77d   :  { %v2784_v60 = vmul.f32 1.442695, %v2783_v59 }
 0x77f   :  { %14323 = vpow2.f32 %v2784_v60 }
 0x789   :  { %v14324_v63 = vpop.eup %14323 }
 0x78a   :  { %v2786_v1 = vmul.f32 %v14324_v63, %v2782_v62  ;;  %v14895_v63 = vsel %vm15828_vm6, 1.0, %v14340_v14 }
 0x78c   :  { %v2787_v2 = vadd.f32 %v2786_v1, %v2707_v0 }
 0x78e   :  { %12808 = vmatmul.mubr.msk.f32.vlgmr.msra.gmra.mrb[12].mxu1 %vm890_vm7, %v2787_v2 }
 0x78f   :  { %12811 = vmatpush3.msra.mxu1 %v11438_v3  ;;  %12812 = vmatprep.mubr.msk.f32.mxu1 %vm14339_vm12, %v14340_v14 }
 0x790   :  { %12815 = vmatprep.subr.mxu1 %v14340_v14 }
 0x792   :  { %12813 = vmatmul.mubr.msk.f32.vlgmr.msra.gmra.mrb[14].mxu1 %vm890_vm7, %v2787_v2 }
 0x793   :  { %12816 = vmatpush3.msra.mxu1 %v11440_v4  ;;  %12817 = vmatprep.mubr.msk.f32.mxu1 %vm14339_vm12, %v14340_v14 }
 0x794   :  { %12820 = vmatprep.subr.mxu1 %v14340_v14 }
 0x796   :  { %12818 = vmatmul.mubr.msk.f32.vlgmr.msra.gmra.mrb[16].mxu1 %vm890_vm7, %v2787_v2 }
 0x797   :  { %12821 = vmatpush3.msra.mxu1 %v11442_v5  ;;  %12822 = vmatprep.mubr.msk.f32.mxu1 %vm14339_vm12, %v14340_v14  ;;  %v14902_v5 = vsel %vm15827_vm9, 1.0, %v14340_v14 }
 0x798   :  { %12825 = vmatprep.subr.mxu1 %v14340_v14 }
 0x79a   :  { %12823 = vmatmul.mubr.msk.f32.vlgmr.msra.gmra.mrb[18].mxu1 %vm890_vm7, %v2787_v2 }
 0x79b   :  { %12826 = vmatpush3.msra.mxu1 %v11444_v6  ;;  %12827 = vmatprep.mubr.msk.f32.mxu1 %vm14339_vm12, %v14340_v14 }
 0x79c   :  { %12830 = vmatprep.subr.mxu1 %v14340_v14 }
 0x79e   :  { %12828 = vmatmul.mubr.msk.f32.vlgmr.msra.gmra.mrb[20].mxu1 %vm890_vm7, %v2787_v2 }
 0x79f   :  { %12831 = vmatpush3.msra.mxu1 %v11446_v7  ;;  %12832 = vmatprep.mubr.msk.f32.mxu1 %vm14339_vm12, %v14340_v14 }
 0x7a0   :  { %12835 = vmatprep.subr.mxu1 %v14340_v14 }
 0x7a2   :  { %12833 = vmatmul.mubr.msk.f32.vlgmr.msra.gmra.mrb[22].mxu1 %vm890_vm7, %v2787_v2 }
 0x7a3   :  { %12836 = vmatpush3.msra.mxu1 %v11448_v8  ;;  %12837 = vmatprep.mubr.msk.f32.mxu1 %vm14339_vm12, %v14340_v14 }
 0x7a4   :  { %12840 = vmatprep.subr.mxu1 %v14340_v14 }
 0x7a6   :  { %12838 = vmatmul.mubr.msk.f32.vlgmr.msra.gmra.mrb[24].mxu1 %vm890_vm7, %v2787_v2 }
 0x7a7   :  { %12841 = vmatpush3.msra.mxu1 %v11450_v9  ;;  %12842 = vmatprep.mubr.msk.f32.mxu1 %vm14339_vm12, %v14340_v14 }
 0x7a8   :  { %13787 = vmatprep.subr.bf16.mxu1 %v14338_v13 }
 0x7aa   :  { %12843 = vmatmul.mubr.msk.f32.vlgmr.msra.gmra.mrb[26].mxu1 %vm890_vm7, %v2787_v2 }
 0x7ab   :  { %12853 = vmatprep.mubr.msk.f32.mxu1 %vm14339_vm12, %v14340_v14  ;;  %13789 = vmatpush3.bf16.msra.mxu1 %v13788_v48 }
 0x7ac   :  { %13790 = vmatprep.subr.bf16.mxu1 %v14338_v13 }
 0x7af   :  { %13792 = vmatpush3.bf16.msra.mxu1 %v13791_v24  ;;  %v11456_v24 = vld [vmem:[%s14836_s1 + $0x28] sm:$0xff] }
 0x861   :  { %v2859_v30 = vpop.f32.mrb[12].mxu1 }
 0x862   :  { %v2867_v32 = vrot.slane %v2859_v30, %v14854_v29  ;;  %v12809_v33 = vpop.f32.mrb[13].mxu1  ;;  %v3503_v30 = vld [vmem:[%s14918_s18 + $0x8] sm:$0xff] }
 0x864   :  { %v2868_v34 = vmul.f32 %v2867_v32, %v14859_v31  ;;  %v13794_v32 = vpack.c.bf16 %v11456_v24, %v11455_v23  ;;  %v11502_v23 = vld [vmem:[%s14938_s22 + $0x28] sm:$0xff] }
 0x865   :  { %v2938_v36 = vpop.f32.mrb[14].mxu1 }
 0x866   :  { %v2946_v38 = vrot.slane %v2938_v36, %v14854_v29  ;;  %v12814_v39 = vpop.f32.mrb[15].mxu1  ;;  %v2869_v40 = vadd.f32 %v2868_v34, %v2788_v35  ;;  %v11457_v35 = vld [vmem:[%s14836_s1 + $0x30] sm:$0xff]  ;;  %v11458_v36 = vld [vmem:[%s14836_s1 + $0x38] sm:$0xff]  ;;  %s14955_s1 = sld [smem:[%s15801_s0 + %s14357_s26]]   ;;  %s14359_s26 = smov 20  }
 0x867   :  { %v11460_v39 = vld [vmem:[%s14918_s18 + $0x10] sm:$0xff]  ;;  %s14969_s2 = sld [smem:[%s15801_s0 + %s14359_s26]]   ;;  %s14369_s26 = smov 40  }
 0x868   :  { %v2947_v41 = vmul.f32 %v2946_v38, %v14867_v37  ;;  %v13797_v38 = vpack.c.bf16 %v11458_v36, %v11457_v35  ;;  %v4098_v35 = vld [vmem:[%s15017_s7 + $0x8] sm:$0xff]  ;;  %v4099_v36 = vld [vmem:[%s15017_s7 + $0x10] sm:$0xff] }
 0x869   :  { %v3017_v42 = vpop.f32.mrb[16].mxu1 }
 0x86a   :  { %v2948_v45 = vadd.f32 %v2947_v41, %v2869_v40  ;;  %v3025_v46 = vrot.slane %v3017_v42, %v14854_v29  ;;  %v12819_v47 = vpop.f32.mrb[17].mxu1  ;;  %v3939_v40 = vld [vmem:[%s14938_s22] sm:$0xff]  ;;  %v3940_v41 = vld [vmem:[%s14938_s22 + $0x8] sm:$0xff] }
 0x86b   :  { %v11469_v47 = vld [vmem:[%s14918_s18 + $0x20] sm:$0xff] }
 0x86c   :  { %v3026_v49 = vmul.f32 %v3025_v46, %v14874_v43  ;;  %15841 = sst [smem:[#allocation14_spill]] %s14955_s1 }
 0x86d   :  { %v3096_v50 = vpop.f32.mrb[18].mxu1  ;;  %15843 = sst [smem:[#allocation16_spill]] %s14969_s2 }
 0x86e   :  { %v3027_v52 = vadd.f32 %v3026_v49, %v2948_v45  ;;  %v3104_v53 = vrot.slane %v3096_v50, %v14854_v29  ;;  %v12824_v54 = vpop.f32.mrb[19].mxu1  ;;  %v11461_v45 = vld [vmem:[%s14918_s18 + $0x18] sm:$0xff]  ;;  %v13805_v49 = vpack.c.bf16 %v3940_v41, %v3939_v40  ;;  %v11470_v50 = vld [vmem:[%s14918_s18 + $0x28] sm:$0xff]  ;;  %s14358_s18 = smov 19  }
 0x86f   :  { %s14964_s16 = sld [smem:[%s15801_s0 + %s14358_s18]]  }
 0x870   :  { %v3105_v55 = vmul.f32 %v3104_v53, %v14881_v51  ;;  %v3938_v53 = vld [vmem:[%s14955_s1 + $0x8] sm:$0xff] }
 0x871   :  { %v3175_v56 = vpop.f32.mrb[20].mxu1 }
 0x872   :  { %v3106_v58 = vadd.f32 %v3105_v55, %v3027_v52  ;;  %v3183_v59 = vrot.slane %v3175_v56, %v14854_v29  ;;  %v12829_v60 = vpop.f32.mrb[21].mxu1  ;;  %v3937_v52 = vld [vmem:[%s14955_s1] sm:$0xff]  ;;  %v11485_v55 = vld [vmem:[%s14938_s22 + $0x10] sm:$0xff]  ;;  %v11486_v56 = vld [vmem:[%s14938_s22 + $0x18] sm:$0xff] }
 0x873   :  { %v13809_v54 = vpack.c.bf16 %v3938_v53, %v3937_v52 }
 0x874   :  { %v3184_v61 = vmul.f32 %v3183_v59, %v14888_v57 }
 0x875   :  { %v3254_v62 = vpop.f32.mrb[22].mxu1  ;;  %15842 = sst [smem:[#allocation15_spill]] %s14964_s16  ;;  %v3424_v59 = vld [vmem:[%s14964_s16 + $0x8] sm:$0xff]  ;;  %v3423_v60 = vld [vmem:[%s14964_s16] sm:$0xff]  ;;  %s15864_s16 = sld [smem:[#allocation17_spill]] }
 0x876   :  { %v3185_v0 = vadd.f32 %v3184_v61, %v3106_v58  ;;  %v3262_v1 = vrot.slane %v3254_v62, %v14854_v29  ;;  %v12834_v2 = vpop.f32.mrb[23].mxu1  ;;  %v13817_v58 = vpack.c.bf16 %v11486_v56, %v11485_v55  ;;  %v11509_v55 = vld [vmem:[%s15017_s7 + $0x50] sm:$0xff]  ;;  %v11510_v56 = vld [vmem:[%s15017_s7 + $0x58] sm:$0xff] }
 0x878   :  { %v3263_v3 = vmul.f32 %v3262_v1, %v14895_v63 }
 0x879   :  { %v3333_v4 = vpop.f32.mrb[24].mxu1 }
 0x87a   :  { %v3264_v6 = vadd.f32 %v3263_v3, %v3185_v0  ;;  %v3341_v7 = vrot.slane %v3333_v4, %v14854_v29  ;;  %v12839_v8 = vpop.f32.mrb[25].mxu1  ;;  %v11473_v3 = vld [vmem:[%s14969_s2] ss:$0 sm:$0xff]  ;;  %s14366_s2 = smov 27  }
 0x87b   :  { %v11474_v8 = vld [vmem:[%s14974_s27] ss:$0 sm:$0xff]  ;;  %s15053_s27 = sld [smem:[%s15801_s0 + %s14364_s11]]  }
 0x87c   :  { %v3342_v9 = vmul.f32 %v3341_v7, %v14902_v5 }
 0x87d   :  { %v3412_v12 = vpop.f32.mrb[26].mxu1 }
 0x87e   :  { %v3343_v16 = vadd.f32 %v3342_v9, %v3264_v6  ;;  %v3420_v48 = vrot.slane %v3412_v12, %v14854_v29  ;;  %v12844_v17 = vpop.f32.mrb[27].mxu1 }
 0x880   :  { %v3421_v18 = vmul.f32 %v3420_v48, %v14909_v15  ;;  %v11484_v48 = vld [vmem:[%s14955_s1 + $0x18] sm:$0xff] }
 0x882   :  { %v3422_v20 = vadd.f32 %v3421_v18, %v3343_v16  ;;  %v11483_v16 = vld [vmem:[%s14955_s1 + $0x10] sm:$0xff] }
 0x884   :  { %12854 = vmatmul.mubr.msk.f32.vlgmr.msra.gmra.mrb[28].mxu1 %vm990_vm8, %v3422_v20  ;;  %12886 = vmatmul.mubr.msk.f32.vlgmr.msra.gmra.mrb[44].mxu0 %vm990_vm8, %v3422_v20 }
 0x885   :  { %12858 = vmatprep.mubr.msk.f32.mxu1 %vm890_vm7, %v3502_v22  ;;  %v11501_v22 = vld [vmem:[%s14938_s22 + $0x20] sm:$0xff]  ;;  %s15063_s22 = sld [smem:[%s15801_s0 + %s14366_s2]]   ;;  %s14367_s2 = smov 30  }
 0x886   :  { %v13829_v24 = vpack.c.bf16 %v11502_v23, %v11501_v22 }
 0x957   :  { %v3498_v25 = vpop.f32.mrb[28].mxu1  ;;  %v3819_v28 = vpop.f32.mrb[44].mxu0 }
 0x958   :  { %v12855_v33 = vpop.f32.mrb[29].mxu1  ;;  %12856 = vmatprep.subr.mxu1 %v3498_v25  ;;  %v12887_v34 = vpop.f32.mrb[45].mxu0 }
 0x959   :  { %12857 = vmatpush3.msra.mxu1 %v3498_v25  ;;  %v11499_v25 = vld [vmem:[%s14955_s1 + $0x20] sm:$0xff] }
 0x95a   :  { %13793 = vmatprep.subr.bf16.mxu1 %v14338_v13  ;;  %12859 = vmatmul.mubr.msk.f32.vlgmr.msra.gmra.mrb[30].mxu1 %vm890_vm7, %v3503_v30 }
 0x95b   :  { %13795 = vmatpush3.bf16.msra.mxu1 %v13794_v32  ;;  %12869 = vmatprep.mubr.msk.f32.mxu1 %vm14339_vm12, %v14340_v14  ;;  %v4769_v32 = vld [vmem:[%s14996_s28] sm:$0xff] }
 0x95c   :  { %13796 = vmatprep.subr.bf16.mxu1 %v14338_v13 }
 0x95f   :  { %13798 = vmatpush3.bf16.msra.mxu1 %v13797_v38  ;;  %v4100_v38 = vld [vmem:[%s15017_s7 + $0x18] sm:$0xff] }
 0x962   :  { %12870 = vmatmul.mubr.msk.f32.vlgmr.msra.gmra.mrb[32].mxu1 %vm990_vm8, %v3422_v20  ;;  %v13821_v20 = vpack.c.bf16 %v11484_v48, %v11483_v16 }
 0x963   :  { %12874 = vmatprep.mubr.msk.f32.mxu1 %vm890_vm7, %v11460_v39  ;;  %v11491_v39 = vld [vmem:[%s15017_s7 + $0x20] sm:$0xff] }
 0xa35   :  { %v3658_v42 = vpop.f32.mrb[32].mxu1 }
 0xa36   :  { %v12871_v46 = vpop.f32.mrb[33].mxu1  ;;  %12872 = vmatprep.subr.mxu1 %v3658_v42 }
 0xa37   :  { %12873 = vmatpush3.msra.mxu1 %v3658_v42  ;;  %v11493_v46 = vld [vmem:[%s15017_s7 + $0x30] sm:$0xff] }
 0xa38   :  { %12875 = vmatmul.mubr.msk.f32.vlgmr.msra.gmra.mrb[30].mxu1 %vm890_vm7, %v11461_v45  ;;  %12888 = vmatprep.subr.mxu1 %v3819_v28  ;;  %v11492_v45 = vld [vmem:[%s15017_s7 + $0x28] sm:$0xff] }
 0xa39   :  { %12889 = vmatpush3.msra.mxu1 %v3819_v28  ;;  %12890 = vmatprep.mubr.msk.f32.mxu1 %vm890_vm7, %v11469_v47  ;;  %v11500_v28 = vld [vmem:[%s14955_s1 + $0x28] sm:$0xff]  ;;  %v11494_v47 = vld [vmem:[%s15017_s7 + $0x38] sm:$0xff]  ;;  %s15865_s1 = sld [smem:[#allocation18_spill]] }
 0xa3a   :  { %13806 = vmatprep.subr.bf16.mxu1 %v13805_v49  ;;  %v13833_v30 = vpack.c.bf16 %v11500_v28, %v11499_v25 }
 0xa40   :  { %12891 = vmatmul.mubr.msk.f32.vlgmr.msra.gmra.mrb[30].mxu1 %vm890_vm7, %v11470_v50 }
 0xa41   :  { %13808 = vmatpush3.bf16.msra.mxu1 %v13805_v49  ;;  %12897 = vmatprep.mubr.msk.f32.mxu1 %vm1447_vm11, %v14563_v10  ;;  %v11507_v49 = vld [vmem:[%s15017_s7 + $0x40] sm:$0xff] }
 0xa42   :  { %13810 = vmatprep.subr.bf16.mxu1 %v13809_v54 }
 0xa44   :  { %12898 = vmatmul.mubr.msk.f32.vlgmr.msra.gmra.mrb[34].mxu1 %vm1447_vm11, %v14565_v11 }
 0xa45   :  { %13812 = vmatpush3.bf16.msra.mxu1 %v13809_v54  ;;  %v11508_v54 = vld [vmem:[%s15017_s7 + $0x48] sm:$0xff] }
 0xa46   :  { %13818 = vmatprep.subr.bf16.mxu1 %v13817_v58 }
 0xb13   :  { %v12892_v61 = vpop.f32.mrb[30].mxu1 }
 0xb14   :  { %v14092_v62 = vadd.f32 %v12892_v61, %v3424_v59  ;;  %v3898_v0 = vpop.f32.mrb[31].mxu1  ;;  %v11534_v59 = vld [vmem:[%s14996_s28 + $0x8] sm:$0xff]  ;;  %v3933_v61 = vld [vmem:[%s15053_s27] sm:$0xff] }
 0xb15   :  { %v14093_v1 = vadd.f32 %v3898_v0, %v3423_v60  ;;  %v3934_v60 = vld [vmem:[%s15053_s27 + $0x8] sm:$0xff] }
 0xb16   :  { %vm3910_vm13 = vcmp.ge.f32.partialorder %v14092_v62, 0.0  ;;  %v3912_v2 = vmul.f32 0.01, %v14092_v62 }
 0xb17   :  { %vm3909_vm10 = vcmp.ge.f32.partialorder %v14093_v1, 0.0  ;;  %v3911_v4 = vmul.f32 0.01, %v14093_v1 }
 0xb18   :  { %v3914_v6 = vsel %vm3910_vm13, %v14092_v62, %v3912_v2 }
 0xb19   :  { %v3923_v7 = vmul.f32 %v11473_v3, %v3914_v6  ;;  %v3913_v9 = vsel %vm3909_vm10, %v14093_v1, %v3911_v4 }
 0xb1a   :  { %v3922_v12 = vmul.f32 %v11473_v3, %v3913_v9  ;;  %v3936_v3 = vld [vmem:[%s15053_s27 + $0x18] sm:$0xff] }
 0xb1b   :  { %v3932_v18 = vadd.f32 %v11474_v8, %v3923_v7  ;;  %v3935_v7 = vld [vmem:[%s15053_s27 + $0x10] sm:$0xff] }
 0xb1c   :  { %v3931_v17 = vadd.f32 %v11474_v8, %v3922_v12 }
 0xb1e   :  { %12904 = vmatprep.mubr.msk.f32.mxu1 %vm1447_vm11, %v3931_v17 }
 0xb1f   :  { %12905 = vmatmul.mubr.msk.f32.vlgmr.msra.gmra.mrb[34].mxu1 %vm1447_vm11, %v3932_v18 }
 0xb20   :  { %13820 = vmatpush3.bf16.msra.mxu1 %v13817_v58  ;;  %12921 = vmatprep.mubr.msk.f32.mxu1 %vm1447_vm11, %v14563_v10  ;;  %v4768_v58 = vld [vmem:[%s15046_s23] sm:$0xff] }
 0xb21   :  { %13822 = vmatprep.subr.bf16.mxu1 %v13821_v20 }
 0xb23   :  { %12922 = vmatmul.mubr.msk.f32.vlgmr.msra.gmra.mrb[36].mxu1 %vm1447_vm11, %v14565_v11 }
 0xb24   :  { %12928 = vmatprep.mubr.msk.f32.mxu1 %vm1447_vm11, %v3931_v17  ;;  %13824 = vmatpush3.bf16.msra.mxu1 %v13821_v20 }
 0xb25   :  { %13830 = vmatprep.subr.bf16.mxu1 %v13829_v24 }
 0xb2b   :  { %12929 = vmatmul.mubr.msk.f32.vlgmr.msra.gmra.mrb[36].mxu1 %vm1447_vm11, %v3932_v18 }
 0xb2c   :  { %13832 = vmatpush3.bf16.msra.mxu1 %v13829_v24  ;;  %12945 = vmatprep.mubr.msk.f32.mxu1 %vm1447_vm11, %v14563_v10  ;;  %v4097_v10 = vld [vmem:[%s15017_s7] sm:$0xff]  ;;  %s14365_s7 = smov 26  }
 0xb2d   :  { %13834 = vmatprep.subr.bf16.mxu1 %v13833_v30  ;;  %12911 = vmatprep.mubr.msk.f32.mxu0 %vm1447_vm11, %v4097_v10  ;;  %s15058_s15 = sld [smem:[%s15801_s0 + %s14365_s7]]  }
 0xb2e   :  { %s15150_s7 = sld [smem:[%s15801_s0 + %s14367_s2]]  }
 0xb2f   :  { %12946 = vmatmul.mubr.msk.f32.vlgmr.msra.gmra.mrb[38].mxu1 %vm1447_vm11, %v14565_v11  ;;  %s15262_s2 = sld [smem:[%s15801_s0 + %s14369_s26]]  }
 0xb30   :  { %12952 = vmatprep.mubr.msk.f32.mxu1 %vm1447_vm11, %v3931_v17  ;;  %13836 = vmatpush3.bf16.msra.mxu1 %v13833_v30 }
 0xb31   :  { %12965 = vmatprep.subr.mxu1 %v4769_v32 }
 0xb33   :  { %v11515_v6 = vld [vmem:[%s15058_s15] ss:$0 sm:$0xff] }
 0xb37   :  { %12953 = vmatmul.mubr.msk.f32.vlgmr.msra.gmra.mrb[38].mxu1 %vm1447_vm11, %v3932_v18  ;;  %v11516_v18 = vld [vmem:[%s15063_s22] ss:$0 sm:$0xff] }
 0xb38   :  { %12967 = vmatprep.mubr.msk.f32.mxu1 %vm890_vm7, %v14483_v19  ;;  %12966 = vmatpush3.msra.mxu1 %v4769_v32 }
 0xb39   :  { %12973 = vmatprep.subr.mxu1 %v4768_v58 }
 0xb3b   :  { %12968 = vmatmul.mubr.msk.f32.vlgmr.msra.gmra.mrb[40].mxu1 %vm890_vm7, %v14485_v21 }
 0xb3c   :  { %12970 = vmatprep.mubr.msk.f32.mxu1 %vm890_vm7, %v14492_v26  ;;  %12974 = vmatpush3.msra.mxu1 %v4768_v58  ;;  %v4953_v58 = vld [vmem:[%s15150_s7 + $0x8] sm:$0xff] }
 0xb3d   :  { %13001 = vmatprep.subr.mxu1 %v11534_v59 }
 0xb3f   :  { %12971 = vmatmul.mubr.msk.f32.gmra.mrb[42].mxu1 %vm890_vm7, %v14494_v27 }
 0xbf2   :  { %v12906_v11 = vpop.f32.mrb[34].mxu1 }
 0xbf3   :  { %v4088_v33 = vpop.f32.mrb[35].mxu1 }
 0xbf4   :  { %v13813_v34 = vpack.c.bf16 %v12906_v11, %v4088_v33 }
 0xbf6   :  { %13814 = vmatprep.subr.bf16.mxu0 %v13813_v34 }
 0xbf7   :  { %13816 = vmatpush3.bf16.msra.mxu0 %v13813_v34  ;;  %v11533_v34 = vld [vmem:[%s15046_s23 + $0x8] sm:$0xff] }
 0xbfa   :  { %12912 = vmatmul.mubr.msk.f32.vlgmr.msra.gmra.mrb[46].mxu0 %vm1447_vm11, %v4098_v35 }
 0xbfb   :  { %12914 = vmatprep.mubr.msk.f32.mxu0 %vm1447_vm11, %v4099_v36 }
 0xbfe   :  { %v12930_v40 = vpop.f32.mrb[36].mxu1  ;;  %12915 = vmatmul.mubr.msk.f32.gmra.mrb[48].mxu0 %vm1447_vm11, %v4100_v38  ;;  %v11560_v38 = vld [vmem:[%s14996_s28 + $0x10] sm:$0xff] }
 0xbff   :  { %v4349_v41 = vpop.f32.mrb[37].mxu1  ;;  %12935 = vmatprep.mubr.msk.f32.mxu0 %vm1447_vm11, %v11491_v39  ;;  %v11559_v39 = vld [vmem:[%s15046_s23 + $0x10] sm:$0xff] }
 0xc00   :  { %v13825_v42 = vpack.c.bf16 %v12930_v40, %v4349_v41  ;;  %v5758_v40 = vld [vmem:[%s14378_s6] sm:$0x7] }
 0xc01   :  { %v15124_v41 = vld [vmem:[%s14383_s9 + $0x60] sm:$0xff] }
 0xc02   :  { %13826 = vmatprep.subr.bf16.mxu0 %v13825_v42 }
 0xc03   :  { %13828 = vmatpush3.bf16.msra.mxu0 %v13825_v42  ;;  %v15131_v42 = vld [vmem:[%s14383_s9 + $0x68] sm:$0xff] }
 0xc06   :  { %12936 = vmatmul.mubr.msk.f32.vlgmr.msra.gmra.mrb[46].mxu0 %vm1447_vm11, %v11492_v45  ;;  %v15134_v45 = vld [vmem:[%s14383_s9 + $0x70] sm:$0xff] }
 0xc07   :  { %12938 = vmatprep.mubr.msk.f32.mxu0 %vm1447_vm11, %v11493_v46  ;;  %v15141_v46 = vld [vmem:[%s14383_s9 + $0x78] sm:$0xff] }
 0xc0a   :  { %v12954_v50 = vpop.f32.mrb[38].mxu1  ;;  %12939 = vmatmul.mubr.msk.f32.gmra.mrb[48].mxu0 %vm1447_vm11, %v11494_v47  ;;  %v4952_v47 = vld [vmem:[%s15150_s7] sm:$0xff] }
 0xc0b   :  { %v4611_v52 = vpop.f32.mrb[39].mxu1  ;;  %12959 = vmatprep.mubr.msk.f32.mxu0 %vm1447_vm11, %v11507_v49  ;;  %v11624_v49 = vld [vmem:[%s14378_s6 + $0x8] sm:$0x7] }
 0xc0c   :  { %v13837_v53 = vpack.c.bf16 %v12954_v50, %v4611_v52 }
 0xc0e   :  { %13838 = vmatprep.subr.bf16.mxu0 %v13837_v53 }
 0xc0f   :  { %13840 = vmatpush3.bf16.msra.mxu0 %v13837_v53 }
 0xc12   :  { %12960 = vmatmul.mubr.msk.f32.vlgmr.msra.gmra.mrb[46].mxu0 %vm1447_vm11, %v11508_v54 }
 0xc13   :  { %12962 = vmatprep.mubr.msk.f32.mxu0 %vm1447_vm11, %v11509_v55 }
 0xc16   :  { %12963 = vmatmul.mubr.msk.f32.gmra.mrb[48].mxu0 %vm1447_vm11, %v11510_v56 }
 0xc17   :  { %12989 = vmatprep.mubr.msk.f32.mxu0 %vm990_vm8, %v4952_v47 }
 0xce5   :  { %v12961_v62 = vpop.f32.mrb[46].mxu0 }
 0xce6   :  { %v14094_v0 = vadd.f32 %v12961_v62, %v3934_v60  ;;  %v4703_v1 = vpop.f32.mrb[47].mxu0  ;;  %v4955_v60 = vld [vmem:[%s15150_s7 + $0x18] sm:$0xff] }
 0xce7   :  { %v14095_v2 = vadd.f32 %v4703_v1, %v3933_v61  ;;  %v4956_v61 = vld [vmem:[%s15150_s7 + $0x20] sm:$0xff]  ;;  %v4957_v1 = vld [vmem:[%s15150_s7 + $0x28] sm:$0xff] }
 0xce8   :  { %vm4727_vm10 = vcmp.ge.f32.partialorder %v14094_v0, 0.0  ;;  %v4731_v4 = vmul.f32 0.01, %v14094_v0 }
 0xce9   :  { %vm4726_vm13 = vcmp.ge.f32.partialorder %v14095_v2, 0.0  ;;  %v4730_v8 = vmul.f32 0.01, %v14095_v2  ;;  %v12964_v9 = vpop.f32.mrb[48].mxu0 }
 0xcea   :  { %v4735_v12 = vsel %vm4727_vm10, %v14094_v0, %v4731_v4  ;;  %v14096_v16 = vadd.f32 %v12964_v9, %v3936_v3  ;;  %v4713_v48 = vpop.f32.mrb[49].mxu0  ;;  %v4958_v3 = vld [vmem:[%s15150_s7 + $0x30] sm:$0xff]  ;;  %v11543_v9 = vld [vmem:[%s15150_s7 + $0x40] sm:$0xff] }
 0xceb   :  { %v4746_v17 = vmul.f32 %v11515_v6, %v4735_v12  ;;  %v4734_v20 = vsel %vm4726_vm13, %v14095_v2, %v4730_v8  ;;  %v14097_v22 = vadd.f32 %v4713_v48, %v3935_v7  ;;  %v4959_v7 = vld [vmem:[%s15150_s7 + $0x38] sm:$0xff]  ;;  %v11544_v12 = vld [vmem:[%s15150_s7 + $0x48] sm:$0xff] }
 0xcec   :  { %v4745_v23 = vmul.f32 %v11515_v6, %v4734_v20  ;;  %vm4729_vm9 = vcmp.ge.f32.partialorder %v14096_v16, 0.0  ;;  %v4733_v24 = vmul.f32 0.01, %v14096_v16  ;;  %v11546_v48 = vld [vmem:[%s15150_s7 + $0x58] sm:$0xff] }
 0xced   :  { %vm4728_vm6 = vcmp.ge.f32.partialorder %v14097_v22, 0.0  ;;  %v4732_v25 = vmul.f32 0.01, %v14097_v22  ;;  %v4757_v32 = vadd.f32 %v11516_v18, %v4746_v17  ;;  %v11547_v17 = vld [vmem:[%s15150_s7 + $0x60] sm:$0xff] }
 0xcee   :  { %v4737_v28 = vsel %vm4729_vm9, %v14096_v16, %v4733_v24  ;;  %v4756_v30 = vadd.f32 %v11516_v18, %v4745_v23  ;;  %v11545_v16 = vld [vmem:[%s15150_s7 + $0x50] sm:$0xff] }
 0xcef   :  { %v4748_v10 = vmul.f32 %v11515_v6, %v4737_v28  ;;  %v4736_v11 = vsel %vm4728_vm6, %v14097_v22, %v4732_v25  ;;  %v11548_v22 = vld [vmem:[%s15150_s7 + $0x68] sm:$0xff]  ;;  %v11549_v24 = vld [vmem:[%s15150_s7 + $0x70] sm:$0xff] }
 0xcf0   :  { %v4747_v33 = vmul.f32 %v11515_v6, %v4736_v11  ;;  %12975 = vmatprep.mubr.msk.f32.mxu1 %vm890_vm7, %v4756_v30 }
 0xcf1   :  { %12976 = vmatmul.mubr.msk.f32.vlgmr.msra.gmra.mrb[40].mxu1 %vm890_vm7, %v4757_v32  ;;  %v4759_v36 = vadd.f32 %v11516_v18, %v4748_v10  ;;  %v11569_v10 = vld [vmem:[%s15150_s7 + $0x80] sm:$0xff] }
 0xcf2   :  { %v4758_v35 = vadd.f32 %v11516_v18, %v4747_v33  ;;  %13002 = vmatpush3.msra.mxu1 %v11534_v59  ;;  %v4954_v59 = vld [vmem:[%s15150_s7 + $0x10] sm:$0xff] }
 0xcf3   :  { %13009 = vmatprep.subr.mxu1 %v11533_v34 }
 0xcf4   :  { %12978 = vmatprep.mubr.msk.f32.mxu1 %vm890_vm7, %v4758_v35 }
 0xcf5   :  { %12979 = vmatmul.mubr.msk.f32.gmra.mrb[42].mxu1 %vm890_vm7, %v4759_v36 }
 0xcf6   :  { %13003 = vmatprep.mubr.msk.f32.mxu1 %vm890_vm7, %v14483_v19 }
 0xcf9   :  { %13004 = vmatmul.mubr.msk.f32.vlgmr.msra.gmra.mrb[44].mxu1 %vm890_vm7, %v14485_v21 }
 0xcfa   :  { %13006 = vmatprep.mubr.msk.f32.mxu1 %vm890_vm7, %v14492_v26  ;;  %13010 = vmatpush3.msra.mxu1 %v11533_v34  ;;  %v11570_v34 = vld [vmem:[%s15150_s7 + $0x88] sm:$0xff] }
 0xcfb   :  { %13037 = vmatprep.subr.mxu1 %v11560_v38 }
 0xcfd   :  { %13007 = vmatmul.mubr.msk.f32.gmra.mrb[46].mxu1 %vm890_vm7, %v14494_v27 }
 0xcfe   :  { %13011 = vmatprep.mubr.msk.f32.mxu1 %vm890_vm7, %v4756_v30 }
 0xd01   :  { %13012 = vmatmul.mubr.msk.f32.vlgmr.msra.gmra.mrb[44].mxu1 %vm890_vm7, %v4757_v32 }
 0xd02   :  { %13014 = vmatprep.mubr.msk.f32.mxu1 %vm890_vm7, %v4758_v35  ;;  %13038 = vmatpush3.msra.mxu1 %v11560_v38 }
 0xd03   :  { %13045 = vmatprep.subr.mxu1 %v11559_v39 }
 0xd05   :  { %13015 = vmatmul.mubr.msk.f32.gmra.mrb[46].mxu1 %vm890_vm7, %v4759_v36 }
 0xd06   :  { %13039 = vmatprep.mubr.msk.f32.mxu1 %vm890_vm7, %v14483_v19  ;;  %v15105_v19 = vld [vmem:[%s14383_s9 + $0x40] sm:$0xff] }
 0xd09   :  { %13040 = vmatmul.mubr.msk.f32.vlgmr.msra.gmra.mrb[48].mxu1 %vm890_vm7, %v14485_v21  ;;  %v15111_v21 = vld [vmem:[%s14383_s9 + $0x48] sm:$0xff] }
 0xd0a   :  { %13042 = vmatprep.mubr.msk.f32.mxu1 %vm890_vm7, %v14492_v26  ;;  %13046 = vmatpush3.msra.mxu1 %v11559_v39  ;;  %v15114_v26 = vld [vmem:[%s14383_s9 + $0x50] sm:$0xff] }
 0xd0b   :  { %13073 = vmatprep.subr.msk.mxu1 %vm206_vm0, %v5758_v40 }
 0xd0d   :  { %13043 = vmatmul.mubr.msk.f32.gmra.mrb[50].mxu1 %vm890_vm7, %v14494_v27  ;;  %v15121_v27 = vld [vmem:[%s14383_s9 + $0x58] sm:$0xff] }
 0xd0e   :  { %13047 = vmatprep.mubr.msk.f32.mxu1 %vm890_vm7, %v4756_v30  ;;  %v11550_v30 = vld [vmem:[%s15150_s7 + $0x78] sm:$0xff] }
 0xd11   :  { %13048 = vmatmul.mubr.msk.f32.vlgmr.msra.gmra.mrb[48].mxu1 %vm890_vm7, %v4757_v32 }
 0xd12   :  { %13050 = vmatprep.mubr.msk.f32.mxu1 %vm890_vm7, %v4758_v35  ;;  %13074 = vmatpush3.msk.msra.mxu1 %vm206_vm0, %v5758_v40  ;;  %v11572_v40 = vld [vmem:[%s15150_s7 + $0x98] sm:$0xff] }
 0xd13   :  { %13145 = vmatprep.subr.msk.mxu1 %vm206_vm0, %v11624_v49 }
 0xd15   :  { %13051 = vmatmul.mubr.msk.f32.gmra.mrb[50].mxu1 %vm890_vm7, %v4759_v36  ;;  %v11571_v36 = vld [vmem:[%s15150_s7 + $0x90] sm:$0xff] }
 0xd16   :  { %13075 = vmatprep.mubr.msk.f32.mxu1 %vm181_vm1, %v15105_v19 }
 0xd19   :  { %13076 = vmatmul.mubr.msk.f32.vlgmr.msra.gmra.mrb[52].mxu1 %vm181_vm1, %v15111_v21 }
 0xd1a   :  { %13078 = vmatprep.mubr.msk.f32.mxu1 %vm181_vm1, %v15114_v26  ;;  %13146 = vmatpush3.msk.msra.mxu1 %vm206_vm0, %v11624_v49  ;;  %v11573_v49 = vld [vmem:[%s15150_s7 + $0xa0] sm:$0xff] }
 0xd1d   :  { %13079 = vmatmul.mubr.msk.f32.gmra.mrb[54].mxu1 %vm181_vm1, %v15121_v27 }
 0xd1e   :  { %13081 = vmatprep.mubr.msk.f32.mxu1 %vm181_vm1, %v15124_v41 }
 0xd21   :  { %13082 = vmatmul.mubr.msk.f32.gmra.mrb[56].mxu1 %vm181_vm1, %v15131_v42 }
 0xd22   :  { %13084 = vmatprep.mubr.msk.f32.mxu1 %vm181_vm1, %v15134_v45 }
 0xd25   :  { %13085 = vmatmul.mubr.msk.f32.gmra.mrb[58].mxu1 %vm181_vm1, %v15141_v46 }
 0xd26   :  { %13147 = vmatprep.mubr.msk.f32.mxu1 %vm181_vm1, %v15105_v19 }
 0xd29   :  { %13148 = vmatmul.mubr.msk.f32.vlgmr.msra.gmra.mrb[60].mxu1 %vm181_vm1, %v15111_v21 }
 0xd2a   :  { %13150 = vmatprep.mubr.msk.f32.mxu1 %vm181_vm1, %v15114_v26 }
 0xd2d   :  { %13151 = vmatmul.mubr.msk.f32.gmra.mrb[62].mxu1 %vm181_vm1, %v15121_v27 }
 0xd2e   :  { %13153 = vmatprep.mubr.msk.f32.mxu1 %vm181_vm1, %v15124_v41 }
 0xd31   :  { %13154 = vmatmul.mubr.msk.f32.gmra.mrb[64].mxu1 %vm181_vm1, %v15131_v42 }
 0xd32   :  { %13156 = vmatprep.mubr.msk.f32.mxu1 %vm181_vm1, %v15134_v45 }
 0xd35   :  { %13157 = vmatmul.mubr.msk.f32.gmra.mrb[66].mxu1 %vm181_vm1, %v15141_v46 }
 0xdc4   :  { %v12977_v50 = vpop.f32.mrb[40].mxu1 }
 0xdc5   :  { %v4933_v52 = vpop.f32.mrb[41].mxu1 }
 0xdc6   :  { %v13841_v53 = vpack.c.bf16 %v12977_v50, %v4933_v52 }
 0xdc8   :  { %v12980_v54 = vpop.f32.mrb[42].mxu1  ;;  %13842 = vmatprep.subr.bf16.mxu0 %v13841_v53 }
 0xdc9   :  { %v4943_v55 = vpop.f32.mrb[43].mxu1  ;;  %13844 = vmatpush3.bf16.msra.mxu0 %v13841_v53  ;;  %v11574_v53 = vld [vmem:[%s15150_s7 + $0xa8] sm:$0xff] }
 0xdca   :  { %v13845_v56 = vpack.c.bf16 %v12980_v54, %v4943_v55  ;;  %v11575_v55 = vld [vmem:[%s15150_s7 + $0xb0] sm:$0xff] }
 0xdcc   :  { %13846 = vmatprep.subr.bf16.mxu0 %v13845_v56 }
 0xdcd   :  { %13848 = vmatpush3.bf16.msra.mxu0 %v13845_v56 }
 0xdd0   :  { %12990 = vmatmul.mubr.msk.f32.vlgmr.msra.gmra.mrb[50].mxu0 %vm990_vm8, %v4953_v58 }
 0xdd1   :  { %12992 = vmatprep.mubr.msk.f32.mxu0 %vm990_vm8, %v4954_v59  ;;  %v11576_v59 = vld [vmem:[%s15150_s7 + $0xb8] sm:$0xff] }
 0xdd4   :  { %12993 = vmatmul.mubr.msk.f32.gmra.mrb[52].mxu0 %vm990_vm8, %v4955_v60  ;;  %v13013_v62 = vpop.f32.mrb[44].mxu1 }
 0xdd5   :  { %v5252_v0 = vpop.f32.mrb[45].mxu1  ;;  %12995 = vmatprep.mubr.msk.f32.mxu0 %vm990_vm8, %v4956_v61  ;;  %v5891_v61 = vld [vmem:[%s14429_s13] sm:$0xff] }
 0xdd6   :  { %v13849_v2 = vpack.c.bf16 %v13013_v62, %v5252_v0  ;;  %v11606_v62 = vld [vmem:[%s14378_s6 + $0x4] sm:$0x7]  ;;  %v5892_v0 = vld [vmem:[%s14429_s13 + $0x8] sm:$0xff]  ;;  %s14368_s6 = smov 31  }
 0xdd7   :  { %s15257_s18 = sld [smem:[%s15801_s0 + %s14368_s6]]  }
 0xdd8   :  { %12996 = vmatmul.mubr.msk.f32.gmra.mrb[54].mxu0 %vm990_vm8, %v4957_v1  ;;  %v13016_v4 = vpop.f32.mrb[46].mxu1  ;;  %13850 = vmatprep.subr.bf16.mxu0 %v13849_v2  ;;  %v5893_v1 = vld [vmem:[%s14429_s13 + $0x10] sm:$0xff]  ;;  %s15846_s0 = sld [smem:[#allocation2_spill]] }
 0xdd9   :  { %v5262_v6 = vpop.f32.mrb[47].mxu1  ;;  %13852 = vmatpush3.bf16.msra.mxu0 %v13849_v2  ;;  %12998 = vmatprep.mubr.msk.f32.mxu0 %vm990_vm8, %v4958_v3  ;;  %v5894_v2 = vld [vmem:[%s14429_s13 + $0x18] sm:$0xff] }
 0xdda   :  { %v13853_v8 = vpack.c.bf16 %v13016_v4, %v5262_v6  ;;  %v11616_v4 = vld [vmem:[%s14429_s13 + $0x20] sm:$0xff] }
 0xddc   :  { %12999 = vmatmul.mubr.msk.f32.gmra.mrb[56].mxu0 %vm990_vm8, %v4959_v7  ;;  %13854 = vmatprep.subr.bf16.mxu0 %v13853_v8 }
 0xddd   :  { %13856 = vmatpush3.bf16.msra.mxu0 %v13853_v8  ;;  %13025 = vmatprep.mubr.msk.f32.mxu0 %vm990_vm8, %v11543_v9 }
 0xde0   :  { %13026 = vmatmul.mubr.msk.f32.vlgmr.msra.gmra.mrb[50].mxu0 %vm990_vm8, %v11544_v12  ;;  %v4760_v12 = vld [vmem:[%s15257_s18] sm:$0xff] }
 0xde1   :  { %13028 = vmatprep.mubr.msk.f32.mxu0 %vm990_vm8, %v11545_v16 }
 0xde4   :  { %13029 = vmatmul.mubr.msk.f32.gmra.mrb[52].mxu0 %vm990_vm8, %v11546_v48  ;;  %v13049_v18 = vpop.f32.mrb[48].mxu1 }
 0xde5   :  { %v5572_v20 = vpop.f32.mrb[49].mxu1  ;;  %13031 = vmatprep.mubr.msk.f32.mxu0 %vm990_vm8, %v11547_v17 }
 0xde6   :  { %v13857_v23 = vpack.c.bf16 %v13049_v18, %v5572_v20  ;;  %v4763_v20 = vld [vmem:[%s15257_s18 + $0x18] sm:$0xff] }
 0xde8   :  { %13032 = vmatmul.mubr.msk.f32.gmra.mrb[54].mxu0 %vm990_vm8, %v11548_v22  ;;  %v13052_v25 = vpop.f32.mrb[50].mxu1  ;;  %13858 = vmatprep.subr.bf16.mxu0 %v13857_v23  ;;  %v4762_v22 = vld [vmem:[%s15257_s18 + $0x10] sm:$0xff] }
 0xde9   :  { %v5582_v28 = vpop.f32.mrb[51].mxu1  ;;  %13860 = vmatpush3.bf16.msra.mxu0 %v13857_v23  ;;  %13034 = vmatprep.mubr.msk.f32.mxu0 %vm990_vm8, %v11549_v24 }
 0xdea   :  { %v13861_v32 = vpack.c.bf16 %v13052_v25, %v5582_v28 }
 0xdec   :  { %13035 = vmatmul.mubr.msk.f32.gmra.mrb[56].mxu0 %vm990_vm8, %v11550_v30  ;;  %13862 = vmatprep.subr.bf16.mxu0 %v13861_v32  ;;  %v13077_v11 = vpop.f32.mrb[52].mxu1  ;;  %v4765_v30 = vld [vmem:[%s15257_s18 + $0x28] sm:$0xff] }
 0xded   :  { %13864 = vmatpush3.bf16.msra.mxu0 %v13861_v32  ;;  %v5852_v33 = vpop.f32.mrb[53].mxu1  ;;  %13061 = vmatprep.mubr.msk.f32.mxu0 %vm990_vm8, %v11569_v10  ;;  %v4764_v32 = vld [vmem:[%s15257_s18 + $0x20] sm:$0xff] }
 0xdee   :  { %v13865_v35 = vpack.c.bf16 %v13077_v11, %v5852_v33 }
 0xdf0   :  { %13062 = vmatmul.mubr.msk.f32.vlgmr.msra.gmra.mrb[50].mxu0 %vm990_vm8, %v11570_v34  ;;  %v13080_v38 = vpop.f32.mrb[54].mxu1  ;;  %13866 = vmatprep.subr.bf16.mxu0 %v13865_v35 }
 0xdf1   :  { %v5862_v39 = vpop.f32.mrb[55].mxu1  ;;  %13868 = vmatpush3.bf16.msra.mxu0 %v13865_v35  ;;  %13064 = vmatprep.mubr.msk.f32.mxu0 %vm990_vm8, %v11571_v36  ;;  %v4767_v35 = vld [vmem:[%s15257_s18 + $0x38] sm:$0xff]  ;;  %v4766_v36 = vld [vmem:[%s15257_s18 + $0x30] sm:$0xff] }
 0xdf2   :  { %v13869_v47 = vpack.c.bf16 %v13080_v38, %v5862_v39 }
 0xdf4   :  { %13065 = vmatmul.mubr.msk.f32.gmra.mrb[52].mxu0 %vm990_vm8, %v11572_v40  ;;  %v13083_v50 = vpop.f32.mrb[56].mxu1  ;;  %13870 = vmatprep.subr.bf16.mxu0 %v13869_v47 }
 0xdf5   :  { %v5872_v52 = vpop.f32.mrb[57].mxu1  ;;  %13872 = vmatpush3.bf16.msra.mxu0 %v13869_v47  ;;  %13067 = vmatprep.mubr.msk.f32.mxu0 %vm990_vm8, %v11573_v49 }
 0xdf6   :  { %v13873_v54 = vpack.c.bf16 %v13083_v50, %v5872_v52 }
 0xdf8   :  { %13068 = vmatmul.mubr.msk.f32.gmra.mrb[54].mxu0 %vm990_vm8, %v11574_v53  ;;  %v13086_v56 = vpop.f32.mrb[58].mxu1  ;;  %13874 = vmatprep.subr.bf16.mxu0 %v13873_v54 }
 0xdf9   :  { %v5882_v58 = vpop.f32.mrb[59].mxu1  ;;  %13876 = vmatpush3.bf16.msra.mxu0 %v13873_v54  ;;  %13070 = vmatprep.mubr.msk.f32.mxu0 %vm990_vm8, %v11575_v55 }
 0xdfa   :  { %v13877_v60 = vpack.c.bf16 %v13086_v56, %v5882_v58 }
 0xdfc   :  { %13071 = vmatmul.mubr.msk.f32.gmra.mrb[56].mxu0 %vm990_vm8, %v11576_v59  ;;  %13878 = vmatprep.subr.bf16.mxu0 %v13877_v60 }
 0xdfd   :  { %13880 = vmatpush3.bf16.msra.mxu0 %v13877_v60  ;;  %13103 = vmatprep.mubr.msk.f32.mxu0 %vm319_vm2, %v5891_v61 }
 0xdfe   :  { %13109 = vmatprep.subr.msk.mxu0 %vm206_vm0, %v11606_v62 }
 0xe00   :  { %13104 = vmatmul.mubr.msk.f32.vlgmr.msra.gmra.mrb[58].mxu0 %vm319_vm2, %v5892_v0  ;;  %v11617_v0 = vld [vmem:[%s14429_s13 + $0x28] sm:$0xff] }
 0xe01   :  { %13106 = vmatprep.mubr.msk.f32.mxu0 %vm319_vm2, %v5893_v1  ;;  %13110 = vmatpush3.msk.msra.mxu0 %vm206_vm0, %v11606_v62  ;;  %v11618_v1 = vld [vmem:[%s14429_s13 + $0x30] sm:$0xff] }
 0xe04   :  { %13107 = vmatmul.mubr.msk.f32.gmra.mrb[60].mxu0 %vm319_vm2, %v5894_v2  ;;  %v11619_v2 = vld [vmem:[%s14429_s13 + $0x38] sm:$0xff] }
 0xe05   :  { %13111 = vmatprep.mubr.msk.f32.mxu0 %vm181_vm1, %v15105_v19  ;;  %v13149_v19 = vpop.f32.mrb[60].mxu1 }
 0xe08   :  { %13112 = vmatmul.mubr.msk.f32.vlgmr.msra.gmra.mrb[62].mxu0 %vm181_vm1, %v15111_v21  ;;  %v6280_v21 = vpop.f32.mrb[61].mxu1 }
 0xe09   :  { %13114 = vmatprep.mubr.msk.f32.mxu0 %vm181_vm1, %v15114_v26  ;;  %v15244_v3 = vpack.c.bf16 %v13149_v19, %v6280_v21  ;;  %v13152_v26 = vpop.f32.mrb[62].mxu1  ;;  %v11634_v19 = vld [vmem:[%s14429_s13 + $0x40] sm:$0xff]  ;;  %v11635_v21 = vld [vmem:[%s14429_s13 + $0x48] sm:$0xff] }
 0xe0a   :  { %v6290_v6 = vpop.f32.mrb[63].mxu1 }
 0xe0c   :  { %13115 = vmatmul.mubr.msk.f32.gmra.mrb[64].mxu0 %vm181_vm1, %v15121_v27  ;;  %v15248_v27 = vpack.c.bf16 %v13152_v26, %v6290_v6  ;;  %v11637_v26 = vld [vmem:[%s14429_s13 + $0x58] sm:$0xff]  ;;  %v11659_v6 = vld [vmem:[%s14458_s17 + $0x10] sm:$0xff] }
 0xe0d   :  { %13117 = vmatprep.mubr.msk.f32.mxu0 %vm181_vm1, %v15124_v41  ;;  %v13155_v41 = vpop.f32.mrb[64].mxu1 }
 0xe0e   :  { %v6300_v7 = vpop.f32.mrb[65].mxu1 }
 0xe0f   :  { %v13158_v8 = vpop.f32.mrb[66].mxu1 }
 0xe10   :  { %13118 = vmatmul.mubr.msk.f32.gmra.mrb[66].mxu0 %vm181_vm1, %v15131_v42  ;;  %v15250_v42 = vpack.c.bf16 %v13155_v41, %v6300_v7  ;;  %v5754_v41 = vld [vmem:[%s14465_s21] sm:$0xff] }
 0xe11   :  { %13120 = vmatprep.mubr.msk.f32.mxu0 %vm181_vm1, %v15134_v45  ;;  %v6310_v45 = vpop.f32.mrb[67].mxu1 }
 0xe12   :  { %v15252_v9 = vpack.c.bf16 %v13158_v8, %v6310_v45 }
 0xe14   :  { %13121 = vmatmul.mubr.msk.f32.gmra.mrb[68].mxu0 %vm181_vm1, %v15141_v46  ;;  %v4761_v46 = vld [vmem:[%s15257_s18 + $0x8] sm:$0xff] }
 0xe15   :  { %13139 = vmatprep.mubr.msk.f32.mxu0 %vm319_vm2, %v11616_v4  ;;  %v6460_v4 = vld [vmem:[%s14458_s17] sm:$0xff] }
 0xe16   :  { %13181 = vmatprep.subr.mxu1 %v6460_v4 }
 0xe17   :  { %13182 = vmatpush3.msra.mxu1 %v6460_v4 }
 0xec3   :  { %v13063_v16 = vpop.f32.mrb[50].mxu0 }
 0xec4   :  { %v14098_v48 = vadd.f32 %v13063_v16, %v4761_v46  ;;  %v5690_v17 = vpop.f32.mrb[51].mxu0  ;;  %v5756_v16 = vld [vmem:[%s14465_s21 + $0x10] sm:$0xff] }
 0xec5   :  { %v14099_v18 = vadd.f32 %v5690_v17, %v4760_v12  ;;  %v11642_v12 = vld [vmem:[%s14470_s25] ss:$0 sm:$0xff]  ;;  %s15853_s25 = sld [smem:[#allocation6_spill]] }
 0xec6   :  { %5738 = vst.msk [vmem:[%s15262_s2 + $0x8] sm:$0xff] %vm181_vm1, %v14098_v48 }
 0xec7   :  { %5737 = vst.msk [vmem:[%s15262_s2] sm:$0xff] %vm181_vm1, %v14099_v18  ;;  %v13066_v23 = vpop.f32.mrb[52].mxu0 }
 0xec8   :  { %v14100_v24 = vadd.f32 %v13066_v23, %v4763_v20  ;;  %v5700_v25 = vpop.f32.mrb[53].mxu0 }
 0xec9   :  { %v14101_v28 = vadd.f32 %v5700_v25, %v4762_v22 }
 0xeca   :  { %5740 = vst.msk [vmem:[%s15262_s2 + $0x18] sm:$0xff] %vm181_vm1, %v14100_v24  ;;  %v11643_v24 = vld [vmem:[%s14475_s29] ss:$0 sm:$0xff]  ;;  %s15854_s29 = sld [smem:[#allocation7_spill]] }
 0xecb   :  { %5739 = vst.msk [vmem:[%s15262_s2 + $0x10] sm:$0xff] %vm181_vm1, %v14101_v28  ;;  %v13069_v10 = vpop.f32.mrb[54].mxu0 }
 0xecc   :  { %v14102_v11 = vadd.f32 %v13069_v10, %v4765_v30  ;;  %v5710_v33 = vpop.f32.mrb[55].mxu0 }
 0xecd   :  { %v14103_v34 = vadd.f32 %v5710_v33, %v4764_v32 }
 0xece   :  { %5742 = vst.msk [vmem:[%s15262_s2 + $0x28] sm:$0xff] %vm181_vm1, %v14102_v11 }
 0xecf   :  { %5741 = vst.msk [vmem:[%s15262_s2 + $0x20] sm:$0xff] %vm181_vm1, %v14103_v34  ;;  %v13072_v38 = vpop.f32.mrb[56].mxu0 }
 0xed0   :  { %v14104_v39 = vadd.f32 %v13072_v38, %v4767_v35  ;;  %v5720_v40 = vpop.f32.mrb[57].mxu0 }
 0xed1   :  { %v14105_v47 = vadd.f32 %v5720_v40, %v4766_v36 }
 0xed2   :  { %5744 = vst.msk [vmem:[%s15262_s2 + $0x38] sm:$0xff] %vm181_vm1, %v14104_v39 }
 0xed3   :  { %5743 = vst.msk [vmem:[%s15262_s2 + $0x30] sm:$0xff] %vm181_vm1, %v14105_v47  ;;  %v6558_v47 = vld [vmem:[%s14519_s3] sm:$0xff] }
 0xedb   :  { %v13113_v49 = vpop.f32.mrb[62].mxu0 }
 0xedc   :  { %v6066_v50 = vpop.f32.mrb[63].mxu0 }
 0xedd   :  { %v13881_v52 = vpack.c.bf16 %v13113_v49, %v6066_v50 }
 0xedf   :  { %v13116_v53 = vpop.f32.mrb[64].mxu0  ;;  %13882 = vmatprep.subr.bf16.mxu0 %v13881_v52 }
 0xee0   :  { %v6076_v54 = vpop.f32.mrb[65].mxu0  ;;  %13884 = vmatpush3.bf16.msra.mxu0 %v13881_v52 }
 0xee1   :  { %v13885_v55 = vpack.c.bf16 %v13116_v53, %v6076_v54 }
 0xee3   :  { %v13119_v56 = vpop.f32.mrb[66].mxu0  ;;  %13886 = vmatprep.subr.bf16.mxu0 %v13885_v55 }
 0xee4   :  { %v6086_v58 = vpop.f32.mrb[67].mxu0  ;;  %13888 = vmatpush3.bf16.msra.mxu0 %v13885_v55 }
 0xee5   :  { %v13889_v59 = vpack.c.bf16 %v13119_v56, %v6086_v58 }
 0xee7   :  { %v13122_v60 = vpop.f32.mrb[68].mxu0  ;;  %13890 = vmatprep.subr.bf16.mxu0 %v13889_v59 }
 0xee8   :  { %v6096_v61 = vpop.f32.mrb[69].mxu0  ;;  %13892 = vmatpush3.bf16.msra.mxu0 %v13889_v59 }
 0xee9   :  { %v13893_v62 = vpack.c.bf16 %v13122_v60, %v6096_v61 }
 0xeeb   :  { %13894 = vmatprep.subr.bf16.mxu0 %v13893_v62 }
 0xeec   :  { %13896 = vmatpush3.bf16.msra.mxu0 %v13893_v62 }
 0xeed   :  { %13898 = vmatprep.subr.bf16.mxu0 %v15244_v3 }
 0xeef   :  { %13140 = vmatmul.mubr.msk.f32.vlgmr.msra.gmra.mrb[58].mxu0 %vm319_vm2, %v11617_v0  ;;  %v11650_v0 = vld [vmem:[%s14458_s17 + $0x8] sm:$0xff]  ;;  %s15851_s17 = sld [smem:[#allocation4_spill]] }
 0xef0   :  { %13900 = vmatpush3.bf16.msra.mxu0 %v15244_v3  ;;  %13142 = vmatprep.mubr.msk.f32.mxu0 %vm319_vm2, %v11618_v1  ;;  %v11636_v3 = vld [vmem:[%s14429_s13 + $0x50] sm:$0xff]  ;;  %v6559_v1 = vld [vmem:[%s14519_s3 + $0x8] sm:$0xff]  ;;  %s15850_s13 = sld [smem:[#allocation3_spill]] }
 0xef1   :  { %13902 = vmatprep.subr.bf16.mxu0 %v15248_v27 }
 0xef3   :  { %13143 = vmatmul.mubr.msk.f32.gmra.mrb[60].mxu0 %vm319_vm2, %v11619_v2  ;;  %v11655_v2 = vld [vmem:[%s14519_s3 + $0x10] sm:$0xff] }
 0xef4   :  { %13904 = vmatpush3.bf16.msra.mxu0 %v15248_v27  ;;  %13175 = vmatprep.mubr.msk.f32.mxu0 %vm319_vm2, %v11634_v19  ;;  %v5755_v27 = vld [vmem:[%s14465_s21 + $0x8] sm:$0xff] }
 0xef5   :  { %13906 = vmatprep.subr.bf16.mxu0 %v15250_v42 }
 0xef8   :  { %13908 = vmatpush3.bf16.msra.mxu0 %v15250_v42 }
 0xef9   :  { %13910 = vmatprep.subr.bf16.mxu0 %v15252_v9 }
 0xefc   :  { %13912 = vmatpush3.bf16.msra.mxu0 %v15252_v9  ;;  %v5757_v9 = vld [vmem:[%s14465_s21 + $0x18] sm:$0xff]  ;;  %s15852_s21 = sld [smem:[#allocation5_spill]] }
 0xefd   :  { %13219 = vmatprep.subr.mxu0 %v11659_v6 }
 0xeff   :  { %13176 = vmatmul.mubr.msk.f32.vlgmr.msra.gmra.mrb[58].mxu0 %vm319_vm2, %v11635_v21 }
 0xf00   :  { %13178 = vmatprep.mubr.msk.f32.mxu0 %vm319_vm2, %v11636_v3  ;;  %13220 = vmatpush3.msra.mxu0 %v11659_v6 }
 0xf03   :  { %13179 = vmatmul.mubr.msk.f32.gmra.mrb[60].mxu0 %vm319_vm2, %v11637_v26 }
 0xfd2   :  { %v13177_v7 = vpop.f32.mrb[58].mxu0 }
 0xfd3   :  { %v14106_v42 = vadd.f32 %v13177_v7, %v5755_v27  ;;  %v6401_v8 = vpop.f32.mrb[59].mxu0  ;;  %v11656_v27 = vld [vmem:[%s14519_s3 + $0x18] sm:$0xff]  ;;  %v11665_v7 = vld [vmem:[%s14519_s3 + $0x28] sm:$0xff] }
 0xfd4   :  { %v14107_v45 = vadd.f32 %v6401_v8, %v5754_v41  ;;  %v11664_v41 = vld [vmem:[%s14519_s3 + $0x20] sm:$0xff]  ;;  %v7011_v8 = vld [vmem:[%s14536_s8 + $0x8] sm:$0xff]  ;;  %s15855_s3 = sld [smem:[#allocation8_spill]] }
 0xfd5   :  { %vm6425_vm0 = vcmp.ge.f32.partialorder %v14106_v42, 0.0  ;;  %v6429_v46 = vmul.f32 0.01, %v14106_v42 }
 0xfd6   :  { %vm6424_vm2 = vcmp.ge.f32.partialorder %v14107_v45, 0.0  ;;  %v6428_v48 = vmul.f32 0.01, %v14107_v45  ;;  %v13180_v17 = vpop.f32.mrb[60].mxu0 }
 0xfd7   :  { %v6433_v18 = vsel %vm6425_vm0, %v14106_v42, %v6429_v46  ;;  %v14108_v20 = vadd.f32 %v13180_v17, %v5757_v9  ;;  %v6411_v22 = vpop.f32.mrb[61].mxu0  ;;  %v7010_v42 = vld [vmem:[%s14536_s8] sm:$0xff]  ;;  %v11674_v46 = vld [vmem:[%s14536_s8 + $0x18] sm:$0xff] }
 0xfd8   :  { %v6444_v23 = vmul.f32 %v11642_v12, %v6433_v18  ;;  %v6432_v25 = vsel %vm6424_vm2, %v14107_v45, %v6428_v48  ;;  %v14109_v28 = vadd.f32 %v6411_v22, %v5756_v16  ;;  %v11673_v45 = vld [vmem:[%s14536_s8 + $0x10] sm:$0xff]  ;;  %v13937_v9 = vpack.c.bf16 %v7011_v8, %v7010_v42  ;;  %v11679_v16 = vld [vmem:[%s14536_s8 + $0x20] sm:$0xff]  ;;  %v11680_v48 = vld [vmem:[%s14536_s8 + $0x28] sm:$0xff]  ;;  %s15856_s8 = sld [smem:[#allocation9_spill]] }
 0xfd9   :  { %v6443_v30 = vmul.f32 %v11642_v12, %v6432_v25  ;;  %vm6427_vm6 = vcmp.ge.f32.partialorder %v14108_v20, 0.0  ;;  %v6431_v32 = vmul.f32 0.01, %v14108_v20  ;;  %v13951_v17 = vpack.c.bf16 %v11680_v48, %v11679_v16  ;;  %v6459_v18 = vld [vmem:[%s14545_s14 + $0x8] sm:$0xff]  ;;  %v11685_v42 = vld [vmem:[%s14624_s20] ss:$0 sm:$0xff] }
 0xfda   :  { %vm6426_vm9 = vcmp.ge.f32.partialorder %v14109_v28, 0.0  ;;  %v6430_v10 = vmul.f32 0.01, %v14109_v28  ;;  %v15320_v34 = vadd.f32 %v11643_v24, %v6444_v23  ;;  %13938 = vmatprep.subr.bf16.mxu0 %v13937_v9  ;;  %s15863_s20 = sld [smem:[#allocation16_spill]] }
 0xfdb   :  { %v15318_v11 = vadd.f32 %v11643_v24, %v6443_v30  ;;  %v6435_v33 = vsel %vm6427_vm6, %v14108_v20, %v6431_v32  ;;  %v6458_v20 = vld [vmem:[%s14545_s14] sm:$0xff]  ;;  %s15857_s14 = sld [smem:[#allocation10_spill]] }
 0xfdc   :  { %v6446_v35 = vmul.f32 %v11642_v12, %v6435_v33  ;;  %v6434_v36 = vsel %vm6426_vm9, %v14109_v28, %v6430_v10  ;;  %v11668_v30 = vld [vmem:[%s14550_s19] ss:$0 sm:$0xff]  ;;  %s15858_s19 = sld [smem:[#allocation11_spill]] }
 0xfdd   :  { %v6445_v38 = vmul.f32 %v11642_v12, %v6434_v36  ;;  %13183 = vmatprep.mubr.msk.f32.mxu1 %vm890_vm7, %v15318_v11  ;;  %13221 = vmatprep.mubr.msk.f32.mxu0 %vm890_vm7, %v15318_v11  ;;  %v13944_v12 = vpack.c.bf16 %v11674_v46, %v11673_v45  ;;  %v11686_v45 = vld [vmem:[%s15846_s0] ss:$0 sm:$0xff] }
 0xfde   :  { %13184 = vmatmul.mubr.msk.f32.vlgmr.msra.gmra.mrb[68].mxu1 %vm890_vm7, %v15320_v34  ;;  %13222 = vmatmul.mubr.msk.f32.vlgmr.msra.gmra.mrb[70].mxu0 %vm890_vm7, %v15320_v34  ;;  %v15332_v40 = vadd.f32 %v11643_v24, %v6446_v35  ;;  %v11669_v35 = vld [vmem:[%s14555_s24] ss:$0 sm:$0xff]  ;;  %s15859_s24 = sld [smem:[#allocation12_spill]] }
 0xfdf   :  { %v15330_v39 = vadd.f32 %v11643_v24, %v6445_v38  ;;  %13940 = vmatpush3.bf16.msra.mxu0 %v13937_v9 }
 0xfe0   :  { %13941 = vmatprep.subr.bf16.mxu0 %v14338_v13 }
 0xfe1   :  { %13186 = vmatprep.mubr.msk.f32.mxu1 %vm890_vm7, %v15330_v39  ;;  %13224 = vmatprep.mubr.msk.f32.mxu0 %vm890_vm7, %v15330_v39 }
 0xfe2   :  { %13187 = vmatmul.mubr.msk.f32.gmra.mrb[70].mxu1 %vm890_vm7, %v15332_v40  ;;  %13225 = vmatmul.mubr.msk.f32.gmra.mrb[72].mxu0 %vm890_vm7, %v15332_v40 }
 0xfe3   :  { %13197 = vmatprep.mubr.msk.f32.mxu1 %vm990_vm8, %v6558_v47 }
0x10b1   :  { %v13185_v49 = vpop.f32.mrb[68].mxu1  ;;  %v13223_v50 = vpop.f32.mrb[70].mxu0 }
0x10b2   :  { %v6539_v52 = vpop.f32.mrb[69].mxu1  ;;  %v6881_v53 = vpop.f32.mrb[71].mxu0 }
0x10b3   :  { %v13913_v54 = vpack.c.bf16 %v13185_v49, %v6539_v52  ;;  %v13929_v55 = vpack.c.bf16 %v13223_v50, %v6881_v53 }
0x10b5   :  { %v13188_v56 = vpop.f32.mrb[70].mxu1  ;;  %13914 = vmatprep.subr.bf16.mxu1 %v13913_v54  ;;  %v13226_v58 = vpop.f32.mrb[72].mxu0 }
0x10b6   :  { %v6549_v59 = vpop.f32.mrb[71].mxu1  ;;  %13916 = vmatpush3.bf16.msra.mxu1 %v13913_v54  ;;  %v6891_v60 = vpop.f32.mrb[73].mxu0 }
0x10b7   :  { %v13917_v61 = vpack.c.bf16 %v13188_v56, %v6549_v59  ;;  %v13933_v62 = vpack.c.bf16 %v13226_v58, %v6891_v60  ;;  %v7093_v59 = vld [vmem:[%s14588_s30] sm:$0xff] }
0x10b9   :  { %13918 = vmatprep.subr.bf16.mxu1 %v13917_v61 }
0x10ba   :  { %13920 = vmatpush3.bf16.msra.mxu1 %v13917_v61 }
0x10bb   :  { %13200 = vmatprep.subr.mxu1 %v11650_v0 }
0x10bd   :  { %13198 = vmatmul.mubr.msk.f32.vlgmr.msra.gmra.mrb[72].mxu1 %vm990_vm8, %v6559_v1  ;;  %v7500_v1 = vld [vmem:[%s14608_s5] sm:$0xff] }
0x10be   :  { %13202 = vmatprep.mubr.msk.f32.mxu1 %vm890_vm7, %v15318_v11  ;;  %13201 = vmatpush3.msra.mxu1 %v11650_v0  ;;  %v11683_v0 = vld [vmem:[%s14588_s30 + $0x10] sm:$0xff] }
0x10c1   :  { %13203 = vmatmul.mubr.msk.f32.vlgmr.msra.gmra.mrb[74].mxu1 %vm890_vm7, %v15320_v34 }
0x10c2   :  { %13205 = vmatprep.mubr.msk.f32.mxu1 %vm890_vm7, %v15330_v39 }
0x10c5   :  { %13206 = vmatmul.mubr.msk.f32.gmra.mrb[76].mxu1 %vm890_vm7, %v15332_v40 }
0x10c6   :  { %13216 = vmatprep.mubr.msk.f32.mxu1 %vm990_vm8, %v11655_v2  ;;  %v7501_v2 = vld [vmem:[%s14608_s5 + $0x8] sm:$0xff] }
0x1194   :  { %v13204_v19 = vpop.f32.mrb[74].mxu1 }
0x1195   :  { %v6710_v21 = vpop.f32.mrb[75].mxu1 }
0x1196   :  { %v13921_v3 = vpack.c.bf16 %v13204_v19, %v6710_v21  ;;  %v7502_v19 = vld [vmem:[%s14608_s5 + $0x10] sm:$0xff]  ;;  %v13959_v21 = vpack.c.bf16 %v7501_v2, %v7500_v1 }
0x1198   :  { %v13207_v26 = vpop.f32.mrb[76].mxu1  ;;  %13922 = vmatprep.subr.bf16.mxu1 %v13921_v3 }
0x1199   :  { %v6720_v4 = vpop.f32.mrb[77].mxu1  ;;  %13924 = vmatpush3.bf16.msra.mxu1 %v13921_v3  ;;  %v7503_v3 = vld [vmem:[%s14608_s5 + $0x18] sm:$0xff] }
0x119a   :  { %v13925_v6 = vpack.c.bf16 %v13207_v26, %v6720_v4  ;;  %v13962_v26 = vpack.c.bf16 %v7503_v3, %v7502_v19  ;;  %v7009_v4 = vld [vmem:[%s14619_s12] sm:$0xff]  ;;  %v11695_v3 = vld [vmem:[%s14608_s5 + $0x50] sm:$0xff]  ;;  %s15862_s12 = sld [smem:[#allocation15_spill]] }
0x119c   :  { %13926 = vmatprep.subr.bf16.mxu1 %v13925_v6 }
0x119d   :  { %13928 = vmatpush3.bf16.msra.mxu1 %v13925_v6 }
0x119e   :  { %13930 = vmatprep.subr.bf16.mxu1 %v13929_v55 }
0x11a0   :  { %13217 = vmatmul.mubr.msk.f32.vlgmr.msra.gmra.mrb[72].mxu1 %vm990_vm8, %v11656_v27 }
0x11a1   :  { %13932 = vmatpush3.bf16.msra.mxu1 %v13929_v55  ;;  %13235 = vmatprep.mubr.msk.f32.mxu1 %vm990_vm8, %v11664_v41 }
0x11a2   :  { %13934 = vmatprep.subr.bf16.mxu1 %v13933_v62 }
0x11a5   :  { %13936 = vmatpush3.bf16.msra.mxu1 %v13933_v62  ;;  %v11677_v62 = vld [vmem:[%s14588_s30 + $0x8] sm:$0xff]  ;;  %s15860_s30 = sld [smem:[#allocation13_spill]] }
0x11a6   :  { %13945 = vmatprep.subr.bf16.mxu1 %v13944_v12 }
0x11a8   :  { %13236 = vmatmul.mubr.msk.f32.vlgmr.msra.gmra.mrb[72].mxu1 %vm990_vm8, %v11665_v7 }
0x11a9   :  { %13947 = vmatpush3.bf16.msra.mxu1 %v13944_v12 }
0x11aa   :  { %13952 = vmatprep.subr.bf16.mxu1 %v13951_v17 }
0x127b   :  { %v13237_v22 = vpop.f32.mrb[72].mxu1 }
0x127c   :  { %v14110_v23 = vadd.f32 %v13237_v22, %v6459_v18  ;;  %v6974_v24 = vpop.f32.mrb[73].mxu1 }
0x127d   :  { %v14111_v25 = vadd.f32 %v6974_v24, %v6458_v20 }
0x127e   :  { %vm6986_vm10 = vcmp.ge.f32.partialorder %v14110_v23, 0.0  ;;  %v6988_v28 = vmul.f32 0.01, %v14110_v23 }
0x127f   :  { %vm6985_vm13 = vcmp.ge.f32.partialorder %v14111_v25, 0.0  ;;  %v6987_v32 = vmul.f32 0.01, %v14111_v25 }
0x1280   :  { %v6990_v10 = vsel %vm6986_vm10, %v14110_v23, %v6988_v28 }
0x1281   :  { %v6999_v33 = vmul.f32 %v11668_v30, %v6990_v10  ;;  %v6989_v36 = vsel %vm6985_vm13, %v14111_v25, %v6987_v32  ;;  %v11688_v32 = vld [vmem:[%s14608_s5 + $0x20] sm:$0xff]  ;;  %v11689_v10 = vld [vmem:[%s14608_s5 + $0x28] sm:$0xff] }
0x1282   :  { %v6998_v38 = vmul.f32 %v11668_v30, %v6989_v36 }
0x1283   :  { %v15376_v49 = vadd.f32 %v11669_v35, %v6999_v33 }
0x1284   :  { %v15374_v47 = vadd.f32 %v11669_v35, %v6998_v38 }
0x1286   :  { %13242 = vmatprep.mubr.msk.f32.mxu0 %vm1447_vm11, %v15374_v47  ;;  %13256 = vmatprep.mubr.msk.f32.mxu1 %vm1447_vm11, %v15374_v47 }
0x1287   :  { %13243 = vmatmul.mubr.msk.f32.vlgmr.msra.gmra.mrb[74].mxu0 %vm1447_vm11, %v15376_v49  ;;  %13257 = vmatmul.mubr.msk.f32.vlgmr.msra.gmra.mrb[78].mxu1 %vm1447_vm11, %v15376_v49 }
0x1288   :  { %13954 = vmatpush3.bf16.msra.mxu1 %v13951_v17  ;;  %13270 = vmatprep.mubr.msk.f32.mxu1 %vm1447_vm11, %v15374_v47 }
0x1289   :  { %13249 = vmatprep.mubr.msk.f32.mxu0 %vm14339_vm12, %v14340_v14  ;;  %13958 = vmatprep.subr.bf16.mxu1 %v14338_v13 }
0x128b   :  { %13271 = vmatmul.mubr.msk.f32.vlgmr.msra.gmra.mrb[80].mxu1 %vm1447_vm11, %v15376_v49 }
0x128c   :  { %13288 = vmatprep.mubr.msk.f32.mxu1 %vm14339_vm12, %v14340_v14  ;;  %13960 = vmatpush3.bf16.msra.mxu1 %v13959_v21 }
0x128d   :  { %13961 = vmatprep.subr.bf16.mxu1 %v14338_v13 }
0x1290   :  { %13963 = vmatpush3.bf16.msra.mxu1 %v13962_v26  ;;  %v11696_v26 = vld [vmem:[%s14608_s5 + $0x58] sm:$0xff] }
0x1291   :  { %13964 = vmatprep.subr.bf16.mxu1 %v14338_v13 }
0x135a   :  { %v13244_v50 = vpop.f32.mrb[74].mxu0  ;;  %v13258_v52 = vpop.f32.mrb[78].mxu1 }
0x135b   :  { %v7084_v53 = vpop.f32.mrb[75].mxu0  ;;  %v7236_v54 = vpop.f32.mrb[79].mxu1 }
0x135c   :  { %v13942_v55 = vpack.c.bf16 %v13244_v50, %v7084_v53  ;;  %v13949_v56 = vpack.c.bf16 %v13258_v52, %v7236_v54  ;;  %v13965_v50 = vpack.c.bf16 %v11689_v10, %v11688_v32  ;;  %v11690_v53 = vld [vmem:[%s14608_s5 + $0x30] sm:$0xff]  ;;  %v11691_v54 = vld [vmem:[%s14608_s5 + $0x38] sm:$0xff] }
0x135e   :  { %13943 = vmatpush3.bf16.msra.mxu0 %v13942_v55  ;;  %v13272_v58 = vpop.f32.mrb[80].mxu1 }
0x135f   :  { %v7388_v60 = vpop.f32.mrb[81].mxu1  ;;  %13948 = vmatprep.subr.bf16.mxu0 %v14338_v13 }
0x1360   :  { %v13956_v61 = vpack.c.bf16 %v13272_v58, %v7388_v60 }
0x1361   :  { %13250 = vmatmul.mubr.msk.f32.vlgmr.msra.gmra.mrb[76].mxu0 %vm1447_vm11, %v7093_v59  ;;  %v13968_v59 = vpack.c.bf16 %v11691_v54, %v11690_v53 }
0x1362   :  { %13950 = vmatpush3.bf16.msra.mxu0 %v13949_v56  ;;  %13263 = vmatprep.mubr.msk.f32.mxu0 %vm14339_vm12, %v14340_v14 }
0x1363   :  { %13955 = vmatprep.subr.bf16.mxu0 %v14338_v13 }
0x1369   :  { %13264 = vmatmul.mubr.msk.f32.vlgmr.msra.gmra.mrb[76].mxu0 %vm1447_vm11, %v11677_v62  ;;  %v11694_v62 = vld [vmem:[%s14608_s5 + $0x48] sm:$0xff] }
0x136a   :  { %13957 = vmatpush3.bf16.msra.mxu0 %v13956_v61  ;;  %13277 = vmatprep.mubr.msk.f32.mxu0 %vm14339_vm12, %v14340_v14  ;;  %v11693_v61 = vld [vmem:[%s14608_s5 + $0x40] sm:$0xff] }
0x136b   :  { %13368 = vmatprep.subr.mxu0 %v14340_v14  ;;  %v13971_v19 = vpack.c.bf16 %v11694_v62, %v11693_v61 }
0x1371   :  { %13278 = vmatmul.mubr.msk.f32.vlgmr.msra.gmra.mrb[76].mxu0 %vm1447_vm11, %v11683_v0 }
0x1372   :  { %13370 = vmatprep.mubr.msk.f32.mxu0 %vm14339_vm12, %v14340_v14 }
0x1444   :  { %v7467_v6 = vpop.f32.mrb[76].mxu0 }
0x1445   :  { %v14112_v27 = vadd.f32 %v7467_v6, %v7009_v4  ;;  %v13279_v41 = vpop.f32.mrb[77].mxu0 }
0x1446   :  { %v13974_v41 = vpack.c.bf16 %v11696_v26, %v11695_v3 }
0x1447   :  { %vm7472_vm0 = vcmp.ge.f32.partialorder %v14112_v27, 0.0  ;;  %v7473_v7 = vmul.f32 0.01, %v14112_v27 }
0x1449   :  { %v7474_v8 = vsel %vm7472_vm0, %v14112_v27, %v7473_v7 }
0x144a   :  { %v7482_v9 = vmul.f32 %v11685_v42, %v7474_v8  ;;  %v11698_v42 = vld [vmem:[%s14608_s5 + $0x60] sm:$0xff]  ;;  %v11699_v8 = vld [vmem:[%s14608_s5 + $0x68] sm:$0xff] }
0x144c   :  { %v15419_v46 = vadd.f32 %v11686_v45, %v7482_v9 }
0x144e   :  { %v7492_v12 = vsel %vm1932_vm14, %v15419_v46, 0.0  ;;  %v7578_v16 = vsel %vm2019_vm15, %v15419_v46, 0.0  ;;  %v7664_v22 = vsel %vm2107_vm3, %v15419_v46, 0.0  ;;  %v7750_v38 = vsel %vm2195_vm4, %v15419_v46, 0.0 }
0x144f   :  { %v7493_v48 = vsel %vm990_vm8, %v7492_v12, 0.0  ;;  %v7579_v17 = vsel %vm990_vm8, %v7578_v16, 0.0  ;;  %v7665_v25 = vsel %vm990_vm8, %v7664_v22, 0.0  ;;  %v7751_v58 = vsel %vm990_vm8, %v7750_v38, 0.0  ;;  %v11705_v38 = vld [vmem:[%s14608_s5 + $0x90] sm:$0xff] }
0x1450   :  { %v7494_v18 = vrot.slane %v7493_v48, 4  ;;  %v7580_v20 = vrot.slane %v7579_v17, 4  ;;  %v7666_v35 = vrot.slane %v7665_v25, 4  ;;  %v7752_v1 = vrot.slane %v7751_v58, 4 }
0x1451   :  { %v7836_v2 = vsel %vm2283_vm5, %v15419_v46, 0.0  ;;  %vm15847_vm14 = vcmp.eq.s32.totalorder %v14633_v44, 5  ;;  %v13977_v16 = vpack.c.bf16 %v11699_v8, %v11698_v42  ;;  %vm15848_vm15 = vcmp.eq.s32.totalorder %v14633_v44, 6  ;;  %v11715_v8 = vld [vmem:[%s14608_s5 + $0xd0] sm:$0xff] }
0x1452   :  { %v7495_v23 = vadd.f32 %v7494_v18, %v7493_v48  ;;  %v7581_v24 = vadd.f32 %v7580_v20, %v7579_v17  ;;  %v7667_v56 = vadd.f32 %v7666_v35, %v7665_v25  ;;  %v7753_v6 = vadd.f32 %v7752_v1, %v7751_v58  ;;  %v11700_v17 = vld [vmem:[%s14608_s5 + $0x70] sm:$0xff]  ;;  %v11701_v18 = vld [vmem:[%s14608_s5 + $0x78] sm:$0xff]  ;;  %v11708_v58 = vld [vmem:[%s14608_s5 + $0xa0] sm:$0xff] }
0x1453   :  { %v7837_v27 = vsel %vm990_vm8, %v7836_v2, 0.0  ;;  %v7922_v12 = vsel %vm15847_vm14, %v15419_v46, 0.0  ;;  %vm15849_vm3 = vcmp.eq.s32.totalorder %v14633_v44, 7  ;;  %v11710_v2 = vld [vmem:[%s14608_s5 + $0xb0] sm:$0xff] }
0x1454   :  { %v7496_v28 = vrot.slane %v7495_v23, 2  ;;  %v7582_v33 = vrot.slane %v7581_v24, 2  ;;  %v7668_v0 = vrot.slane %v7667_v56, 2  ;;  %v7754_v45 = vrot.slane %v7753_v6, 2 }
0x1455   :  { %v7838_v9 = vrot.slane %v7837_v27, 4  ;;  %v8094_v62 = vsel %vm15849_vm3, %v15419_v46, 0.0 }
0x1456   :  { %v7497_v30 = vadd.f32 %v7496_v28, %v7495_v23  ;;  %v7583_v55 = vadd.f32 %v7582_v33, %v7581_v24  ;;  %v7669_v4 = vadd.f32 %v7668_v0, %v7667_v56  ;;  %v7755_v20 = vadd.f32 %v7754_v45, %v7753_v6  ;;  %v11703_v28 = vld [vmem:[%s14608_s5 + $0x80] sm:$0xff]  ;;  %v11714_v6 = vld [vmem:[%s14608_s5 + $0xc8] sm:$0xff]  ;;  %v11716_v45 = vld [vmem:[%s14608_s5 + $0xd8] sm:$0xff] }
0x1457   :  { %v7839_v22 = vadd.f32 %v7838_v9, %v7837_v27  ;;  %v7923_v23 = vsel %vm990_vm8, %v7922_v12, 0.0  ;;  %v13980_v24 = vpack.c.bf16 %v11701_v18, %v11700_v17  ;;  %v8008_v33 = vsel %vm15848_vm15, %v15419_v46, 0.0  ;;  %v11718_v17 = vld [vmem:[%s14608_s5 + $0xe0] sm:$0xff]  ;;  %v11719_v18 = vld [vmem:[%s14608_s5 + $0xe8] sm:$0xff] }
0x1458   :  { %v7498_v36 = vrot.slane %v7497_v30, 1  ;;  %v7584_v60 = vrot.slane %v7583_v55, 1  ;;  %v7670_v7 = vrot.slane %v7669_v4, 1  ;;  %v7756_v25 = vrot.slane %v7755_v20, 1 }
0x1459   :  { %v7840_v32 = vrot.slane %v7839_v22, 2  ;;  %v7924_v10 = vrot.slane %v7923_v23, 4  ;;  %v8009_v54 = vsel %vm990_vm8, %v8008_v33, 0.0  ;;  %v8095_v26 = vsel %vm990_vm8, %v8094_v62, 0.0  ;;  %v8180_v33 = vld [vmem:[%s15850_s13] sm:$0xff] }
0x145a   :  { %v7499_v52 = vadd.f32 %v7498_v36, %v7497_v30  ;;  %v7585_v21 = vadd.f32 %v7584_v60, %v7583_v55  ;;  %v7671_v48 = vadd.f32 %v7670_v7, %v7669_v4  ;;  %v11704_v30 = vld [vmem:[%s14608_s5 + $0x88] sm:$0xff]  ;;  %v7757_v36 = vadd.f32 %v7756_v25, %v7755_v20  ;;  %v11713_v4 = vld [vmem:[%s14608_s5 + $0xc0] sm:$0xff]  ;;  %v11721_v25 = vld [vmem:[%s14608_s5 + $0xf8] sm:$0xff]  ;;  %13369 = vmatpush3.msra.mxu0 %v8180_v33 }
0x145b   :  { %v13983_v35 = vpack.c.bf16 %v11704_v30, %v11703_v28  ;;  %v7925_v53 = vadd.f32 %v7924_v10, %v7923_v23  ;;  %v8010_v61 = vrot.slane %v8009_v54, 4  ;;  %v13995_v7 = vpack.c.bf16 %v11714_v6, %v11713_v4  ;;  %13373 = vmatprep.subr.mxu0 %v14340_v14  ;;  %v11733_v4 = vld [vmem:[%s15853_s25 + $0x20] sm:$0xff]  ;;  %v11735_v6 = vld [vmem:[%s15853_s25 + $0x28] sm:$0xff] }
0x145c   :  { %13289 = vmatmul.mubr.msk.f32.vlgmr.msra.gmra.mrb[82].mxu1 %vm990_vm8, %v7499_v52  ;;  %v7841_v52 = vadd.f32 %v7840_v32, %v7839_v22  ;;  %v14001_v22 = vpack.c.bf16 %v11719_v18, %v11718_v17  ;;  %v11755_v17 = vld [vmem:[%s15857_s14 + $0x50] sm:$0xff] }
0x145d   :  { %13966 = vmatpush3.bf16.msra.mxu1 %v13965_v50  ;;  %13299 = vmatprep.mubr.msk.f32.mxu1 %vm14339_vm12, %v14340_v14  ;;  %v11706_v50 = vld [vmem:[%s14608_s5 + $0x98] sm:$0xff]  ;;  %v7926_v60 = vrot.slane %v7925_v53, 2  ;;  %v8011_v3 = vadd.f32 %v8010_v61, %v8009_v54 }
0x145e   :  { %13967 = vmatprep.subr.bf16.mxu1 %v14338_v13  ;;  %v13986_v55 = vpack.c.bf16 %v11706_v50, %v11705_v38  ;;  %v7842_v56 = vrot.slane %v7841_v52, 1 }
0x145f   :  { %v8012_v27 = vrot.slane %v8011_v3, 2 }
0x1460   :  { %v7843_v1 = vadd.f32 %v7842_v56, %v7841_v52  ;;  %v8255_v52 = vld [vmem:[%s15852_s21] sm:$0xff] }
0x1461   :  { %13969 = vmatpush3.bf16.msra.mxu1 %v13968_v59  ;;  %v11709_v59 = vld [vmem:[%s14608_s5 + $0xa8] sm:$0xff]  ;;  %v8013_v9 = vadd.f32 %v8012_v27, %v8011_v3  ;;  %v8256_v56 = vld [vmem:[%s15854_s29] sm:$0x1]  ;;  %v11737_v27 = vld [vmem:[%s15853_s25 + $0x30] sm:$0xff] }
0x1462   :  { %13970 = vmatprep.subr.bf16.mxu1 %v14338_v13  ;;  %v13989_v0 = vpack.c.bf16 %v11709_v59, %v11708_v58 }
0x1464   :  { %13300 = vmatmul.mubr.msk.f32.vlgmr.msra.gmra.mrb[82].mxu1 %vm990_vm8, %v7585_v21  ;;  %v7927_v21 = vadd.f32 %v7926_v60, %v7925_v53  ;;  %v8335_v53 = vld [vmem:[%s15853_s25] sm:$0xff] }
0x1465   :  { %13972 = vmatpush3.bf16.msra.mxu1 %v13971_v19  ;;  %13310 = vmatprep.mubr.msk.f32.mxu1 %vm14339_vm12, %v14340_v14  ;;  %v11711_v19 = vld [vmem:[%s14608_s5 + $0xb8] sm:$0xff] }
0x1466   :  { %13973 = vmatprep.subr.bf16.mxu1 %v14338_v13  ;;  %v13992_v44 = vpack.c.bf16 %v11711_v19, %v11710_v2  ;;  %v7928_v46 = vrot.slane %v7927_v21, 1 }
0x1468   :  { %v7929_v42 = vadd.f32 %v7928_v46, %v7927_v21  ;;  %v11731_v46 = vld [vmem:[%s15853_s25 + $0x18] sm:$0xff] }
0x1469   :  { %13975 = vmatpush3.bf16.msra.mxu1 %v13974_v41  ;;  %v8096_v41 = vrot.slane %v8095_v26, 4 }
0x146a   :  { %13976 = vmatprep.subr.bf16.mxu1 %v14338_v13 }
0x146b   :  { %v8097_v12 = vadd.f32 %v8096_v41, %v8095_v26  ;;  %v11727_v26 = vld [vmem:[%s15853_s25 + $0x8] sm:$0xff]  ;;  %v11739_v41 = vld [vmem:[%s15853_s25 + $0x38] sm:$0xff] }
0x146c   :  { %13311 = vmatmul.mubr.msk.f32.vlgmr.msra.gmra.mrb[82].mxu1 %vm990_vm8, %v7671_v48  ;;  %v8014_v48 = vrot.slane %v8013_v9, 1 }
0x146d   :  { %13978 = vmatpush3.bf16.msra.mxu1 %v13977_v16  ;;  %13321 = vmatprep.mubr.msk.f32.mxu1 %vm14339_vm12, %v14340_v14  ;;  %v13998_v16 = vpack.c.bf16 %v11716_v45, %v11715_v8  ;;  %v8098_v20 = vrot.slane %v8097_v12, 2  ;;  %v11753_v8 = vld [vmem:[%s15857_s14 + $0x40] sm:$0xff] }
0x146e   :  { %13979 = vmatprep.subr.bf16.mxu1 %v14338_v13  ;;  %v8015_v23 = vadd.f32 %v8014_v48, %v8013_v9  ;;  %v11754_v9 = vld [vmem:[%s15857_s14 + $0x48] sm:$0xff]  ;;  %v8959_v48 = vld [vmem:[%s15857_s14 + $0x18] sm:$0xff] }
0x146f   :  { %v8099_v28 = vadd.f32 %v8098_v20, %v8097_v12  ;;  %v14019_v12 = vpack.c.bf16 %v11754_v9, %v11753_v8  ;;  %v11756_v20 = vld [vmem:[%s15857_s14 + $0x58] sm:$0xff]  ;;  %v11745_v8 = vld [vmem:[%s15857_s14 + $0x28] sm:$0xff] }
0x1470   :  { %v9034_v9 = vld [vmem:[%s15859_s24 + $0x8] sm:$0xff] }
0x1471   :  { %13981 = vmatpush3.bf16.msra.mxu1 %v13980_v24  ;;  %v11720_v24 = vld [vmem:[%s14608_s5 + $0xf0] sm:$0xff]  ;;  %v8100_v32 = vrot.slane %v8099_v28, 1  ;;  %s15861_s5 = sld [smem:[#allocation14_spill]] }
0x1472   :  { %13982 = vmatprep.subr.bf16.mxu1 %v14338_v13  ;;  %v14004_v30 = vpack.c.bf16 %v11721_v25, %v11720_v24 }
0x1473   :  { %v8101_v10 = vadd.f32 %v8100_v32, %v8099_v28 }
0x1474   :  { %13322 = vmatmul.mubr.msk.f32.vlgmr.msra.gmra.mrb[82].mxu1 %vm990_vm8, %v7757_v36 }
0x1475   :  { %13984 = vmatpush3.bf16.msra.mxu1 %v13983_v35  ;;  %13332 = vmatprep.mubr.msk.f32.mxu1 %vm14339_vm12, %v14340_v14  ;;  %v7491_v35 = vld [vmem:[%s15851_s17] sm:$0x1] }
0x1476   :  { %13985 = vmatprep.subr.bf16.mxu1 %v14338_v13 }
0x1479   :  { %13987 = vmatpush3.bf16.msra.mxu1 %v13986_v55 }
0x147a   :  { %13988 = vmatprep.subr.bf16.mxu1 %v14338_v13 }
0x147c   :  { %13333 = vmatmul.mubr.msk.f32.vlgmr.msra.gmra.mrb[82].mxu1 %vm990_vm8, %v7843_v1  ;;  %v11725_v1 = vld [vmem:[%s15856_s8 + $0x1] sm:$0x1] }
0x147d   :  { %13990 = vmatpush3.bf16.msra.mxu1 %v13989_v0  ;;  %13343 = vmatprep.mubr.msk.f32.mxu1 %vm14339_vm12, %v14340_v14  ;;  %v8181_v0 = vld [vmem:[%s15855_s3] sm:$0x1] }
0x147e   :  { %13991 = vmatprep.subr.bf16.mxu1 %v14338_v13 }
0x1481   :  { %13993 = vmatpush3.bf16.msra.mxu1 %v13992_v44  ;;  %v11729_v44 = vld [vmem:[%s15853_s25 + $0x10] sm:$0xff] }
0x1482   :  { %13994 = vmatprep.subr.bf16.mxu1 %v14338_v13 }
0x1484   :  { %13344 = vmatmul.mubr.msk.f32.vlgmr.msra.gmra.mrb[82].mxu1 %vm990_vm8, %v7929_v42  ;;  %v8957_v42 = vld [vmem:[%s15857_s14 + $0x8] sm:$0xff] }
0x1485   :  { %13996 = vmatpush3.bf16.msra.mxu1 %v13995_v7  ;;  %13354 = vmatprep.mubr.msk.f32.mxu1 %vm14339_vm12, %v14340_v14  ;;  %v8956_v7 = vld [vmem:[%s15857_s14] sm:$0xff] }
0x1486   :  { %13997 = vmatprep.subr.bf16.mxu1 %v14338_v13  ;;  %v14007_v45 = vpack.c.bf16 %v8957_v42, %v8956_v7  ;;  %v9033_v7 = vld [vmem:[%s15859_s24] sm:$0xff] }
0x1487   :  { %v11744_v42 = vld [vmem:[%s15857_s14 + $0x20] sm:$0xff] }
0x1489   :  { %13999 = vmatpush3.bf16.msra.mxu1 %v13998_v16  ;;  %v8958_v16 = vld [vmem:[%s15857_s14 + $0x10] sm:$0xff] }
0x148a   :  { %14000 = vmatprep.subr.bf16.mxu1 %v14338_v13  ;;  %v14010_v18 = vpack.c.bf16 %v8959_v48, %v8958_v16  ;;  %v11746_v16 = vld [vmem:[%s15857_s14 + $0x30] sm:$0xff]  ;;  %v11747_v48 = vld [vmem:[%s15857_s14 + $0x38] sm:$0xff] }
0x148c   :  { %13355 = vmatmul.mubr.msk.f32.vlgmr.msra.gmra.mrb[82].mxu1 %vm990_vm8, %v8015_v23 }
0x148d   :  { %14002 = vmatpush3.bf16.msra.mxu1 %v14001_v22  ;;  %13365 = vmatprep.mubr.msk.f32.mxu1 %vm14339_vm12, %v14340_v14  ;;  %v14022_v22 = vpack.c.bf16 %v11756_v20, %v11755_v17  ;;  %v14016_v17 = vpack.c.bf16 %v11747_v48, %v11746_v16  ;;  %v9466_v20 = vld [vmem:[%s15860_s30] sm:$0xff] }
0x148e   :  { %14003 = vmatprep.subr.bf16.mxu1 %v14338_v13 }
0x1491   :  { %14005 = vmatpush3.bf16.msra.mxu1 %v14004_v30  ;;  %v8334_v30 = vld [vmem:[%s15858_s19] sm:$0xff] }
0x1492   :  { %14018 = vmatprep.subr.bf16.mxu1 %v14338_v13 }
0x1494   :  { %13366 = vmatmul.mubr.msk.f32.vlgmr.msra.gmra.mrb[82].mxu1 %vm990_vm8, %v8101_v10 }
0x1495   :  { %13458 = vmatprep.mubr.msk.f32.mxu1 %vm14339_vm12, %v14340_v14  ;;  %14020 = vmatpush3.bf16.msra.mxu1 %v14019_v12 }
0x1496   :  { %14021 = vmatprep.subr.bf16.mxu1 %v14338_v13 }
0x1499   :  { %14023 = vmatpush3.bf16.msra.mxu1 %v14022_v22  ;;  %v9467_v22 = vld [vmem:[%s15860_s30 + $0x8] sm:$0xff] }
0x1567   :  { %v8175_v36 = vpop.f32.mrb[82].mxu1 }
0x1568   :  { %v14113_v38 = vadd.f32 %v8175_v36, %v7491_v35  ;;  %v13367_v50 = vpop.f32.mrb[83].mxu1 }
0x156a   :  { %13371 = vmatmul.mubr.msk.f32.vlgmr.msra.gmra.mrb[78].mxu0 %vm890_vm7, %v14113_v38 }
0x156b   :  { %13374 = vmatpush3.msra.mxu0 %v8255_v52  ;;  %13375 = vmatprep.mubr.msk.f32.mxu0 %vm14339_vm12, %v14340_v14 }
0x156c   :  { %13378 = vmatprep.subr.mxu0 %v14340_v14 }
0x156e   :  { %13376 = vmatmul.mubr.msk.f32.vlgmr.msra.gmra.mrb[80].mxu0 %vm890_vm7, %v14113_v38 }
0x156f   :  { %13380 = vmatprep.mubr.msk.f32.mxu0 %vm14339_vm12, %v14340_v14  ;;  %13379 = vmatpush3.msra.mxu0 %v8335_v53 }
0x1570   :  { %13383 = vmatprep.subr.mxu0 %v14340_v14 }
0x163d   :  { %v8251_v54 = vpop.f32.mrb[78].mxu0 }
0x163e   :  { %v13372_v55 = vpop.f32.mrb[79].mxu0  ;;  %v8252_v19 = vadd.f32 %v8251_v54, %v8181_v0 }
0x1641   :  { %v8323_v58 = vpop.f32.mrb[80].mxu0 }
0x1642   :  { %v8324_v59 = vadd.f32 %v8323_v58, %v8256_v56  ;;  %v13377_v60 = vpop.f32.mrb[81].mxu0 }
0x1644   :  { %v8329_v61 = vmul.f32 0.5, %v8324_v59 }
0x1646   :  { %v8330_v62 = vmul.f32 1.442695, %v8329_v61 }
0x1648   :  { %14325 = vpow2.f32 %v8330_v62 }
0x1652   :  { %v14326_v2 = vpop.eup %14325 }
0x1653   :  { %v8332_v21 = vmul.f32 %v14326_v2, %v11725_v1 }
0x1655   :  { %v8333_v3 = vadd.f32 %v8332_v21, %v8252_v19 }
0x1657   :  { %13381 = vmatmul.mubr.msk.f32.vlgmr.msra.gmra.mrb[82].mxu0 %vm890_vm7, %v8333_v3 }
0x1658   :  { %13384 = vmatpush3.msra.mxu0 %v11727_v26  ;;  %13385 = vmatprep.mubr.msk.f32.mxu0 %vm14339_vm12, %v14340_v14 }
0x1659   :  { %13388 = vmatprep.subr.mxu0 %v14340_v14 }
0x165b   :  { %13386 = vmatmul.mubr.msk.f32.vlgmr.msra.gmra.mrb[84].mxu0 %vm890_vm7, %v8333_v3 }
0x165c   :  { %13389 = vmatpush3.msra.mxu0 %v11729_v44  ;;  %13390 = vmatprep.mubr.msk.f32.mxu0 %vm14339_vm12, %v14340_v14 }
0x165d   :  { %13393 = vmatprep.subr.mxu0 %v14340_v14 }
0x165f   :  { %13391 = vmatmul.mubr.msk.f32.vlgmr.msra.gmra.mrb[86].mxu0 %vm890_vm7, %v8333_v3 }
0x1660   :  { %13394 = vmatpush3.msra.mxu0 %v11731_v46  ;;  %13395 = vmatprep.mubr.msk.f32.mxu0 %vm14339_vm12, %v14340_v14 }
0x1661   :  { %13398 = vmatprep.subr.mxu0 %v14340_v14 }
0x1663   :  { %13396 = vmatmul.mubr.msk.f32.vlgmr.msra.gmra.mrb[88].mxu0 %vm890_vm7, %v8333_v3 }
0x1664   :  { %13399 = vmatpush3.msra.mxu0 %v11733_v4  ;;  %13400 = vmatprep.mubr.msk.f32.mxu0 %vm14339_vm12, %v14340_v14 }
0x1665   :  { %13403 = vmatprep.subr.mxu0 %v14340_v14 }
0x1667   :  { %13401 = vmatmul.mubr.msk.f32.vlgmr.msra.gmra.mrb[90].mxu0 %vm890_vm7, %v8333_v3 }
0x1668   :  { %13404 = vmatpush3.msra.mxu0 %v11735_v6  ;;  %13405 = vmatprep.mubr.msk.f32.mxu0 %vm14339_vm12, %v14340_v14 }
0x1669   :  { %13408 = vmatprep.subr.mxu0 %v14340_v14 }
0x166b   :  { %13406 = vmatmul.mubr.msk.f32.vlgmr.msra.gmra.mrb[92].mxu0 %vm890_vm7, %v8333_v3 }
0x166c   :  { %13409 = vmatpush3.msra.mxu0 %v11737_v27  ;;  %13410 = vmatprep.mubr.msk.f32.mxu0 %vm14339_vm12, %v14340_v14 }
0x166d   :  { %13413 = vmatprep.subr.mxu0 %v14340_v14 }
0x166f   :  { %13411 = vmatmul.mubr.msk.f32.vlgmr.msra.gmra.mrb[94].mxu0 %vm890_vm7, %v8333_v3 }
0x1670   :  { %13414 = vmatpush3.msra.mxu0 %v11739_v41  ;;  %13415 = vmatprep.mubr.msk.f32.mxu0 %vm14339_vm12, %v14340_v14 }
0x1671   :  { %14006 = vmatprep.subr.bf16.mxu0 %v14338_v13 }
0x1673   :  { %13416 = vmatmul.mubr.msk.f32.vlgmr.msra.gmra.mrb[96].mxu0 %vm890_vm7, %v8333_v3 }
0x1674   :  { %13426 = vmatprep.mubr.msk.f32.mxu0 %vm14339_vm12, %v14340_v14  ;;  %14008 = vmatpush3.bf16.msra.mxu0 %v14007_v45 }
0x1675   :  { %14009 = vmatprep.subr.bf16.mxu0 %v14338_v13 }
0x1678   :  { %14011 = vmatpush3.bf16.msra.mxu0 %v14010_v18  ;;  %v11749_v18 = vld [vmem:[%s15859_s24 + $0x10] sm:$0xff] }
0x172a   :  { %v8405_v23 = vpop.f32.mrb[82].mxu0 }
0x172b   :  { %v8412_v24 = vrot.slane %v8405_v23, %v14854_v29  ;;  %v13382_v25 = vpop.f32.mrb[83].mxu0 }
0x172d   :  { %v8413_v28 = vmul.f32 %v8412_v24, %v14859_v31  ;;  %v11750_v24 = vld [vmem:[%s15859_s24 + $0x18] sm:$0xff] }
0x172e   :  { %v8482_v32 = vpop.f32.mrb[84].mxu0 }
0x172f   :  { %v8489_v10 = vrot.slane %v8482_v32, %v14854_v29  ;;  %v13387_v33 = vpop.f32.mrb[85].mxu0  ;;  %v8414_v35 = vadd.f32 %v8413_v28, %v8334_v30  ;;  %v11758_v28 = vld [vmem:[%s15859_s24 + $0x20] sm:$0xff]  ;;  %v14024_v30 = vpack.c.bf16 %v9467_v22, %v9466_v20  ;;  %v9465_v32 = vld [vmem:[%s15861_s5 + $0x8] sm:$0xff]  ;;  %v11799_v20 = vld [vmem:[%s15865_s1 + $0x58] sm:$0xff] }
0x1730   :  { %v11774_v33 = vld [vmem:[%s15860_s30 + $0x10] sm:$0xff]  ;;  %v10289_v22 = vld [vmem:[%s15046_s23] sm:$0xff] }
0x1731   :  { %v8490_v36 = vmul.f32 %v8489_v10, %v14867_v37 }
0x1732   :  { %v8559_v38 = vpop.f32.mrb[86].mxu0 }
0x1733   :  { %v8491_v50 = vadd.f32 %v8490_v36, %v8414_v35  ;;  %v8566_v52 = vrot.slane %v8559_v38, %v14854_v29  ;;  %v13392_v53 = vpop.f32.mrb[87].mxu0  ;;  %v11775_v35 = vld [vmem:[%s15860_s30 + $0x18] sm:$0xff]  ;;  %v8955_v38 = vld [vmem:[%s15862_s12 + $0x8] sm:$0xff] }
0x1734   :  { %v14036_v36 = vpack.c.bf16 %v11775_v35, %v11774_v33  ;;  %v11804_v33 = vld [vmem:[%s15058_s15] ss:$0 sm:$0xff]  ;;  %v9462_v35 = vld [vmem:[%s15053_s27 + $0x10] sm:$0xff] }
0x1735   :  { %v8567_v54 = vmul.f32 %v8566_v52, %v14874_v43 }
0x1736   :  { %v8636_v55 = vpop.f32.mrb[88].mxu0 }
0x1737   :  { %v8568_v56 = vadd.f32 %v8567_v54, %v8491_v50  ;;  %v8643_v58 = vrot.slane %v8636_v55, %v14854_v29  ;;  %v13397_v31 = vpop.f32.mrb[89].mxu0  ;;  %v8954_v50 = vld [vmem:[%s15862_s12] sm:$0xff] }
0x1739   :  { %v8644_v59 = vmul.f32 %v8643_v58, %v14881_v51  ;;  %v11762_v58 = vld [vmem:[%s15863_s20] ss:$0 sm:$0xff] }
0x173a   :  { %v8713_v60 = vpop.f32.mrb[90].mxu0 }
0x173b   :  { %v8645_v61 = vadd.f32 %v8644_v59, %v8568_v56  ;;  %v8720_v62 = vrot.slane %v8713_v60, %v14854_v29  ;;  %v13402_v0 = vpop.f32.mrb[91].mxu0 }
0x173d   :  { %v8721_v37 = vmul.f32 %v8720_v62, %v14888_v57 }
0x173e   :  { %v8790_v1 = vpop.f32.mrb[92].mxu0 }
0x173f   :  { %v8722_v2 = vadd.f32 %v8721_v37, %v8645_v61  ;;  %v8797_v19 = vrot.slane %v8790_v1, %v14854_v29  ;;  %v13407_v43 = vpop.f32.mrb[93].mxu0  ;;  %v11763_v61 = vld [vmem:[%s15864_s16] ss:$0 sm:$0xff]  ;;  %v11772_v37 = vld [vmem:[%s15861_s5 + $0x10] sm:$0xff]  ;;  %v11773_v1 = vld [vmem:[%s15861_s5 + $0x18] sm:$0xff] }
0x1740   :  { %v14040_v43 = vpack.c.bf16 %v11773_v1, %v11772_v37 }
0x1741   :  { %v8798_v21 = vmul.f32 %v8797_v19, %v14895_v63 }
0x1742   :  { %v8867_v3 = vpop.f32.mrb[94].mxu0 }
0x1743   :  { %v8799_v26 = vadd.f32 %v8798_v21, %v8722_v2  ;;  %v8874_v51 = vrot.slane %v8867_v3, %v14854_v29  ;;  %v13412_v44 = vpop.f32.mrb[95].mxu0  ;;  %v11790_v21 = vld [vmem:[%s15860_s30 + $0x20] sm:$0xff]  ;;  %v11791_v3 = vld [vmem:[%s15860_s30 + $0x28] sm:$0xff] }
0x1744   :  { %v11789_v44 = vld [vmem:[%s15861_s5 + $0x28] sm:$0xff] }
0x1745   :  { %v8875_v46 = vmul.f32 %v8874_v51, %v14902_v5  ;;  %v11788_v51 = vld [vmem:[%s15861_s5 + $0x20] sm:$0xff] }
0x1746   :  { %v8944_v4 = vpop.f32.mrb[96].mxu0 }
0x1747   :  { %v8876_v57 = vadd.f32 %v8875_v46, %v8799_v26  ;;  %v8951_v6 = vrot.slane %v8944_v4, %v14854_v29  ;;  %v13417_v27 = vpop.f32.mrb[97].mxu0  ;;  %v14013_v29 = vpack.c.bf16 %v11745_v8, %v11744_v42  ;;  %v14048_v26 = vpack.c.bf16 %v11791_v3, %v11790_v21  ;;  %v10290_v4 = vld [vmem:[%s14996_s28] sm:$0xff]  ;;  %v11849_v3 = vld [vmem:[%s14996_s28 + $0x10] sm:$0xff] }
0x1748   :  { %v14052_v46 = vpack.c.bf16 %v11789_v44, %v11788_v51  ;;  %v9625_v27 = vld [vmem:[%s15865_s1 + $0x8] sm:$0xff] }
0x1749   :  { %v8952_v41 = vmul.f32 %v8951_v6, %v14909_v15 }
0x174b   :  { %v8953_v63 = vadd.f32 %v8952_v41, %v8876_v57  ;;  %v9626_v41 = vld [vmem:[%s15865_s1 + $0x10] sm:$0xff] }
0x174d   :  { %13427 = vmatmul.mubr.msk.f32.vlgmr.msra.gmra.mrb[98].mxu0 %vm990_vm8, %v8953_v63  ;;  %13459 = vmatmul.mubr.msk.f32.vlgmr.msra.gmra.mrb[84].mxu1 %vm990_vm8, %v8953_v63 }
0x174e   :  { %13431 = vmatprep.mubr.msk.f32.mxu0 %vm890_vm7, %v9033_v7  ;;  %v11780_v7 = vld [vmem:[%s15865_s1 + $0x20] sm:$0xff] }
0x1820   :  { %v9029_v5 = vpop.f32.mrb[98].mxu0  ;;  %v9347_v45 = vpop.f32.mrb[84].mxu1 }
0x1821   :  { %v13428_v12 = vpop.f32.mrb[99].mxu0  ;;  %13429 = vmatprep.subr.mxu0 %v9029_v5  ;;  %v13460_v15 = vpop.f32.mrb[85].mxu1 }
0x1822   :  { %13430 = vmatpush3.msra.mxu0 %v9029_v5  ;;  %v11796_v12 = vld [vmem:[%s15865_s1 + $0x40] sm:$0xff] }
0x1823   :  { %14012 = vmatprep.subr.bf16.mxu0 %v14338_v13  ;;  %13432 = vmatmul.mubr.msk.f32.vlgmr.msra.gmra.mrb[100].mxu0 %vm890_vm7, %v9034_v9  ;;  %v11782_v9 = vld [vmem:[%s15865_s1 + $0x30] sm:$0xff] }
0x1824   :  { %14014 = vmatpush3.bf16.msra.mxu0 %v14013_v29  ;;  %13442 = vmatprep.mubr.msk.f32.mxu0 %vm14339_vm12, %v14340_v14  ;;  %v9464_v14 = vld [vmem:[%s15861_s5] sm:$0xff]  ;;  %v11783_v29 = vld [vmem:[%s15865_s1 + $0x38] sm:$0xff] }
0x1825   :  { %14015 = vmatprep.subr.bf16.mxu0 %v14338_v13  ;;  %v11759_v13 = vld [vmem:[%s15859_s24 + $0x28] sm:$0xff]  ;;  %v14028_v10 = vpack.c.bf16 %v9465_v32, %v9464_v14  ;;  %v9463_v32 = vld [vmem:[%s15053_s27 + $0x18] sm:$0xff] }
0x1828   :  { %14017 = vmatpush3.bf16.msra.mxu0 %v14016_v17  ;;  %v11797_v17 = vld [vmem:[%s15865_s1 + $0x48] sm:$0xff] }
0x182b   :  { %13443 = vmatmul.mubr.msk.f32.vlgmr.msra.gmra.mrb[102].mxu0 %vm990_vm8, %v8953_v63  ;;  %v9627_v63 = vld [vmem:[%s15865_s1 + $0x18] sm:$0xff] }
0x182c   :  { %13447 = vmatprep.mubr.msk.f32.mxu0 %vm890_vm7, %v11749_v18  ;;  %v11798_v18 = vld [vmem:[%s15865_s1 + $0x50] sm:$0xff] }
0x18fe   :  { %v9188_v23 = vpop.f32.mrb[102].mxu0 }
0x18ff   :  { %v13444_v25 = vpop.f32.mrb[103].mxu0  ;;  %13445 = vmatprep.subr.mxu0 %v9188_v23 }
0x1900   :  { %13446 = vmatpush3.msra.mxu0 %v9188_v23  ;;  %v11823_v23 = vld [vmem:[%s14996_s28 + $0x8] sm:$0xff]  ;;  %v9460_v25 = vld [vmem:[%s15053_s27] sm:$0xff] }
0x1901   :  { %13448 = vmatmul.mubr.msk.f32.vlgmr.msra.gmra.mrb[100].mxu0 %vm890_vm7, %v11750_v24  ;;  %13461 = vmatprep.subr.mxu0 %v9347_v45  ;;  %v9461_v24 = vld [vmem:[%s15053_s27 + $0x8] sm:$0xff] }
0x1902   :  { %13462 = vmatpush3.msra.mxu0 %v9347_v45  ;;  %13463 = vmatprep.mubr.msk.f32.mxu0 %vm890_vm7, %v11758_v28  ;;  %v11781_v45 = vld [vmem:[%s15865_s1 + $0x28] sm:$0xff] }
0x1903   :  { %14025 = vmatprep.subr.bf16.mxu0 %v14024_v30 }
0x1909   :  { %13464 = vmatmul.mubr.msk.f32.vlgmr.msra.gmra.mrb[100].mxu0 %vm890_vm7, %v11759_v13 }
0x190a   :  { %14027 = vmatpush3.bf16.msra.mxu0 %v14024_v30  ;;  %13470 = vmatprep.mubr.msk.f32.mxu0 %vm1447_vm11, %v15374_v47 }
0x190b   :  { %14029 = vmatprep.subr.bf16.mxu0 %v14028_v10 }
0x190d   :  { %13471 = vmatmul.mubr.msk.f32.vlgmr.msra.gmra.mrb[104].mxu0 %vm1447_vm11, %v15376_v49 }
0x190e   :  { %14031 = vmatpush3.bf16.msra.mxu0 %v14028_v10 }
0x190f   :  { %14037 = vmatprep.subr.bf16.mxu0 %v14036_v36 }
0x19dc   :  { %v13465_v52 = vpop.f32.mrb[100].mxu0 }
0x19dd   :  { %v14114_v53 = vadd.f32 %v13465_v52, %v8955_v38  ;;  %v9425_v54 = vpop.f32.mrb[101].mxu0 }
0x19de   :  { %v14115_v55 = vadd.f32 %v9425_v54, %v8954_v50 }
0x19df   :  { %vm9437_vm12 = vcmp.ge.f32.partialorder %v14114_v53, 0.0  ;;  %v9439_v56 = vmul.f32 0.01, %v14114_v53 }
0x19e0   :  { %vm9436_vm4 = vcmp.ge.f32.partialorder %v14115_v55, 0.0  ;;  %v9438_v31 = vmul.f32 0.01, %v14115_v55 }
0x19e1   :  { %v9441_v59 = vsel %vm9437_vm12, %v14114_v53, %v9439_v56 }
0x19e2   :  { %v9450_v60 = vmul.f32 %v11762_v58, %v9441_v59  ;;  %v9440_v62 = vsel %vm9436_vm4, %v14115_v55, %v9438_v31  ;;  %v11805_v55 = vld [vmem:[%s15063_s22] ss:$0 sm:$0xff] }
0x19e3   :  { %v9449_v0 = vmul.f32 %v11762_v58, %v9440_v62 }
0x19e4   :  { %v9459_v19 = vadd.f32 %v11763_v61, %v9450_v60 }
0x19e5   :  { %v9458_v2 = vadd.f32 %v11763_v61, %v9449_v0 }
0x19e7   :  { %13477 = vmatprep.mubr.msk.f32.mxu0 %vm1447_vm11, %v9458_v2 }
0x19e8   :  { %13478 = vmatmul.mubr.msk.f32.vlgmr.msra.gmra.mrb[104].mxu0 %vm1447_vm11, %v9459_v19 }
0x19e9   :  { %14039 = vmatpush3.bf16.msra.mxu0 %v14036_v36  ;;  %13494 = vmatprep.mubr.msk.f32.mxu0 %vm1447_vm11, %v15374_v47 }
0x19ea   :  { %14041 = vmatprep.subr.bf16.mxu0 %v14040_v43 }
0x19ec   :  { %13495 = vmatmul.mubr.msk.f32.vlgmr.msra.gmra.mrb[106].mxu0 %vm1447_vm11, %v15376_v49 }
0x19ed   :  { %13501 = vmatprep.mubr.msk.f32.mxu0 %vm1447_vm11, %v9458_v2  ;;  %14043 = vmatpush3.bf16.msra.mxu0 %v14040_v43 }
0x19ee   :  { %14049 = vmatprep.subr.bf16.mxu0 %v14048_v26 }
0x19f4   :  { %13502 = vmatmul.mubr.msk.f32.vlgmr.msra.gmra.mrb[106].mxu0 %vm1447_vm11, %v9459_v19 }
0x19f5   :  { %14051 = vmatpush3.bf16.msra.mxu0 %v14048_v26  ;;  %13518 = vmatprep.mubr.msk.f32.mxu0 %vm1447_vm11, %v15374_v47  ;;  %v9624_v47 = vld [vmem:[%s15865_s1] sm:$0xff]  ;;  %v11848_v26 = vld [vmem:[%s15046_s23 + $0x10] sm:$0xff] }
0x19f6   :  { %14053 = vmatprep.subr.bf16.mxu0 %v14052_v46  ;;  %13484 = vmatprep.mubr.msk.f32.mxu1 %vm1447_vm11, %v9624_v47  ;;  %v10475_v47 = vld [vmem:[%s15150_s7 + $0x10] sm:$0xff] }
0x19f8   :  { %13519 = vmatmul.mubr.msk.f32.vlgmr.msra.gmra.mrb[108].mxu0 %vm1447_vm11, %v15376_v49 }
0x19f9   :  { %13525 = vmatprep.mubr.msk.f32.mxu0 %vm1447_vm11, %v9458_v2  ;;  %14055 = vmatpush3.bf16.msra.mxu0 %v14052_v46 }
0x19fa   :  { %13538 = vmatprep.subr.mxu0 %v10290_v4 }
0x1a00   :  { %13526 = vmatmul.mubr.msk.f32.vlgmr.msra.gmra.mrb[108].mxu0 %vm1447_vm11, %v9459_v19  ;;  %v11822_v19 = vld [vmem:[%s15046_s23 + $0x8] sm:$0xff] }
0x1a01   :  { %13540 = vmatprep.mubr.msk.f32.mxu0 %vm890_vm7, %v15318_v11  ;;  %13539 = vmatpush3.msra.mxu0 %v10290_v4  ;;  %v10474_v4 = vld [vmem:[%s15150_s7 + $0x8] sm:$0xff] }
0x1a02   :  { %13546 = vmatprep.subr.mxu0 %v10289_v22 }
0x1a04   :  { %13541 = vmatmul.mubr.msk.f32.vlgmr.msra.gmra.mrb[110].mxu0 %vm890_vm7, %v15320_v34 }
0x1a05   :  { %13543 = vmatprep.mubr.msk.f32.mxu0 %vm890_vm7, %v15330_v39  ;;  %13547 = vmatpush3.msra.mxu0 %v10289_v22  ;;  %v11838_v22 = vld [vmem:[%s15150_s7 + $0x70] sm:$0xff] }
0x1a06   :  { %13574 = vmatprep.subr.mxu0 %v11823_v23 }
0x1a08   :  { %13544 = vmatmul.mubr.msk.f32.gmra.mrb[112].mxu0 %vm890_vm7, %v15332_v40 }
0x1abb   :  { %v13479_v49 = vpop.f32.mrb[104].mxu0 }
0x1abc   :  { %v9615_v57 = vpop.f32.mrb[105].mxu0 }
0x1abd   :  { %v14032_v6 = vpack.c.bf16 %v13479_v49, %v9615_v57  ;;  %v10476_v49 = vld [vmem:[%s15150_s7 + $0x18] sm:$0xff]  ;;  %v10477_v57 = vld [vmem:[%s15150_s7 + $0x20] sm:$0xff] }
0x1abf   :  { %14033 = vmatprep.subr.bf16.mxu1 %v14032_v6 }
0x1ac0   :  { %14035 = vmatpush3.bf16.msra.mxu1 %v14032_v6 }
0x1ac3   :  { %13485 = vmatmul.mubr.msk.f32.vlgmr.msra.gmra.mrb[86].mxu1 %vm1447_vm11, %v9625_v27 }
0x1ac4   :  { %13487 = vmatprep.mubr.msk.f32.mxu1 %vm1447_vm11, %v9626_v41  ;;  %v10478_v41 = vld [vmem:[%s15150_s7 + $0x28] sm:$0xff] }
0x1ac7   :  { %v13503_v42 = vpop.f32.mrb[106].mxu0  ;;  %13488 = vmatmul.mubr.msk.f32.gmra.mrb[88].mxu1 %vm1447_vm11, %v9627_v63 }
0x1ac8   :  { %v9874_v8 = vpop.f32.mrb[107].mxu0  ;;  %13508 = vmatprep.mubr.msk.f32.mxu1 %vm1447_vm11, %v11780_v7  ;;  %v10479_v7 = vld [vmem:[%s15150_s7 + $0x30] sm:$0xff] }
0x1ac9   :  { %v14044_v5 = vpack.c.bf16 %v13503_v42, %v9874_v8 }
0x1acb   :  { %14045 = vmatprep.subr.bf16.mxu1 %v14044_v5 }
0x1acc   :  { %14047 = vmatpush3.bf16.msra.mxu1 %v14044_v5  ;;  %v10480_v5 = vld [vmem:[%s15150_s7 + $0x38] sm:$0xff] }
0x1acf   :  { %13509 = vmatmul.mubr.msk.f32.vlgmr.msra.gmra.mrb[86].mxu1 %vm1447_vm11, %v11781_v45 }
0x1ad0   :  { %13511 = vmatprep.mubr.msk.f32.mxu1 %vm1447_vm11, %v11782_v9  ;;  %v11832_v9 = vld [vmem:[%s15150_s7 + $0x40] sm:$0xff] }
0x1ad3   :  { %v13527_v15 = vpop.f32.mrb[108].mxu0  ;;  %13512 = vmatmul.mubr.msk.f32.gmra.mrb[88].mxu1 %vm1447_vm11, %v11783_v29  ;;  %v11833_v29 = vld [vmem:[%s15150_s7 + $0x48] sm:$0xff] }
0x1ad4   :  { %v10133_v16 = vpop.f32.mrb[109].mxu0  ;;  %13532 = vmatprep.mubr.msk.f32.mxu1 %vm1447_vm11, %v11796_v12  ;;  %v11834_v12 = vld [vmem:[%s15150_s7 + $0x50] sm:$0xff] }
0x1ad5   :  { %v14056_v48 = vpack.c.bf16 %v13527_v15, %v10133_v16  ;;  %v11835_v15 = vld [vmem:[%s15150_s7 + $0x58] sm:$0xff]  ;;  %v11836_v16 = vld [vmem:[%s15150_s7 + $0x60] sm:$0xff] }
0x1ad7   :  { %14057 = vmatprep.subr.bf16.mxu1 %v14056_v48 }
0x1ad8   :  { %14059 = vmatpush3.bf16.msra.mxu1 %v14056_v48 }
0x1adb   :  { %13533 = vmatmul.mubr.msk.f32.vlgmr.msra.gmra.mrb[86].mxu1 %vm1447_vm11, %v11797_v17 }
0x1adc   :  { %13535 = vmatprep.mubr.msk.f32.mxu1 %vm1447_vm11, %v11798_v18  ;;  %v11837_v18 = vld [vmem:[%s15150_s7 + $0x68] sm:$0xff] }
0x1adf   :  { %13536 = vmatmul.mubr.msk.f32.gmra.mrb[88].mxu1 %vm1447_vm11, %v11799_v20 }
0x1bae   :  { %v13534_v28 = vpop.f32.mrb[86].mxu1 }
0x1baf   :  { %v14116_v30 = vadd.f32 %v13534_v28, %v9461_v24  ;;  %v10224_v13 = vpop.f32.mrb[87].mxu1 }
0x1bb0   :  { %v14117_v14 = vadd.f32 %v10224_v13, %v9460_v25  ;;  %v11839_v25 = vld [vmem:[%s15150_s7 + $0x78] sm:$0xff]  ;;  %v11859_v13 = vld [vmem:[%s15150_s7 + $0x88] sm:$0xff] }
0x1bb1   :  { %vm10248_vm5 = vcmp.ge.f32.partialorder %v14116_v30, 0.0  ;;  %v10252_v10 = vmul.f32 0.01, %v14116_v30 }
0x1bb2   :  { %vm10247_vm2 = vcmp.ge.f32.partialorder %v14117_v14, 0.0  ;;  %v10251_v36 = vmul.f32 0.01, %v14117_v14  ;;  %v13537_v38 = vpop.f32.mrb[88].mxu1 }
0x1bb3   :  { %v10256_v50 = vsel %vm10248_vm5, %v14116_v30, %v10252_v10  ;;  %v14118_v52 = vadd.f32 %v13537_v38, %v9463_v32  ;;  %v10234_v53 = vpop.f32.mrb[89].mxu1  ;;  %v11858_v30 = vld [vmem:[%s15150_s7 + $0x80] sm:$0xff]  ;;  %v11861_v32 = vld [vmem:[%s15150_s7 + $0x98] sm:$0xff]  ;;  %v10282_v38 = vld [vmem:[%s15257_s18 + $0x8] sm:$0xff] }
0x1bb4   :  { %v10267_v54 = vmul.f32 %v11804_v33, %v10256_v50  ;;  %v10255_v56 = vsel %vm10247_vm2, %v14117_v14, %v10251_v36  ;;  %v14119_v58 = vadd.f32 %v10234_v53, %v9462_v35  ;;  %v11860_v14 = vld [vmem:[%s15150_s7 + $0x90] sm:$0xff]  ;;  %v11862_v10 = vld [vmem:[%s15150_s7 + $0xa0] sm:$0xff]  ;;  %v11865_v36 = vld [vmem:[%s15150_s7 + $0xb8] sm:$0xff] }
0x1bb5   :  { %v10266_v31 = vmul.f32 %v11804_v33, %v10255_v56  ;;  %vm10250_vm11 = vcmp.ge.f32.partialorder %v14118_v52, 0.0  ;;  %v10254_v59 = vmul.f32 0.01, %v14118_v52  ;;  %v11864_v35 = vld [vmem:[%s15150_s7 + $0xb0] sm:$0xff]  ;;  %v10281_v50 = vld [vmem:[%s15257_s18] sm:$0xff]  ;;  %v10284_v56 = vld [vmem:[%s15257_s18 + $0x18] sm:$0xff] }
0x1bb6   :  { %vm10249_vm6 = vcmp.ge.f32.partialorder %v14119_v58, 0.0  ;;  %v10253_v60 = vmul.f32 0.01, %v14119_v58  ;;  %v10278_v0 = vadd.f32 %v11805_v55, %v10267_v54 }
0x1bb7   :  { %v10258_v61 = vsel %vm10250_vm11, %v14118_v52, %v10254_v59  ;;  %v10277_v62 = vadd.f32 %v11805_v55, %v10266_v31 }
0x1bb8   :  { %v10269_v37 = vmul.f32 %v11804_v33, %v10258_v61  ;;  %v10257_v1 = vsel %vm10249_vm6, %v14119_v58, %v10253_v60  ;;  %v10283_v58 = vld [vmem:[%s15257_s18 + $0x10] sm:$0xff] }
0x1bb9   :  { %v10268_v2 = vmul.f32 %v11804_v33, %v10257_v1  ;;  %13548 = vmatprep.mubr.msk.f32.mxu0 %vm890_vm7, %v10277_v62  ;;  %v11863_v33 = vld [vmem:[%s15150_s7 + $0xa8] sm:$0xff] }
0x1bba   :  { %13549 = vmatmul.mubr.msk.f32.vlgmr.msra.gmra.mrb[110].mxu0 %vm890_vm7, %v10278_v0  ;;  %v10280_v21 = vadd.f32 %v11805_v55, %v10269_v37 }
0x1bbb   :  { %v10279_v43 = vadd.f32 %v11805_v55, %v10268_v2  ;;  %13575 = vmatpush3.msra.mxu0 %v11823_v23 }
0x1bbc   :  { %13582 = vmatprep.subr.mxu0 %v11822_v19 }
0x1bbd   :  { %13551 = vmatprep.mubr.msk.f32.mxu0 %vm890_vm7, %v10279_v43 }
0x1bbe   :  { %13552 = vmatmul.mubr.msk.f32.gmra.mrb[112].mxu0 %vm890_vm7, %v10280_v21 }
0x1bbf   :  { %13576 = vmatprep.mubr.msk.f32.mxu0 %vm890_vm7, %v15318_v11 }
0x1bc2   :  { %13577 = vmatmul.mubr.msk.f32.vlgmr.msra.gmra.mrb[114].mxu0 %vm890_vm7, %v15320_v34 }
0x1bc3   :  { %13579 = vmatprep.mubr.msk.f32.mxu0 %vm890_vm7, %v15330_v39  ;;  %13583 = vmatpush3.msra.mxu0 %v11822_v19 }
0x1bc4   :  { %13610 = vmatprep.subr.mxu0 %v11849_v3 }
0x1bc6   :  { %13580 = vmatmul.mubr.msk.f32.gmra.mrb[116].mxu0 %vm890_vm7, %v15332_v40 }
0x1bc7   :  { %13584 = vmatprep.mubr.msk.f32.mxu0 %vm890_vm7, %v10277_v62 }
0x1bca   :  { %13585 = vmatmul.mubr.msk.f32.vlgmr.msra.gmra.mrb[114].mxu0 %vm890_vm7, %v10278_v0 }
0x1bcb   :  { %13587 = vmatprep.mubr.msk.f32.mxu0 %vm890_vm7, %v10279_v43  ;;  %13611 = vmatpush3.msra.mxu0 %v11849_v3 }
0x1bcc   :  { %13618 = vmatprep.subr.mxu0 %v11848_v26 }
0x1bce   :  { %13588 = vmatmul.mubr.msk.f32.gmra.mrb[116].mxu0 %vm890_vm7, %v10280_v21 }
0x1bcf   :  { %13612 = vmatprep.mubr.msk.f32.mxu0 %vm890_vm7, %v15318_v11  ;;  %v10473_v11 = vld [vmem:[%s15150_s7] sm:$0xff] }
0x1bd0   :  { %13562 = vmatprep.mubr.msk.f32.mxu1 %vm990_vm8, %v10473_v11 }
0x1bd2   :  { %13613 = vmatmul.mubr.msk.f32.vlgmr.msra.gmra.mrb[118].mxu0 %vm890_vm7, %v15320_v34 }
0x1bd3   :  { %13615 = vmatprep.mubr.msk.f32.mxu0 %vm890_vm7, %v15330_v39  ;;  %13619 = vmatpush3.msra.mxu0 %v11848_v26 }
0x1bd6   :  { %13616 = vmatmul.mubr.msk.f32.gmra.mrb[120].mxu0 %vm890_vm7, %v15332_v40 }
0x1bd7   :  { %13620 = vmatprep.mubr.msk.f32.mxu0 %vm890_vm7, %v10277_v62  ;;  %v10286_v62 = vld [vmem:[%s15257_s18 + $0x28] sm:$0xff] }
0x1bda   :  { %13621 = vmatmul.mubr.msk.f32.vlgmr.msra.gmra.mrb[118].mxu0 %vm890_vm7, %v10278_v0  ;;  %v10285_v0 = vld [vmem:[%s15257_s18 + $0x20] sm:$0xff] }
0x1bdb   :  { %13623 = vmatprep.mubr.msk.f32.mxu0 %vm890_vm7, %v10279_v43  ;;  %v10288_v43 = vld [vmem:[%s15257_s18 + $0x38] sm:$0xff] }
0x1bde   :  { %13624 = vmatmul.mubr.msk.f32.gmra.mrb[120].mxu0 %vm890_vm7, %v10280_v21  ;;  %v10287_v21 = vld [vmem:[%s15257_s18 + $0x30] sm:$0xff] }
0x1c8d   :  { %v13550_v34 = vpop.f32.mrb[110].mxu0 }
0x1c8e   :  { %v10454_v39 = vpop.f32.mrb[111].mxu0 }
0x1c8f   :  { %v14060_v51 = vpack.c.bf16 %v13550_v34, %v10454_v39 }
0x1c91   :  { %v13553_v44 = vpop.f32.mrb[112].mxu0  ;;  %14061 = vmatprep.subr.bf16.mxu1 %v14060_v51 }
0x1c92   :  { %v10464_v40 = vpop.f32.mrb[113].mxu0  ;;  %14063 = vmatpush3.bf16.msra.mxu1 %v14060_v51 }
0x1c93   :  { %v14064_v46 = vpack.c.bf16 %v13553_v44, %v10464_v40 }
0x1c95   :  { %14065 = vmatprep.subr.bf16.mxu1 %v14064_v46 }
0x1c96   :  { %14067 = vmatpush3.bf16.msra.mxu1 %v14064_v46 }
0x1c99   :  { %13563 = vmatmul.mubr.msk.f32.vlgmr.msra.gmra.mrb[90].mxu1 %vm990_vm8, %v10474_v4 }
0x1c9a   :  { %13565 = vmatprep.mubr.msk.f32.mxu1 %vm990_vm8, %v10475_v47 }
0x1c9d   :  { %13566 = vmatmul.mubr.msk.f32.gmra.mrb[92].mxu1 %vm990_vm8, %v10476_v49  ;;  %v13586_v6 = vpop.f32.mrb[114].mxu0 }
0x1c9e   :  { %v10771_v27 = vpop.f32.mrb[115].mxu0  ;;  %13568 = vmatprep.mubr.msk.f32.mxu1 %vm990_vm8, %v10477_v57 }
0x1c9f   :  { %v14068_v63 = vpack.c.bf16 %v13586_v6, %v10771_v27 }
0x1ca1   :  { %13569 = vmatmul.mubr.msk.f32.gmra.mrb[94].mxu1 %vm990_vm8, %v10478_v41  ;;  %v13589_v42 = vpop.f32.mrb[116].mxu0  ;;  %14069 = vmatprep.subr.bf16.mxu1 %v14068_v63 }
0x1ca2   :  { %v10781_v8 = vpop.f32.mrb[117].mxu0  ;;  %14071 = vmatpush3.bf16.msra.mxu1 %v14068_v63  ;;  %13571 = vmatprep.mubr.msk.f32.mxu1 %vm990_vm8, %v10479_v7 }
0x1ca3   :  { %v14072_v45 = vpack.c.bf16 %v13589_v42, %v10781_v8 }
0x1ca5   :  { %13572 = vmatmul.mubr.msk.f32.gmra.mrb[96].mxu1 %vm990_vm8, %v10480_v5  ;;  %14073 = vmatprep.subr.bf16.mxu1 %v14072_v45 }
0x1ca6   :  { %14075 = vmatpush3.bf16.msra.mxu1 %v14072_v45  ;;  %13598 = vmatprep.mubr.msk.f32.mxu1 %vm990_vm8, %v11832_v9 }
0x1ca9   :  { %13599 = vmatmul.mubr.msk.f32.vlgmr.msra.gmra.mrb[90].mxu1 %vm990_vm8, %v11833_v29 }
0x1caa   :  { %13601 = vmatprep.mubr.msk.f32.mxu1 %vm990_vm8, %v11834_v12 }
0x1cad   :  { %13602 = vmatmul.mubr.msk.f32.gmra.mrb[92].mxu1 %vm990_vm8, %v11835_v15  ;;  %v13622_v48 = vpop.f32.mrb[118].mxu0 }
0x1cae   :  { %v11088_v17 = vpop.f32.mrb[119].mxu0  ;;  %13604 = vmatprep.mubr.msk.f32.mxu1 %vm990_vm8, %v11836_v16 }
0x1caf   :  { %v14076_v20 = vpack.c.bf16 %v13622_v48, %v11088_v17 }
0x1cb1   :  { %13605 = vmatmul.mubr.msk.f32.gmra.mrb[94].mxu1 %vm990_vm8, %v11837_v18  ;;  %v13625_v23 = vpop.f32.mrb[120].mxu0  ;;  %14077 = vmatprep.subr.bf16.mxu1 %v14076_v20 }
0x1cb2   :  { %v11098_v24 = vpop.f32.mrb[121].mxu0  ;;  %14079 = vmatpush3.bf16.msra.mxu1 %v14076_v20  ;;  %13607 = vmatprep.mubr.msk.f32.mxu1 %vm990_vm8, %v11838_v22 }
0x1cb3   :  { %v14080_v28 = vpack.c.bf16 %v13625_v23, %v11098_v24 }
0x1cb5   :  { %13608 = vmatmul.mubr.msk.f32.gmra.mrb[96].mxu1 %vm990_vm8, %v11839_v25  ;;  %14081 = vmatprep.subr.bf16.mxu1 %v14080_v28 }
0x1cb6   :  { %14083 = vmatpush3.bf16.msra.mxu1 %v14080_v28  ;;  %13634 = vmatprep.mubr.msk.f32.mxu1 %vm990_vm8, %v11858_v30 }
0x1cb9   :  { %13635 = vmatmul.mubr.msk.f32.vlgmr.msra.gmra.mrb[90].mxu1 %vm990_vm8, %v11859_v13 }
0x1cba   :  { %13637 = vmatprep.mubr.msk.f32.mxu1 %vm990_vm8, %v11860_v14 }
0x1cbd   :  { %13638 = vmatmul.mubr.msk.f32.gmra.mrb[92].mxu1 %vm990_vm8, %v11861_v32 }
0x1cbe   :  { %13640 = vmatprep.mubr.msk.f32.mxu1 %vm990_vm8, %v11862_v10 }
0x1cc1   :  { %13641 = vmatmul.mubr.msk.f32.gmra.mrb[94].mxu1 %vm990_vm8, %v11863_v33 }
0x1cc2   :  { %13643 = vmatprep.mubr.msk.f32.mxu1 %vm990_vm8, %v11864_v35 }
0x1cc5   :  { %13644 = vmatmul.mubr.msk.f32.gmra.mrb[96].mxu1 %vm990_vm8, %v11865_v36 }
0x1d8c   :  { %v13636_v52 = vpop.f32.mrb[90].mxu1 }
0x1d8d   :  { %v14120_v53 = vadd.f32 %v13636_v52, %v10282_v38  ;;  %v11205_v54 = vpop.f32.mrb[91].mxu1 }
0x1d8e   :  { %v14121_v55 = vadd.f32 %v11205_v54, %v10281_v50 }
0x1d8f   :  { %11875 = vst.msk [vmem:[%s15262_s2 + $0x48] sm:$0xff] %vm181_vm1, %v14120_v53 }
0x1d90   :  { %11874 = vst.msk [vmem:[%s15262_s2 + $0x40] sm:$0xff] %vm181_vm1, %v14121_v55  ;;  %v13639_v31 = vpop.f32.mrb[92].mxu1 }
0x1d91   :  { %v14122_v59 = vadd.f32 %v13639_v31, %v10284_v56  ;;  %v11215_v60 = vpop.f32.mrb[93].mxu1 }
0x1d92   :  { %v14123_v61 = vadd.f32 %v11215_v60, %v10283_v58 }
0x1d93   :  { %11877 = vst.msk [vmem:[%s15262_s2 + $0x58] sm:$0xff] %vm181_vm1, %v14122_v59 }
0x1d94   :  { %11876 = vst.msk [vmem:[%s15262_s2 + $0x50] sm:$0xff] %vm181_vm1, %v14123_v61  ;;  %v13642_v37 = vpop.f32.mrb[94].mxu1 }
0x1d95   :  { %v14124_v1 = vadd.f32 %v13642_v37, %v10286_v62  ;;  %v11225_v2 = vpop.f32.mrb[95].mxu1 }
0x1d96   :  { %v14125_v19 = vadd.f32 %v11225_v2, %v10285_v0 }
0x1d97   :  { %11879 = vst.msk [vmem:[%s15262_s2 + $0x68] sm:$0xff] %vm181_vm1, %v14124_v1 }
0x1d98   :  { %11878 = vst.msk [vmem:[%s15262_s2 + $0x60] sm:$0xff] %vm181_vm1, %v14125_v19  ;;  %v13645_v3 = vpop.f32.mrb[96].mxu1 }
0x1d99   :  { %v14126_v26 = vadd.f32 %v13645_v3, %v10288_v43  ;;  %v11235_v11 = vpop.f32.mrb[97].mxu1 }
0x1d9a   :  { %v14127_v34 = vadd.f32 %v11235_v11, %v10287_v21 }
0x1d9b   :  { %11881 = vst.msk [vmem:[%s15262_s2 + $0x78] sm:$0xff] %vm181_vm1, %v14126_v26 }
0x1d9c   :  { %11880 = vst.msk [vmem:[%s15262_s2 + $0x70] sm:$0xff] %vm181_vm1, %v14127_v34 }

</bundles_post_ra>
